<compile_context>
chip_gen: v7x
topology: tpu7x:2x2x1
jax: 0.10.0
libtpu: 0.0.40
codegen_flags: <defaults>
</compile_context>

<pallas_src>
import functools

import jax
import jax.numpy as jnp
from jax.experimental import pallas as pl
from jax.experimental.pallas import tpu as pltpu


def _value_head_kernel(x_ref, w1_ref, b1_ref, w2_ref, b2_ref, o_ref):
    # x_ref:  (row_tile, H)    compute dtype
    # w1_ref: (H, 1024)        compute dtype
    # b1_ref: (1, 1024)        f32
    # w2_ref: (1, 1024)        f32   (second Linear's weight as a row vector)
    # b2_ref: (1, 1)           f32
    # o_ref:  (1, row_tile)    f32   (lane-dense output row for this tile)
    h = jnp.dot(x_ref[...], w1_ref[...], preferred_element_type=jnp.float32)
    h = jnp.tanh(h + b1_ref[...])                     # (row_tile, 1024) f32, EUP
    # Second matmul has output width 1 -> do it on VPU (mul) + XLU (lane reduce).
    v = jnp.sum(h * w2_ref[...], axis=-1) + b2_ref[0, 0]   # (row_tile,)
    o_ref[...] = v.reshape(1, -1).astype(o_ref.dtype)


@functools.partial(jax.jit, static_argnames=("row_tile", "compute_dtype"))
def value_head_forward(hidden, w1, b1, w2, b2, *, row_tile=256,
                       compute_dtype=None):
    """hidden: (B, S, H) -> (B, S) float32 values (matches the PyTorch module)."""
    B, S, H = hidden.shape
    inner = w1.shape[1]                       # 1024
    N = B * S
    num_tiles = pl.cdiv(N, row_tile)
    n_pad = num_tiles * row_tile

    cdtype = jnp.dtype(compute_dtype) if compute_dtype is not None else hidden.dtype

    x = hidden.reshape(N, H).astype(cdtype)
    if n_pad != N:
        x = jnp.pad(x, ((0, n_pad - N), (0, 0)))

    w1c = w1.astype(cdtype)                        # (H, 1024) MXU operand
    b1_2d = b1.reshape(1, inner).astype(jnp.float32)
    w2_row = w2.reshape(1, inner).astype(jnp.float32)
    b2_2d = b2.reshape(1, 1).astype(jnp.float32)

    itemsize = jnp.dtype(cdtype).itemsize
    cost = pl.CostEstimate(
        flops=2 * n_pad * H * inner + 2 * n_pad * inner,
        transcendentals=n_pad * inner,                      # tanh
        bytes_accessed=(n_pad * H * itemsize                # x stream
                        + H * inner * itemsize              # W1 (resident)
                        + inner * 4 + inner * 4 + 4         # b1, w2, b2
                        + n_pad * 4),                       # output
    )

    out = pl.pallas_call(
        _value_head_kernel,
        out_shape=jax.ShapeDtypeStruct((1, n_pad), jnp.float32),
        grid_spec=pltpu.PrefetchScalarGridSpec(
            num_scalar_prefetch=0,
            grid=(num_tiles,),
            in_specs=[
                pl.BlockSpec((row_tile, H), lambda i: (i, 0)),   # x row tile
                pl.BlockSpec((H, inner), lambda i: (0, 0)),      # W1 (resident)
                pl.BlockSpec((1, inner), lambda i: (0, 0)),      # b1
                pl.BlockSpec((1, inner), lambda i: (0, 0)),      # w2 row
                pl.BlockSpec((1, 1), lambda i: (0, 0)),          # b2
            ],
            out_specs=pl.BlockSpec((1, row_tile), lambda i: (0, i)),
        ),
        compiler_params=pltpu.CompilerParams(
            dimension_semantics=("parallel",),
            vmem_limit_bytes=64 * 1024 * 1024,
        ),
        cost_estimate=cost,
    )(x, w1c, b1_2d, w2_row, b2_2d)

    # Drop pad rows and restore (B, S)  (== squeeze(-1) of the PyTorch module).
    return out.reshape(n_pad)[:N].reshape(B, S)


def init_value_head_params(key, hidden_size, inner=1024):
    """Deterministic init mimicking torch.nn.Linear default (U[-1/sqrt(fan_in), +])."""
    k1, k2, k3, k4 = jax.random.split(key, 4)
    lim1 = 1.0 / jnp.sqrt(hidden_size)
    lim2 = 1.0 / jnp.sqrt(inner)
    w1 = jax.random.uniform(k1, (hidden_size, inner), jnp.float32, -lim1, lim1)
    b1 = jax.random.uniform(k2, (inner,), jnp.float32, -lim1, lim1)
    w2 = jax.random.uniform(k3, (inner, 1), jnp.float32, -lim2, lim2)
    b2 = jax.random.uniform(k4, (1,), jnp.float32, -lim2, lim2)
    return w1, b1, w2, b2


if __name__ == "__main__":
    key = jax.random.PRNGKey(0)
    k_in, k_par = jax.random.split(key)

    B, S, H = 2, 8, 32
    hidden = jax.random.normal(k_in, (B, S, H), dtype=jnp.float32)
    w1, b1, w2, b2 = init_value_head_params(k_par, H)

    values = value_head_forward(hidden, w1, b1, w2, b2)
    values = jax.block_until_ready(values)

    # Reference check in plain JAX (same math as the PyTorch module).
    ref = (jnp.tanh(hidden.reshape(-1, H) @ w1 + b1) @ w2 + b2).reshape(B, S)
    assert values.shape == (B, S)
    assert jnp.allclose(values, ref, atol=1e-4, rtol=1e-4)

    print("KERNEL_OK")
</pallas_src>

<mosaic_0001>
module attributes {stable_mosaic.version = 11 : i64} {
  func.func @_value_head_kernel(%arg0: i32, %arg1: memref<256x32xf32, #tpu.memory_space<vmem>>, %arg2: memref<32x1024xf32, #tpu.memory_space<vmem>>, %arg3: memref<1x1024xf32, #tpu.memory_space<vmem>>, %arg4: memref<1x1024xf32, #tpu.memory_space<vmem>>, %arg5: memref<1x1xf32, #tpu.memory_space<vmem>>, %arg6: memref<1x256xf32, #tpu.memory_space<vmem>>) attributes {dimension_semantics = [#tpu.dimension_semantics<parallel>], iteration_bounds = array<i64: 1>, scalar_prefetch = 0 : i64, scratch_operands = 0 : i64, tpu.core_type = #tpu.core_type<tc>, window_params = [{transform_indices = @transform_0, window_bounds = array<i64: 256, 32>}, {pipeline_mode = #tpu.pipeline_mode<synchronous>, transform_indices = @transform_1, window_bounds = array<i64: 32, 1024>}, {pipeline_mode = #tpu.pipeline_mode<synchronous>, transform_indices = @transform_2, window_bounds = array<i64: 1, 1024>}, {pipeline_mode = #tpu.pipeline_mode<synchronous>, transform_indices = @transform_3, window_bounds = array<i64: 1, 1024>}, {pipeline_mode = #tpu.pipeline_mode<synchronous>, transform_indices = @transform_4, window_bounds = array<i64: 1, 1>}, {transform_indices = @transform_5, window_bounds = array<i64: 1, 256>}]} {
    %c0 = arith.constant 0 : index
    %c0_0 = arith.constant 0 : index
    %0 = vector.load %arg1[%c0, %c0_0] : memref<256x32xf32, #tpu.memory_space<vmem>>, vector<256x32xf32>
    %c0_1 = arith.constant 0 : index
    %c0_2 = arith.constant 0 : index
    %1 = vector.load %arg2[%c0_1, %c0_2] : memref<32x1024xf32, #tpu.memory_space<vmem>>, vector<32x1024xf32>
    %cst = arith.constant dense<0.000000e+00> : vector<256x1024xf32>
    %2 = tpu.matmul %0, %1, %cst {dimension_numbers = #tpu.dot_dimension_numbers<[1], [0], [0], [1], [0, 0, 1, 1], [], []>} : vector<256x32xf32>, vector<32x1024xf32>, vector<256x1024xf32> -> vector<256x1024xf32>
    %c0_3 = arith.constant 0 : index
    %c0_4 = arith.constant 0 : index
    %3 = vector.load %arg3[%c0_3, %c0_4] : memref<1x1024xf32, #tpu.memory_space<vmem>>, vector<1x1024xf32>
    %4 = vector.broadcast %3 : vector<1x1024xf32> to vector<256x1024xf32>
    %5 = arith.addf %2, %4 : vector<256x1024xf32>
    %6 = math.tanh %5 : vector<256x1024xf32>
    %c0_5 = arith.constant 0 : index
    %c0_6 = arith.constant 0 : index
    %7 = vector.load %arg4[%c0_5, %c0_6] : memref<1x1024xf32, #tpu.memory_space<vmem>>, vector<1x1024xf32>
    %8 = vector.broadcast %7 : vector<1x1024xf32> to vector<256x1024xf32>
    %9 = arith.mulf %6, %8 : vector<256x1024xf32>
    %cst_7 = arith.constant dense<0.000000e+00> : vector<256xf32>
    %10 = vector.multi_reduction <add>, %9, %cst_7 [1] : vector<256x1024xf32> to vector<256xf32>
    %c0_8 = arith.constant 0 : index
    %c0_9 = arith.constant 0 : index
    %11 = vector.load %arg5[%c0_8, %c0_9] : memref<1x1xf32, #tpu.memory_space<vmem>>, vector<1x1xf32>
    %12 = vector.extract %11[0, 0] : f32 from vector<1x1xf32>
    %13 = vector.broadcast %12 : f32 to vector<256xf32>
    %14 = arith.addf %10, %13 : vector<256xf32>
    %15 = vector.shape_cast %14 : vector<256xf32> to vector<1x256xf32>
    %c0_10 = arith.constant 0 : index
    %c0_11 = arith.constant 0 : index
    %16 = vector.load %arg6[%c0_10, %c0_11] : memref<1x256xf32, #tpu.memory_space<vmem>>, vector<1x256xf32>
    tpu.vector_store %arg6[%c0_10, %c0_11], %15 {strides = array<i32>} : memref<1x256xf32, #tpu.memory_space<vmem>>, vector<1x256xf32>,
    return
  }
  func.func @transform_0(%arg0: i32) -> (i32, i32) {
    %c0_i32 = arith.constant 0 : i32
    %c0_i32_0 = arith.constant 0 : i32
    return %arg0, %c0_i32 : i32, i32
  }
  func.func @transform_1(%arg0: i32) -> (i32, i32) {
    %c0_i32 = arith.constant 0 : i32
    %c0_i32_0 = arith.constant 0 : i32
    %c0_i32_1 = arith.constant 0 : i32
    return %c0_i32, %c0_i32_0 : i32, i32
  }
  func.func @transform_2(%arg0: i32) -> (i32, i32) {
    %c0_i32 = arith.constant 0 : i32
    %c0_i32_0 = arith.constant 0 : i32
    %c0_i32_1 = arith.constant 0 : i32
    return %c0_i32, %c0_i32_0 : i32, i32
  }
  func.func @transform_3(%arg0: i32) -> (i32, i32) {
    %c0_i32 = arith.constant 0 : i32
    %c0_i32_0 = arith.constant 0 : i32
    %c0_i32_1 = arith.constant 0 : i32
    return %c0_i32, %c0_i32_0 : i32, i32
  }
  func.func @transform_4(%arg0: i32) -> (i32, i32) {
    %c0_i32 = arith.constant 0 : i32
    %c0_i32_0 = arith.constant 0 : i32
    %c0_i32_1 = arith.constant 0 : i32
    return %c0_i32, %c0_i32_0 : i32, i32
  }
  func.func @transform_5(%arg0: i32) -> (i32, i32) {
    %c0_i32 = arith.constant 0 : i32
    %c0_i32_0 = arith.constant 0 : i32
    return %c0_i32, %arg0 : i32, i32
  }
}

</mosaic_0001>

<bundles_post_ra>
// kernel: value_head_forward.1
= control target key start
LH: loop header
LB: loop body
LE: loop exit
PB: predicated region body
PF: predicated region fallthrough
CT: control target
= control target key end

     0   :  { %s8055_s0 = inlined_call_operand.hbm [shape: f32[256,32], index: 0, kind: input, shape index: {}]   ;;  %s8056_s1 = inlined_call_operand.hbm [shape: f32[32,1024], index: 1, kind: input, shape index: {}]   ;;  %s8057_s2 = inlined_call_operand.hbm [shape: f32[1,1024], index: 2, kind: input, shape index: {}]   ;;  %s8058_s3 = inlined_call_operand.hbm [shape: f32[1,1024], index: 3, kind: input, shape index: {}]   ;;  %s8059_s4 = inlined_call_operand.<no memory space> [shape: f32[1,1], index: 4, kind: input, shape index: {}]   ;;  %s8060_s5 = inlined_call_operand.hbm [shape: f32[1,256], index: 5, kind: output, shape index: {}]  }
   0x1   :  { %v10_v0 = vstv %s8059_s4 }
   0x2   :  { %11 = vst [vmem:[#allocation2] sm:$0x1] %v10_v0 }
   0x3   :  { %12 = vsyncpa [#allocation4], 0 }
   0x4   :  { %13 = vsyncpa [#allocation7], 0 }
   0x5   :  { %14 = vsyncpa [#allocation10], 0 }
   0x6   :  { %15 = vsyncpa [#allocation5], 0  ;;  %s5938_s20 = smov [#allocation6]   ;;  %s5820_s24 = scalar_lea.hbm %s8056_s1, 4096 }
   0x7   :  { %s33_s21 = sshll.u32 %s5938_s20, 4  ;;  %p5821_p0 = scmp.ne.s32.totalorder %s8056_s1, %s5820_s24  ;;  %s34_s21 = int_to_ptr.vmem [resolvable:$true] %s33_s21 }
   0x8   :  { %p5824_p1 = scmp.lt.u32.totalorder %s5820_s24, %s8056_s1 }
   0xa   :  { %p5826_p2 = pnand %p5824_p1, %p5821_p0 }
   0xc   :  { %5829 = shalt.err (!%p5826_p2)
}
   0xd   :  { %s5830_s4 = scalar_lea.vmem %s34_s21, 4096  ;;  %p5835_p4 = scmp.lt.s32.totalorder %s34_s21, %s34_s21 }
   0xe   :  { %p5831_p3 = scmp.ne.s32.totalorder %s34_s21, %s5830_s4  ;;  %p5836_p5 = scmp.lt.s32.totalorder %s5830_s4, %s5830_s4 }
  0x10   :  { %p5837_p6 = por %p5836_p5, %p5835_p4 }
  0x12   :  { %p5838_p7 = pnand %p5837_p6, %p5831_p3 }
  0x14   :  { %5841 = shalt.err (!%p5838_p7)
}
  0x15   :  { %s5939_s29 = smov 1024   ;;  %s5940_s30 = smov 64  }
  0x16   :  { %39 = dma.hbm_to_vmem [thread:$0]  %s8056_s1, 4096, %s34_s21, [#allocation7], %s5939_s29, %s5939_s29, %s5940_s30  }
  0x17   :  { %s5941_s8 = smov [#allocation3]   ;;  %s5842_s12 = scalar_lea.hbm %s8055_s0, 4096 }
  0x18   :  { %s21_s9 = sshll.u32 %s5941_s8, 4  ;;  %p5843_p8 = scmp.ne.s32.totalorder %s8055_s0, %s5842_s12  ;;  %s22_s9 = int_to_ptr.vmem [resolvable:$true] %s21_s9 }
  0x19   :  { %p5846_p9 = scmp.lt.u32.totalorder %s5842_s12, %s8055_s0 }
  0x1b   :  { %p5848_p10 = pnand %p5846_p9, %p5843_p8 }
  0x1d   :  { %5851 = shalt.err (!%p5848_p10)
}
  0x1e   :  { %s5852_s17 = scalar_lea.vmem %s22_s9, 4096  ;;  %p5857_p12 = scmp.lt.s32.totalorder %s22_s9, %s22_s9 }
  0x1f   :  { %p5853_p11 = scmp.ne.s32.totalorder %s22_s9, %s5852_s17  ;;  %p5858_p13 = scmp.lt.s32.totalorder %s5852_s17, %s5852_s17 }
  0x21   :  { %p5859_p0 = por %p5858_p13, %p5857_p12 }
  0x23   :  { %p5860_p1 = pnand %p5859_p0, %p5853_p11 }
  0x25   :  { %5863 = shalt.err (!%p5860_p1)
}
  0x26   :  { %s5942_s1 = smov 128   ;;  %s5943_s18 = smov 8  }
  0x27   :  { %27 = dma.hbm_to_vmem [thread:$0]  %s8055_s0, 4096, %s22_s9, [#allocation4], %s5942_s1, %s5942_s1, %s5943_s18  }
  0x28   :  { %s5944_s21 = smov [#allocation8]   ;;  %s5945_s23 = smov [#allocation9]  }
  0x29   :  { %s46_s22 = sshll.u32 %s5944_s21, 4  ;;  %s56_s24 = sshll.u32 %s5945_s23, 4  ;;  %s47_s22 = int_to_ptr.vmem [resolvable:$true] %s46_s22  ;;  %s57_s24 = int_to_ptr.vmem [resolvable:$true] %s56_s24 }
  0x2a   :  { %s5864_s27 = scalar_lea.hbm %s8057_s2, 128 }
  0x2b   :  { %p5865_p2 = scmp.ne.s32.totalorder %s8057_s2, %s5864_s27  ;;  %p5868_p3 = scmp.lt.u32.totalorder %s5864_s27, %s8057_s2 }
  0x2d   :  { %p5870_p4 = pnand %p5868_p3, %p5865_p2 }
  0x2f   :  { %5873 = shalt.err (!%p5870_p4)
}
  0x30   :  { %s5874_s0 = scalar_lea.vmem %s47_s22, 128  ;;  %p5879_p6 = scmp.lt.s32.totalorder %s47_s22, %s47_s22 }
  0x31   :  { %p5875_p5 = scmp.ne.s32.totalorder %s47_s22, %s5874_s0  ;;  %p5880_p7 = scmp.lt.s32.totalorder %s5874_s0, %s5874_s0 }
  0x33   :  { %p5881_p8 = por %p5880_p7, %p5879_p6 }
  0x35   :  { %p5882_p9 = pnand %p5881_p8, %p5875_p5 }
  0x37   :  { %5885 = shalt.err (!%p5882_p9)
}
  0x38   :  { %49 = dma.hbm_to_vmem [thread:$0]  %s8057_s2, 128, %s47_s22, [#allocation7]  }
  0x39   :  { %s5886_s10 = scalar_lea.hbm %s8058_s3, 128 }
  0x3a   :  { %p5887_p10 = scmp.ne.s32.totalorder %s8058_s3, %s5886_s10  ;;  %p5890_p11 = scmp.lt.u32.totalorder %s5886_s10, %s8058_s3 }
  0x3c   :  { %p5892_p12 = pnand %p5890_p11, %p5887_p10 }
  0x3e   :  { %5895 = shalt.err (!%p5892_p12)
}
  0x3f   :  { %s5896_s15 = scalar_lea.vmem %s57_s24, 128  ;;  %p5901_p0 = scmp.lt.s32.totalorder %s57_s24, %s57_s24 }
  0x40   :  { %p5897_p13 = scmp.ne.s32.totalorder %s57_s24, %s5896_s15  ;;  %p5902_p1 = scmp.lt.s32.totalorder %s5896_s15, %s5896_s15 }
  0x42   :  { %p5903_p2 = por %p5902_p1, %p5901_p0 }
  0x44   :  { %p5904_p3 = pnand %p5903_p2, %p5897_p13 }
  0x46   :  { %5907 = shalt.err (!%p5904_p3)
}
  0x47   :  { %59 = dma.hbm_to_vmem [thread:$0]  %s8058_s3, 128, %s57_s24, [#allocation10]  }
  0x48   :  { %5930 = dma.done.wait [#allocation4], 4096  }
  0x49   :  { %5931 = vsyncadd [#allocation4], 4294963200 }
  0x4a   :  { %5932 = dma.done.wait [#allocation7], 4224  }
  0x4b   :  { %5933 = vsyncadd [#allocation7], 4294963072 }
  0x4c   :  { %5934 = dma.done.wait [#allocation10], 128  }
  0x4d   :  { %5935 = vsyncadd [#allocation10], 4294967168  ;;  %v5946_v1 = vmov 0.0   ;;  %v107_v2 = vld [vmem:[#allocation6 + $0x8] sm:$0xff]  ;;  %v106_v4 = vld [vmem:[#allocation6] sm:$0xff]  ;;  %vm180_vm0 = vcmask 261120  }
  0x4e   :  { %341 = vmatprep.mubr.f32.mxu0 %v5946_v1  ;;  %598 = vmatprep.mubr.f32.mxu1 %v5946_v1  ;;  %v115_v3 = vld [vmem:[#allocation6 + $0x48] sm:$0xff]  ;;  %v114_v6 = vld [vmem:[#allocation6 + $0x40] sm:$0xff]  ;;  %v109_v7 = vld [vmem:[#allocation6 + $0x18] sm:$0xff]  ;;  %vm4913_vm1 = vcmask 130112   ;;  %vm4920_vm2 = vcmask 195712   ;;  %vm4927_vm3 = vcmask 261312  }
  0x4f   :  { %v5258_v5 = vpack.c.bf16 %v115_v3, %v107_v2  ;;  %v117_v8 = vld [vmem:[#allocation6 + $0x58] sm:$0xff]  ;;  %v5260_v9 = vpack.c.bf16 %v114_v6, %v106_v4  ;;  %v123_v11 = vld [vmem:[#allocation6 + $0x88] sm:$0xff]  ;;  %v108_v13 = vld [vmem:[#allocation6 + $0x10] sm:$0xff]  ;;  %vm4934_vm4 = vcmask 326912   ;;  %vm4941_vm5 = vcmask 392512   ;;  %s5949_s17 = smov [#allocation11]  }
  0x50   :  { %v5266_v10 = vpack.c.bf16 %v117_v8, %v109_v7  ;;  %v131_v12 = vld [vmem:[#allocation6 + $0xc8] sm:$0xff]  ;;  %v116_v15 = vld [vmem:[#allocation6 + $0x50] sm:$0xff]  ;;  %v122_v16 = vld [vmem:[#allocation6 + $0x80] sm:$0xff]  ;;  %vm4948_vm6 = vcmask 458112   ;;  %vm4955_vm7 = vcmask 523712   ;;  %vm4962_vm8 = vcmask 589312  }
  0x51   :  { %5259 = vmatprep.subr.bf16.mxu0 %v5258_v5  ;;  %v5262_v14 = vpack.c.bf16 %v131_v12, %v123_v11  ;;  %v130_v17 = vld [vmem:[#allocation6 + $0xc0] sm:$0xff]  ;;  %v5268_v18 = vpack.c.bf16 %v116_v15, %v108_v13  ;;  %v125_v20 = vld [vmem:[#allocation6 + $0x98] sm:$0xff]  ;;  %v124_v23 = vld [vmem:[#allocation6 + $0x90] sm:$0xff]  ;;  %vm4969_vm9 = vcmask 654912   ;;  %vm4976_vm10 = vcmask 720512   ;;  %s5119_s1 = sshll.u32 %s5949_s17, 4  ;;  %s5120_s1 = int_to_ptr.vmem [resolvable:$true] %s5119_s1 }
  0x52   :  { %5261 = vmatpush1.bf16.msra.mxu0 %v5260_v9  ;;  %5267 = vmatprep.subr.bf16.mxu1 %v5266_v10  ;;  %v5264_v19 = vpack.c.bf16 %v130_v17, %v122_v16  ;;  %v133_v21 = vld [vmem:[#allocation6 + $0xd8] sm:$0xff]  ;;  %v132_v24 = vld [vmem:[#allocation6 + $0xd0] sm:$0xff]  ;;  %v111_v25 = vld [vmem:[#allocation6 + $0x28] sm:$0xff]  ;;  %vm4983_vm11 = vcmask 786112   ;;  %vm4990_vm12 = vcmask 851712   ;;  %vm4997_vm13 = vcmask 917312   ;;  %p5913_p5 = scmp.lt.s32.totalorder %s5120_s1, %s5120_s1 }
  0x53   :  { %5263 = vmatprep.subr.bf16.mxu0 %v5262_v14  ;;  %v5270_v22 = vpack.c.bf16 %v133_v21, %v125_v20  ;;  %5269 = vmatpush1.bf16.msra.mxu1 %v5268_v18  ;;  %v5272_v26 = vpack.c.bf16 %v132_v24, %v124_v23  ;;  %v119_v27 = vld [vmem:[#allocation6 + $0x68] sm:$0xff]  ;;  %v110_v28 = vld [vmem:[#allocation6 + $0x20] sm:$0xff]  ;;  %v113_v31 = vld [vmem:[#allocation6 + $0x38] sm:$0xff]  ;;  %vm5004_vm14 = vcmask 982912   ;;  %vm5011_vm15 = vcmask 1048512   ;;  %s5908_s18 = scalar_lea.vmem %s5120_s1, 32 }
  0x54   :  { %v118_v29 = vld [vmem:[#allocation6 + $0x60] sm:$0xff]  ;;  %v5274_v30 = vpack.c.bf16 %v119_v27, %v111_v25  ;;  %v121_v32 = vld [vmem:[#allocation6 + $0x78] sm:$0xff]  ;;  %v112_v36 = vld [vmem:[#allocation6 + $0x30] sm:$0xff]  ;;  %p5909_p4 = scmp.ne.s32.totalorder %s5120_s1, %s5908_s18  ;;  %p5914_p6 = scmp.lt.s32.totalorder %s5908_s18, %s5908_s18 }
  0x55   :  { %5271 = vmatprep.subr.bf16.mxu1 %v5270_v22  ;;  %v6033_v33 = vld [vmem:[#allocation3] sm:$0xff]  ;;  %v5276_v34 = vpack.c.bf16 %v118_v29, %v110_v28  ;;  %v5282_v35 = vpack.c.bf16 %v121_v32, %v113_v31  ;;  %v120_v37 = vld [vmem:[#allocation6 + $0x70] sm:$0xff]  ;;  %v6038_v39 = vld [vmem:[#allocation3 + $0x8] sm:$0xff] }
  0x56   :  { %5265 = vmatpush1.bf16.msra.mxu0 %v5264_v19  ;;  %v5284_v38 = vpack.c.bf16 %v120_v37, %v112_v36  ;;  %v127_v40 = vld [vmem:[#allocation6 + $0xa8] sm:$0xff]  ;;  %v126_v42 = vld [vmem:[#allocation6 + $0xa0] sm:$0xff]  ;;  %v129_v46 = vld [vmem:[#allocation6 + $0xb8] sm:$0xff]  ;;  %v8061_v19 = vlaneseq  ;;  %p5915_p7 = por %p5914_p6, %p5913_p5 }
  0x57   :  { %5275 = vmatprep.subr.bf16.mxu0 %v5274_v30  ;;  %5273 = vmatpush1.bf16.msra.mxu1 %v5272_v26  ;;  %v135_v41 = vld [vmem:[#allocation6 + $0xe8] sm:$0xff]  ;;  %v134_v43 = vld [vmem:[#allocation6 + $0xe0] sm:$0xff]  ;;  %v137_v47 = vld [vmem:[#allocation6 + $0xf8] sm:$0xff] }
  0x58   :  { %5283 = vmatprep.subr.bf16.mxu1 %v5282_v35  ;;  %v5278_v44 = vpack.c.bf16 %v135_v41, %v127_v40  ;;  %v5280_v45 = vpack.c.bf16 %v134_v43, %v126_v42  ;;  %v6046_v48 = vld [vmem:[#allocation3 + $0x10] sm:$0xff]  ;;  %v5286_v49 = vpack.c.bf16 %v137_v47, %v129_v46  ;;  %v6054_v53 = vld [vmem:[#allocation3 + $0x18] sm:$0xff]  ;;  %v6062_v54 = vld [vmem:[#allocation3 + $0x20] sm:$0xff]  ;;  %v6400_v20 = vshrl.u32 %v8061_v19, 7  ;;  %p5916_p8 = pnand %p5915_p7, %p5909_p4 }
  0x59   :  { %5130 = vmatmul.mubr.msk.f32.vlgmr.msra.gmra.mrb[0].mxu0 %vm180_vm0, %v6033_v33  ;;  %v128_v50 = vld [vmem:[#allocation6 + $0xb0] sm:$0xff]  ;;  %v6070_v55 = vld [vmem:[#allocation3 + $0x28] sm:$0xff]  ;;  %v6086_v57 = vld [vmem:[#allocation3 + $0x38] sm:$0xff] }
  0x5a   :  { %5277 = vmatpush1.bf16.msra.mxu0 %v5276_v34  ;;  %347 = vmatprep.mubr.f32.mxu0 %v5946_v1  ;;  %v136_v51 = vld [vmem:[#allocation6 + $0xf0] sm:$0xff]  ;;  %v6094_v58 = vld [vmem:[#allocation3 + $0x40] sm:$0xff]  ;;  %v6102_v59 = vld [vmem:[#allocation3 + $0x48] sm:$0xff]  ;;  %8075 = vst [vmem:[#allocation16_spill] sm:$0xff] %v6400_v20  ;;  %v6409_v21 = vsub.s32 0, %v6400_v20  ;;  %v6413_v23 = vsub.s32 1, %v6400_v20 }
  0x5b   :  { %5162 = vmatmul.mubr.msk.f32.vlgmr.msra.gmra.mrb[0].mxu1 %vm180_vm0, %v6033_v33  ;;  %5279 = vmatprep.subr.bf16.mxu0 %v5278_v44  ;;  %v5288_v52 = vpack.c.bf16 %v136_v51, %v128_v50  ;;  %v6078_v56 = vld [vmem:[#allocation3 + $0x30] sm:$0xff]  ;;  %v6118_v61 = vld [vmem:[#allocation3 + $0x58] sm:$0xff]  ;;  %v6126_v62 = vld [vmem:[#allocation3 + $0x60] sm:$0xff]  ;;  %v6418_v24 = vsub.s32 2, %v6400_v20  ;;  %v6422_v25 = vsub.s32 3, %v6400_v20 }
  0x5c   :  { %5285 = vmatpush1.bf16.msra.mxu1 %v5284_v38  ;;  %604 = vmatprep.mubr.f32.mxu1 %v5946_v1  ;;  %v6110_v60 = vld [vmem:[#allocation3 + $0x50] sm:$0xff]  ;;  %v6134_v63 = vld [vmem:[#allocation3 + $0x68] sm:$0xff]  ;;  %v6150_v2 = vld [vmem:[#allocation3 + $0x78] sm:$0xff]  ;;  %8076 = vst [vmem:[#allocation17_spill] sm:$0xff] %v6409_v21 }
  0x5d   :  { %5131 = vmatmul.mubr.msk.f32.gmra.mrb[2].mxu0 %vm180_vm0, %v6038_v39  ;;  %5287 = vmatprep.subr.bf16.mxu1 %v5286_v49  ;;  %v6142_v0 = vld [vmem:[#allocation3 + $0x70] sm:$0xff]  ;;  %v6158_v3 = vld [vmem:[#allocation3 + $0x80] sm:$0xff]  ;;  %v6166_v4 = vld [vmem:[#allocation3 + $0x88] sm:$0xff]  ;;  %8077 = vst [vmem:[#allocation18_spill] sm:$0xff] %v6413_v23 }
  0x5e   :  { %353 = vmatprep.mubr.f32.mxu0 %v5946_v1  ;;  %5281 = vmatpush1.bf16.msra.mxu0 %v5280_v45  ;;  %v6174_v5 = vld [vmem:[#allocation3 + $0x90] sm:$0xff]  ;;  %v6182_v6 = vld [vmem:[#allocation3 + $0x98] sm:$0xff]  ;;  %v6190_v7 = vld [vmem:[#allocation3 + $0xa0] sm:$0xff]  ;;  %8078 = vst [vmem:[#allocation19_spill] sm:$0xff] %v6418_v24 }
  0x5f   :  { %5163 = vmatmul.mubr.msk.f32.gmra.mrb[2].mxu1 %vm180_vm0, %v6038_v39  ;;  %v6198_v8 = vld [vmem:[#allocation3 + $0xa8] sm:$0xff]  ;;  %v6206_v9 = vld [vmem:[#allocation3 + $0xb0] sm:$0xff]  ;;  %v6214_v10 = vld [vmem:[#allocation3 + $0xb8] sm:$0xff]  ;;  %8079 = vst [vmem:[#allocation20_spill] sm:$0xff] %v6422_v25 }
  0x60   :  { %610 = vmatprep.mubr.f32.mxu1 %v5946_v1  ;;  %5289 = vmatpush1.bf16.msra.mxu1 %v5288_v52  ;;  %v6222_v11 = vld [vmem:[#allocation3 + $0xc0] sm:$0xff]  ;;  %v6230_v12 = vld [vmem:[#allocation3 + $0xc8] sm:$0xff]  ;;  %v6238_v13 = vld [vmem:[#allocation3 + $0xd0] sm:$0xff] }
  0x61   :  { %5132 = vmatmul.mubr.msk.f32.gmra.mrb[4].mxu0 %vm180_vm0, %v6046_v48  ;;  %v6246_v14 = vld [vmem:[#allocation3 + $0xd8] sm:$0xff]  ;;  %v6254_v15 = vld [vmem:[#allocation3 + $0xe0] sm:$0xff]  ;;  %v6262_v16 = vld [vmem:[#allocation3 + $0xe8] sm:$0xff] }
  0x62   :  { %359 = vmatprep.mubr.f32.mxu0 %v5946_v1  ;;  %v6270_v17 = vld [vmem:[#allocation3 + $0xf0] sm:$0xff]  ;;  %v6278_v18 = vld [vmem:[#allocation3 + $0xf8] sm:$0xff]  ;;  %v138_v22 = vld [vmem:[#allocation8] sm:$0xff] }
  0x63   :  { %5164 = vmatmul.mubr.msk.f32.gmra.mrb[4].mxu1 %vm180_vm0, %v6046_v48  ;;  %v6427_v26 = vrot.slane %v138_v22, %v6409_v21  ;;  %v6431_v27 = vrot.slane %v138_v22, %v6413_v23  ;;  %v6436_v28 = vrot.slane %v138_v22, %v6418_v24  ;;  %v6440_v30 = vrot.slane %v138_v22, %v6422_v25  ;;  %v1561_v43 = vld [vmem:[#allocation9] sm:$0xff] }
  0x64   :  { %616 = vmatprep.mubr.f32.mxu1 %v5946_v1  ;;  %v6466_v50 = vrot.slane %v1561_v43, %v6409_v21 }
  0x65   :  { %5133 = vmatmul.mubr.msk.f32.gmra.mrb[6].mxu0 %vm180_vm0, %v6054_v53 }
  0x66   :  { %365 = vmatprep.mubr.f32.mxu0 %v5946_v1 }
  0x67   :  { %5165 = vmatmul.mubr.msk.f32.gmra.mrb[6].mxu1 %vm180_vm0, %v6054_v53 }
  0x68   :  { %622 = vmatprep.mubr.f32.mxu1 %v5946_v1 }
  0x69   :  { %5134 = vmatmul.mubr.msk.f32.gmra.mrb[8].mxu0 %vm180_vm0, %v6062_v54 }
  0x6a   :  { %371 = vmatprep.mubr.f32.mxu0 %v5946_v1 }
  0x6b   :  { %5166 = vmatmul.mubr.msk.f32.gmra.mrb[8].mxu1 %vm180_vm0, %v6062_v54 }
  0x6c   :  { %628 = vmatprep.mubr.f32.mxu1 %v5946_v1 }
  0x6d   :  { %5135 = vmatmul.mubr.msk.f32.gmra.mrb[10].mxu0 %vm180_vm0, %v6070_v55 }
  0x6e   :  { %377 = vmatprep.mubr.f32.mxu0 %v5946_v1 }
  0x6f   :  { %5167 = vmatmul.mubr.msk.f32.gmra.mrb[10].mxu1 %vm180_vm0, %v6070_v55 }
  0x70   :  { %634 = vmatprep.mubr.f32.mxu1 %v5946_v1 }
  0x71   :  { %5136 = vmatmul.mubr.msk.f32.gmra.mrb[12].mxu0 %vm180_vm0, %v6078_v56 }
  0x72   :  { %383 = vmatprep.mubr.f32.mxu0 %v5946_v1 }
  0x73   :  { %5168 = vmatmul.mubr.msk.f32.gmra.mrb[12].mxu1 %vm180_vm0, %v6078_v56 }
  0x74   :  { %640 = vmatprep.mubr.f32.mxu1 %v5946_v1 }
  0x75   :  { %5137 = vmatmul.mubr.msk.f32.gmra.mrb[14].mxu0 %vm180_vm0, %v6086_v57 }
  0x76   :  { %389 = vmatprep.mubr.f32.mxu0 %v5946_v1 }
  0x77   :  { %5169 = vmatmul.mubr.msk.f32.gmra.mrb[14].mxu1 %vm180_vm0, %v6086_v57 }
  0x78   :  { %646 = vmatprep.mubr.f32.mxu1 %v5946_v1 }
  0x79   :  { %5138 = vmatmul.mubr.msk.f32.gmra.mrb[16].mxu0 %vm180_vm0, %v6094_v58 }
  0x7a   :  { %395 = vmatprep.mubr.f32.mxu0 %v5946_v1 }
  0x7b   :  { %5170 = vmatmul.mubr.msk.f32.gmra.mrb[16].mxu1 %vm180_vm0, %v6094_v58 }
  0x7c   :  { %652 = vmatprep.mubr.f32.mxu1 %v5946_v1 }
  0x7d   :  { %5139 = vmatmul.mubr.msk.f32.gmra.mrb[18].mxu0 %vm180_vm0, %v6102_v59 }
  0x7e   :  { %401 = vmatprep.mubr.f32.mxu0 %v5946_v1 }
  0x7f   :  { %5171 = vmatmul.mubr.msk.f32.gmra.mrb[18].mxu1 %vm180_vm0, %v6102_v59 }
  0x80   :  { %658 = vmatprep.mubr.f32.mxu1 %v5946_v1 }
  0x81   :  { %5140 = vmatmul.mubr.msk.f32.gmra.mrb[20].mxu0 %vm180_vm0, %v6110_v60 }
  0x82   :  { %407 = vmatprep.mubr.f32.mxu0 %v5946_v1 }
  0x83   :  { %5172 = vmatmul.mubr.msk.f32.gmra.mrb[20].mxu1 %vm180_vm0, %v6110_v60 }
  0x84   :  { %664 = vmatprep.mubr.f32.mxu1 %v5946_v1 }
  0x85   :  { %5141 = vmatmul.mubr.msk.f32.gmra.mrb[22].mxu0 %vm180_vm0, %v6118_v61 }
  0x86   :  { %413 = vmatprep.mubr.f32.mxu0 %v5946_v1 }
  0x87   :  { %5173 = vmatmul.mubr.msk.f32.gmra.mrb[22].mxu1 %vm180_vm0, %v6118_v61 }
  0x88   :  { %670 = vmatprep.mubr.f32.mxu1 %v5946_v1 }
  0x89   :  { %5142 = vmatmul.mubr.msk.f32.gmra.mrb[24].mxu0 %vm180_vm0, %v6126_v62 }
  0x8a   :  { %419 = vmatprep.mubr.f32.mxu0 %v5946_v1 }
  0x8b   :  { %5174 = vmatmul.mubr.msk.f32.gmra.mrb[24].mxu1 %vm180_vm0, %v6126_v62 }
  0x8c   :  { %676 = vmatprep.mubr.f32.mxu1 %v5946_v1 }
  0x8d   :  { %5143 = vmatmul.mubr.msk.f32.gmra.mrb[26].mxu0 %vm180_vm0, %v6134_v63 }
  0x8e   :  { %425 = vmatprep.mubr.f32.mxu0 %v5946_v1 }
  0x8f   :  { %5175 = vmatmul.mubr.msk.f32.gmra.mrb[26].mxu1 %vm180_vm0, %v6134_v63 }
  0x90   :  { %682 = vmatprep.mubr.f32.mxu1 %v5946_v1 }
  0x91   :  { %5144 = vmatmul.mubr.msk.f32.gmra.mrb[28].mxu0 %vm180_vm0, %v6142_v0 }
  0x92   :  { %431 = vmatprep.mubr.f32.mxu0 %v5946_v1 }
  0x93   :  { %5176 = vmatmul.mubr.msk.f32.gmra.mrb[28].mxu1 %vm180_vm0, %v6142_v0 }
  0x94   :  { %688 = vmatprep.mubr.f32.mxu1 %v5946_v1 }
  0x95   :  { %5145 = vmatmul.mubr.msk.f32.gmra.mrb[30].mxu0 %vm180_vm0, %v6150_v2 }
  0x96   :  { %437 = vmatprep.mubr.f32.mxu0 %v5946_v1 }
  0x97   :  { %5177 = vmatmul.mubr.msk.f32.gmra.mrb[30].mxu1 %vm180_vm0, %v6150_v2 }
  0x98   :  { %694 = vmatprep.mubr.f32.mxu1 %v5946_v1 }
  0x99   :  { %5146 = vmatmul.mubr.msk.f32.gmra.mrb[32].mxu0 %vm180_vm0, %v6158_v3 }
  0x9a   :  { %443 = vmatprep.mubr.f32.mxu0 %v5946_v1 }
  0x9b   :  { %5178 = vmatmul.mubr.msk.f32.gmra.mrb[32].mxu1 %vm180_vm0, %v6158_v3 }
  0x9c   :  { %700 = vmatprep.mubr.f32.mxu1 %v5946_v1 }
  0x9d   :  { %5147 = vmatmul.mubr.msk.f32.gmra.mrb[34].mxu0 %vm180_vm0, %v6166_v4 }
  0x9e   :  { %449 = vmatprep.mubr.f32.mxu0 %v5946_v1 }
  0x9f   :  { %5179 = vmatmul.mubr.msk.f32.gmra.mrb[34].mxu1 %vm180_vm0, %v6166_v4 }
  0xa0   :  { %706 = vmatprep.mubr.f32.mxu1 %v5946_v1 }
  0xa1   :  { %5148 = vmatmul.mubr.msk.f32.gmra.mrb[36].mxu0 %vm180_vm0, %v6174_v5 }
  0xa2   :  { %455 = vmatprep.mubr.f32.mxu0 %v5946_v1 }
  0xa3   :  { %5180 = vmatmul.mubr.msk.f32.gmra.mrb[36].mxu1 %vm180_vm0, %v6174_v5 }
  0xa4   :  { %712 = vmatprep.mubr.f32.mxu1 %v5946_v1 }
  0xa5   :  { %5149 = vmatmul.mubr.msk.f32.gmra.mrb[38].mxu0 %vm180_vm0, %v6182_v6 }
  0xa6   :  { %461 = vmatprep.mubr.f32.mxu0 %v5946_v1 }
  0xa7   :  { %5181 = vmatmul.mubr.msk.f32.gmra.mrb[38].mxu1 %vm180_vm0, %v6182_v6 }
  0xa8   :  { %718 = vmatprep.mubr.f32.mxu1 %v5946_v1 }
  0xa9   :  { %5150 = vmatmul.mubr.msk.f32.gmra.mrb[40].mxu0 %vm180_vm0, %v6190_v7 }
  0xaa   :  { %467 = vmatprep.mubr.f32.mxu0 %v5946_v1 }
  0xab   :  { %5182 = vmatmul.mubr.msk.f32.gmra.mrb[40].mxu1 %vm180_vm0, %v6190_v7 }
  0xac   :  { %724 = vmatprep.mubr.f32.mxu1 %v5946_v1 }
  0xad   :  { %5151 = vmatmul.mubr.msk.f32.gmra.mrb[42].mxu0 %vm180_vm0, %v6198_v8 }
  0xae   :  { %473 = vmatprep.mubr.f32.mxu0 %v5946_v1 }
  0xaf   :  { %5183 = vmatmul.mubr.msk.f32.gmra.mrb[42].mxu1 %vm180_vm0, %v6198_v8 }
  0xb0   :  { %730 = vmatprep.mubr.f32.mxu1 %v5946_v1 }
  0xb1   :  { %5152 = vmatmul.mubr.msk.f32.gmra.mrb[44].mxu0 %vm180_vm0, %v6206_v9 }
  0xb2   :  { %479 = vmatprep.mubr.f32.mxu0 %v5946_v1 }
  0xb3   :  { %5184 = vmatmul.mubr.msk.f32.gmra.mrb[44].mxu1 %vm180_vm0, %v6206_v9 }
  0xb4   :  { %736 = vmatprep.mubr.f32.mxu1 %v5946_v1 }
  0xb5   :  { %5153 = vmatmul.mubr.msk.f32.gmra.mrb[46].mxu0 %vm180_vm0, %v6214_v10 }
  0xb6   :  { %485 = vmatprep.mubr.f32.mxu0 %v5946_v1 }
  0xb7   :  { %5185 = vmatmul.mubr.msk.f32.gmra.mrb[46].mxu1 %vm180_vm0, %v6214_v10 }
  0xb8   :  { %742 = vmatprep.mubr.f32.mxu1 %v5946_v1 }
  0xb9   :  { %5154 = vmatmul.mubr.msk.f32.gmra.mrb[48].mxu0 %vm180_vm0, %v6222_v11 }
  0xba   :  { %491 = vmatprep.mubr.f32.mxu0 %v5946_v1 }
  0xbb   :  { %5186 = vmatmul.mubr.msk.f32.gmra.mrb[48].mxu1 %vm180_vm0, %v6222_v11 }
  0xbc   :  { %748 = vmatprep.mubr.f32.mxu1 %v5946_v1 }
  0xbd   :  { %5155 = vmatmul.mubr.msk.f32.gmra.mrb[50].mxu0 %vm180_vm0, %v6230_v12 }
  0xbe   :  { %497 = vmatprep.mubr.f32.mxu0 %v5946_v1 }
  0xbf   :  { %5187 = vmatmul.mubr.msk.f32.gmra.mrb[50].mxu1 %vm180_vm0, %v6230_v12 }
  0xc0   :  { %754 = vmatprep.mubr.f32.mxu1 %v5946_v1 }
  0xc1   :  { %5156 = vmatmul.mubr.msk.f32.gmra.mrb[52].mxu0 %vm180_vm0, %v6238_v13 }
  0xc2   :  { %503 = vmatprep.mubr.f32.mxu0 %v5946_v1 }
  0xc3   :  { %5188 = vmatmul.mubr.msk.f32.gmra.mrb[52].mxu1 %vm180_vm0, %v6238_v13 }
  0xc4   :  { %760 = vmatprep.mubr.f32.mxu1 %v5946_v1 }
  0xc5   :  { %5157 = vmatmul.mubr.msk.f32.gmra.mrb[54].mxu0 %vm180_vm0, %v6246_v14 }
  0xc6   :  { %509 = vmatprep.mubr.f32.mxu0 %v5946_v1 }
  0xc7   :  { %5189 = vmatmul.mubr.msk.f32.gmra.mrb[54].mxu1 %vm180_vm0, %v6246_v14 }
  0xc8   :  { %766 = vmatprep.mubr.f32.mxu1 %v5946_v1 }
  0xc9   :  { %5158 = vmatmul.mubr.msk.f32.gmra.mrb[56].mxu0 %vm180_vm0, %v6254_v15 }
  0xca   :  { %515 = vmatprep.mubr.f32.mxu0 %v5946_v1 }
  0xcb   :  { %5190 = vmatmul.mubr.msk.f32.gmra.mrb[56].mxu1 %vm180_vm0, %v6254_v15 }
  0xcc   :  { %772 = vmatprep.mubr.f32.mxu1 %v5946_v1 }
  0xcd   :  { %5159 = vmatmul.mubr.msk.f32.gmra.mrb[58].mxu0 %vm180_vm0, %v6262_v16 }
  0xce   :  { %521 = vmatprep.mubr.f32.mxu0 %v5946_v1 }
  0xcf   :  { %5191 = vmatmul.mubr.msk.f32.gmra.mrb[58].mxu1 %vm180_vm0, %v6262_v16 }
  0xd0   :  { %778 = vmatprep.mubr.f32.mxu1 %v5946_v1 }
  0xd1   :  { %5160 = vmatmul.mubr.msk.f32.gmra.mrb[60].mxu0 %vm180_vm0, %v6270_v17 }
  0xd2   :  { %527 = vmatprep.mubr.f32.mxu0 %v5946_v1 }
  0xd3   :  { %5192 = vmatmul.mubr.msk.f32.gmra.mrb[60].mxu1 %vm180_vm0, %v6270_v17 }
  0xd4   :  { %784 = vmatprep.mubr.f32.mxu1 %v5946_v1 }
  0xd5   :  { %5161 = vmatmul.mubr.msk.f32.gmra.mrb[62].mxu0 %vm180_vm0, %v6278_v18 }
  0xd6   :  { %855 = vmatprep.mubr.f32.mxu0 %v5946_v1 }
  0xd7   :  { %5193 = vmatmul.mubr.msk.f32.gmra.mrb[62].mxu1 %vm180_vm0, %v6278_v18 }
  0xd8   :  { %1112 = vmatprep.mubr.f32.mxu1 %v5946_v1 }
  0xd9   :  { %5194 = vmatmul.mubr.msk.f32.vlgmr.msra.gmra.mrb[64].mxu0 %vm180_vm0, %v6033_v33 }
  0xda   :  { %861 = vmatprep.mubr.f32.mxu0 %v5946_v1 }
  0xdb   :  { %5226 = vmatmul.mubr.msk.f32.vlgmr.msra.gmra.mrb[64].mxu1 %vm180_vm0, %v6033_v33 }
  0xdc   :  { %1118 = vmatprep.mubr.f32.mxu1 %v5946_v1 }
  0xdd   :  { %5195 = vmatmul.mubr.msk.f32.gmra.mrb[66].mxu0 %vm180_vm0, %v6038_v39 }
  0xde   :  { %867 = vmatprep.mubr.f32.mxu0 %v5946_v1 }
  0xdf   :  { %5227 = vmatmul.mubr.msk.f32.gmra.mrb[66].mxu1 %vm180_vm0, %v6038_v39 }
  0xe0   :  { %1124 = vmatprep.mubr.f32.mxu1 %v5946_v1 }
  0xe1   :  { %5196 = vmatmul.mubr.msk.f32.gmra.mrb[68].mxu0 %vm180_vm0, %v6046_v48 }
  0xe2   :  { %873 = vmatprep.mubr.f32.mxu0 %v5946_v1 }
  0xe3   :  { %5228 = vmatmul.mubr.msk.f32.gmra.mrb[68].mxu1 %vm180_vm0, %v6046_v48 }
  0xe4   :  { %1130 = vmatprep.mubr.f32.mxu1 %v5946_v1 }
  0xe5   :  { %5197 = vmatmul.mubr.msk.f32.gmra.mrb[70].mxu0 %vm180_vm0, %v6054_v53 }
  0xe6   :  { %879 = vmatprep.mubr.f32.mxu0 %v5946_v1 }
  0xe7   :  { %5229 = vmatmul.mubr.msk.f32.gmra.mrb[70].mxu1 %vm180_vm0, %v6054_v53  ;;  %v6471_v53 = vrot.slane %v1561_v43, %v6413_v23 }
  0xe8   :  { %1136 = vmatprep.mubr.f32.mxu1 %v5946_v1 }
  0xe9   :  { %5198 = vmatmul.mubr.msk.f32.gmra.mrb[72].mxu0 %vm180_vm0, %v6062_v54 }
  0xea   :  { %885 = vmatprep.mubr.f32.mxu0 %v5946_v1 }
  0xeb   :  { %5230 = vmatmul.mubr.msk.f32.gmra.mrb[72].mxu1 %vm180_vm0, %v6062_v54 }
  0xec   :  { %1142 = vmatprep.mubr.f32.mxu1 %v5946_v1 }
  0xed   :  { %5199 = vmatmul.mubr.msk.f32.gmra.mrb[74].mxu0 %vm180_vm0, %v6070_v55 }
  0xee   :  { %891 = vmatprep.mubr.f32.mxu0 %v5946_v1 }
  0xef   :  { %5231 = vmatmul.mubr.msk.f32.gmra.mrb[74].mxu1 %vm180_vm0, %v6070_v55 }
  0xf0   :  { %1148 = vmatprep.mubr.f32.mxu1 %v5946_v1 }
  0xf1   :  { %5200 = vmatmul.mubr.msk.f32.gmra.mrb[76].mxu0 %vm180_vm0, %v6078_v56 }
  0xf2   :  { %897 = vmatprep.mubr.f32.mxu0 %v5946_v1 }
  0xf3   :  { %5232 = vmatmul.mubr.msk.f32.gmra.mrb[76].mxu1 %vm180_vm0, %v6078_v56 }
  0xf4   :  { %1154 = vmatprep.mubr.f32.mxu1 %v5946_v1 }
  0xf5   :  { %5201 = vmatmul.mubr.msk.f32.gmra.mrb[78].mxu0 %vm180_vm0, %v6086_v57 }
  0xf6   :  { %903 = vmatprep.mubr.f32.mxu0 %v5946_v1 }
  0xf7   :  { %5233 = vmatmul.mubr.msk.f32.gmra.mrb[78].mxu1 %vm180_vm0, %v6086_v57 }
  0xf8   :  { %1160 = vmatprep.mubr.f32.mxu1 %v5946_v1 }
  0xf9   :  { %5202 = vmatmul.mubr.msk.f32.gmra.mrb[80].mxu0 %vm180_vm0, %v6094_v58 }
  0xfa   :  { %909 = vmatprep.mubr.f32.mxu0 %v5946_v1 }
  0xfb   :  { %5234 = vmatmul.mubr.msk.f32.gmra.mrb[80].mxu1 %vm180_vm0, %v6094_v58 }
  0xfc   :  { %1166 = vmatprep.mubr.f32.mxu1 %v5946_v1 }
  0xfd   :  { %5203 = vmatmul.mubr.msk.f32.gmra.mrb[82].mxu0 %vm180_vm0, %v6102_v59 }
  0xfe   :  { %915 = vmatprep.mubr.f32.mxu0 %v5946_v1 }
  0xff   :  { %5235 = vmatmul.mubr.msk.f32.gmra.mrb[82].mxu1 %vm180_vm0, %v6102_v59  ;;  %v6479_v59 = vrot.slane %v1561_v43, %v6418_v24 }
 0x100   :  { %1172 = vmatprep.mubr.f32.mxu1 %v5946_v1 }
 0x101   :  { %5204 = vmatmul.mubr.msk.f32.gmra.mrb[84].mxu0 %vm180_vm0, %v6110_v60 }
 0x102   :  { %921 = vmatprep.mubr.f32.mxu0 %v5946_v1 }
 0x103   :  { %5236 = vmatmul.mubr.msk.f32.gmra.mrb[84].mxu1 %vm180_vm0, %v6110_v60 }
 0x104   :  { %1178 = vmatprep.mubr.f32.mxu1 %v5946_v1 }
 0x105   :  { %5205 = vmatmul.mubr.msk.f32.gmra.mrb[86].mxu0 %vm180_vm0, %v6118_v61 }
 0x106   :  { %927 = vmatprep.mubr.f32.mxu0 %v5946_v1 }
 0x107   :  { %5237 = vmatmul.mubr.msk.f32.gmra.mrb[86].mxu1 %vm180_vm0, %v6118_v61 }
 0x108   :  { %1184 = vmatprep.mubr.f32.mxu1 %v5946_v1 }
 0x109   :  { %5206 = vmatmul.mubr.msk.f32.gmra.mrb[88].mxu0 %vm180_vm0, %v6126_v62 }
 0x10a   :  { %933 = vmatprep.mubr.f32.mxu0 %v5946_v1 }
 0x10b   :  { %5238 = vmatmul.mubr.msk.f32.gmra.mrb[88].mxu1 %vm180_vm0, %v6126_v62  ;;  %v6485_v62 = vrot.slane %v1561_v43, %v6422_v25 }
 0x10c   :  { %1190 = vmatprep.mubr.f32.mxu1 %v5946_v1 }
 0x10d   :  { %5207 = vmatmul.mubr.msk.f32.gmra.mrb[90].mxu0 %vm180_vm0, %v6134_v63 }
 0x10e   :  { %939 = vmatprep.mubr.f32.mxu0 %v5946_v1 }
 0x10f   :  { %5239 = vmatmul.mubr.msk.f32.gmra.mrb[90].mxu1 %vm180_vm0, %v6134_v63 }
 0x110   :  { %1196 = vmatprep.mubr.f32.mxu1 %v5946_v1 }
 0x111   :  { %5208 = vmatmul.mubr.msk.f32.gmra.mrb[92].mxu0 %vm180_vm0, %v6142_v0 }
 0x112   :  { %945 = vmatprep.mubr.f32.mxu0 %v5946_v1 }
 0x113   :  { %5240 = vmatmul.mubr.msk.f32.gmra.mrb[92].mxu1 %vm180_vm0, %v6142_v0 }
 0x114   :  { %1202 = vmatprep.mubr.f32.mxu1 %v5946_v1 }
 0x115   :  { %5209 = vmatmul.mubr.msk.f32.gmra.mrb[94].mxu0 %vm180_vm0, %v6150_v2 }
 0x116   :  { %951 = vmatprep.mubr.f32.mxu0 %v5946_v1 }
 0x117   :  { %5241 = vmatmul.mubr.msk.f32.gmra.mrb[94].mxu1 %vm180_vm0, %v6150_v2 }
 0x118   :  { %1208 = vmatprep.mubr.f32.mxu1 %v5946_v1 }
 0x119   :  { %5210 = vmatmul.mubr.msk.f32.gmra.mrb[96].mxu0 %vm180_vm0, %v6158_v3 }
 0x11a   :  { %957 = vmatprep.mubr.f32.mxu0 %v5946_v1 }
 0x11b   :  { %5242 = vmatmul.mubr.msk.f32.gmra.mrb[96].mxu1 %vm180_vm0, %v6158_v3 }
 0x11c   :  { %1214 = vmatprep.mubr.f32.mxu1 %v5946_v1 }
 0x11d   :  { %5211 = vmatmul.mubr.msk.f32.gmra.mrb[98].mxu0 %vm180_vm0, %v6166_v4 }
 0x11e   :  { %963 = vmatprep.mubr.f32.mxu0 %v5946_v1 }
 0x11f   :  { %5243 = vmatmul.mubr.msk.f32.gmra.mrb[98].mxu1 %vm180_vm0, %v6166_v4 }
 0x120   :  { %1220 = vmatprep.mubr.f32.mxu1 %v5946_v1 }
 0x121   :  { %5212 = vmatmul.mubr.msk.f32.gmra.mrb[100].mxu0 %vm180_vm0, %v6174_v5 }
 0x122   :  { %969 = vmatprep.mubr.f32.mxu0 %v5946_v1 }
 0x123   :  { %5244 = vmatmul.mubr.msk.f32.gmra.mrb[100].mxu1 %vm180_vm0, %v6174_v5 }
 0x124   :  { %1226 = vmatprep.mubr.f32.mxu1 %v5946_v1 }
 0x125   :  { %5213 = vmatmul.mubr.msk.f32.gmra.mrb[102].mxu0 %vm180_vm0, %v6182_v6 }
 0x126   :  { %975 = vmatprep.mubr.f32.mxu0 %v5946_v1 }
 0x127   :  { %5245 = vmatmul.mubr.msk.f32.gmra.mrb[102].mxu1 %vm180_vm0, %v6182_v6 }
 0x128   :  { %1232 = vmatprep.mubr.f32.mxu1 %v5946_v1 }
 0x129   :  { %5214 = vmatmul.mubr.msk.f32.gmra.mrb[104].mxu0 %vm180_vm0, %v6190_v7 }
 0x12a   :  { %981 = vmatprep.mubr.f32.mxu0 %v5946_v1 }
 0x12b   :  { %5246 = vmatmul.mubr.msk.f32.gmra.mrb[104].mxu1 %vm180_vm0, %v6190_v7 }
 0x12c   :  { %v343_v29 = vpop.f32.mrb[0].mxu0  ;;  %1238 = vmatprep.mubr.f32.mxu1 %v5946_v1 }
 0x12d   :  { %v344_v31 = vadd.f32 %v343_v29, %v6427_v26  ;;  %v345_v32 = vpop.f32.mrb[1].mxu0  ;;  %5215 = vmatmul.mubr.msk.f32.gmra.mrb[106].mxu0 %vm180_vm0, %v6198_v8 }
 0x12e   :  { %v346_v33 = vadd.f32 %v345_v32, %v6431_v27  ;;  %v600_v34 = vpop.f32.mrb[0].mxu1  ;;  %987 = vmatprep.mubr.f32.mxu0 %v5946_v1 }
 0x12f   :  { %5306 = vtanh.f32 %v344_v31  ;;  %v601_v35 = vadd.f32 %v600_v34, %v6436_v28  ;;  %v602_v36 = vpop.f32.mrb[1].mxu1  ;;  %5247 = vmatmul.mubr.msk.f32.gmra.mrb[106].mxu1 %vm180_vm0, %v6198_v8 }
 0x130   :  { %5308 = vtanh.f32 %v346_v33  ;;  %v349_v37 = vpop.f32.mrb[2].mxu0  ;;  %v603_v38 = vadd.f32 %v602_v36, %v6440_v30  ;;  %1244 = vmatprep.mubr.f32.mxu1 %v5946_v1 }
 0x131   :  { %5310 = vtanh.f32 %v601_v35  ;;  %v350_v39 = vadd.f32 %v349_v37, %v6427_v26  ;;  %v351_v40 = vpop.f32.mrb[3].mxu0  ;;  %5216 = vmatmul.mubr.msk.f32.gmra.mrb[108].mxu0 %vm180_vm0, %v6206_v9 }
 0x132   :  { %v352_v41 = vadd.f32 %v351_v40, %v6431_v27  ;;  %5312 = vtanh.f32 %v603_v38  ;;  %v606_v42 = vpop.f32.mrb[2].mxu1  ;;  %993 = vmatprep.mubr.f32.mxu0 %v5946_v1 }
 0x133   :  { %5314 = vtanh.f32 %v350_v39  ;;  %v607_v44 = vadd.f32 %v606_v42, %v6436_v28  ;;  %v608_v45 = vpop.f32.mrb[3].mxu1  ;;  %5248 = vmatmul.mubr.msk.f32.gmra.mrb[108].mxu1 %vm180_vm0, %v6206_v9 }
 0x134   :  { %5316 = vtanh.f32 %v352_v41  ;;  %v355_v46 = vpop.f32.mrb[4].mxu0  ;;  %v609_v47 = vadd.f32 %v608_v45, %v6440_v30  ;;  %1250 = vmatprep.mubr.f32.mxu1 %v5946_v1 }
 0x135   :  { %5318 = vtanh.f32 %v607_v44  ;;  %v356_v48 = vadd.f32 %v355_v46, %v6427_v26  ;;  %v357_v49 = vpop.f32.mrb[5].mxu0  ;;  %5217 = vmatmul.mubr.msk.f32.gmra.mrb[110].mxu0 %vm180_vm0, %v6214_v10 }
 0x136   :  { %v358_v51 = vadd.f32 %v357_v49, %v6431_v27  ;;  %5320 = vtanh.f32 %v609_v47  ;;  %v612_v52 = vpop.f32.mrb[4].mxu1  ;;  %999 = vmatprep.mubr.f32.mxu0 %v5946_v1 }
 0x137   :  { %5322 = vtanh.f32 %v356_v48  ;;  %v613_v54 = vadd.f32 %v612_v52, %v6436_v28  ;;  %v614_v55 = vpop.f32.mrb[5].mxu1  ;;  %5249 = vmatmul.mubr.msk.f32.gmra.mrb[110].mxu1 %vm180_vm0, %v6214_v10 }
 0x138   :  { %5324 = vtanh.f32 %v358_v51  ;;  %v361_v56 = vpop.f32.mrb[6].mxu0  ;;  %v615_v57 = vadd.f32 %v614_v55, %v6440_v30  ;;  %1256 = vmatprep.mubr.f32.mxu1 %v5946_v1 }
 0x139   :  { %v5307_v58 = vpop.eup %5306  ;;  %5326 = vtanh.f32 %v613_v54  ;;  %v362_v60 = vadd.f32 %v361_v56, %v6427_v26  ;;  %v363_v61 = vpop.f32.mrb[7].mxu0  ;;  %5218 = vmatmul.mubr.msk.f32.gmra.mrb[112].mxu0 %vm180_vm0, %v6222_v11 }
 0x13a   :  { %v5309_v63 = vpop.eup %5308  ;;  %v1603_v0 = vmul.f32 %v5307_v58, %v6466_v50  ;;  %v364_v2 = vadd.f32 %v363_v61, %v6431_v27  ;;  %5328 = vtanh.f32 %v615_v57  ;;  %v618_v3 = vpop.f32.mrb[6].mxu1  ;;  %1005 = vmatprep.mubr.f32.mxu0 %v5946_v1 }
 0x13b   :  { %v5311_v4 = vpop.eup %5310  ;;  %v1604_v5 = vmul.f32 %v5309_v63, %v6471_v53  ;;  %5330 = vtanh.f32 %v362_v60  ;;  %v619_v6 = vadd.f32 %v618_v3, %v6436_v28  ;;  %v620_v7 = vpop.f32.mrb[7].mxu1  ;;  %5250 = vmatmul.mubr.msk.f32.gmra.mrb[112].mxu1 %vm180_vm0, %v6222_v11 }
 0x13c   :  { %v5313_v8 = vpop.eup %5312  ;;  %5332 = vtanh.f32 %v364_v2  ;;  %v367_v9 = vpop.f32.mrb[8].mxu0  ;;  %v621_v10 = vadd.f32 %v620_v7, %v6440_v30  ;;  %1262 = vmatprep.mubr.f32.mxu1 %v5946_v1  ;;  %v1605_v32 = vmul.f32 %v5311_v4, %v6479_v59 }
 0x13d   :  { %v5315_v22 = vpop.eup %5314  ;;  %5334 = vtanh.f32 %v619_v6  ;;  %v368_v29 = vadd.f32 %v367_v9, %v6427_v26  ;;  %v369_v31 = vpop.f32.mrb[9].mxu0  ;;  %5219 = vmatmul.mubr.msk.f32.gmra.mrb[114].mxu0 %vm180_vm0, %v6230_v12  ;;  %v1606_v33 = vmul.f32 %v5313_v8, %v6485_v62  ;;  %v1859_v37 = vadd.f32 %v1604_v5, %v1603_v0 }
 0x13e   :  { %v5317_v11 = vpop.eup %5316  ;;  %v1611_v34 = vmul.f32 %v5315_v22, %v6466_v50  ;;  %v370_v35 = vadd.f32 %v369_v31, %v6431_v27  ;;  %5336 = vtanh.f32 %v621_v10  ;;  %v624_v36 = vpop.f32.mrb[8].mxu1  ;;  %1011 = vmatprep.mubr.f32.mxu0 %v5946_v1 }
 0x13f   :  { %v5319_v38 = vpop.eup %5318  ;;  %v1612_v39 = vmul.f32 %v5317_v11, %v6471_v53  ;;  %5338 = vtanh.f32 %v368_v29  ;;  %v625_v40 = vadd.f32 %v624_v36, %v6436_v28  ;;  %v626_v41 = vpop.f32.mrb[9].mxu1  ;;  %5251 = vmatmul.mubr.msk.f32.gmra.mrb[114].mxu1 %vm180_vm0, %v6230_v12  ;;  %v1860_v46 = vadd.f32 %v1859_v37, %v1605_v32 }
 0x140   :  { %v5321_v42 = vpop.eup %5320  ;;  %v1613_v43 = vmul.f32 %v5319_v38, %v6479_v59  ;;  %5340 = vtanh.f32 %v370_v35  ;;  %v373_v44 = vpop.f32.mrb[10].mxu0  ;;  %v627_v45 = vadd.f32 %v626_v41, %v6440_v30  ;;  %1268 = vmatprep.mubr.f32.mxu1 %v5946_v1 }
 0x141   :  { %v5323_v47 = vpop.eup %5322  ;;  %5342 = vtanh.f32 %v625_v40  ;;  %v374_v48 = vadd.f32 %v373_v44, %v6427_v26  ;;  %v375_v49 = vpop.f32.mrb[11].mxu0  ;;  %5220 = vmatmul.mubr.msk.f32.gmra.mrb[116].mxu0 %vm180_vm0, %v6238_v13  ;;  %v1614_v12 = vmul.f32 %v5321_v42, %v6485_v62  ;;  %v1868_v51 = vadd.f32 %v1612_v39, %v1611_v34 }
 0x142   :  { %v5325_v52 = vpop.eup %5324  ;;  %v1619_v54 = vmul.f32 %v5323_v47, %v6466_v50  ;;  %v376_v55 = vadd.f32 %v375_v49, %v6431_v27  ;;  %5344 = vtanh.f32 %v627_v45  ;;  %v630_v56 = vpop.f32.mrb[10].mxu1  ;;  %1017 = vmatprep.mubr.f32.mxu0 %v5946_v1  ;;  %v6518_v57 = vadd.f32 %v1860_v46, %v1606_v33 }
 0x143   :  { %v5327_v58 = vpop.eup %5326  ;;  %v1620_v60 = vmul.f32 %v5325_v52, %v6471_v53  ;;  %5346 = vtanh.f32 %v374_v48  ;;  %v631_v61 = vadd.f32 %v630_v56, %v6436_v28  ;;  %v632_v63 = vpop.f32.mrb[11].mxu1  ;;  %5252 = vmatmul.mubr.msk.f32.gmra.mrb[116].mxu1 %vm180_vm0, %v6238_v13  ;;  %v1869_v0 = vadd.f32 %v1868_v51, %v1613_v43 }
 0x144   :  { %v5329_v2 = vpop.eup %5328  ;;  %5348 = vtanh.f32 %v376_v55  ;;  %v379_v3 = vpop.f32.mrb[12].mxu0  ;;  %v633_v4 = vadd.f32 %v632_v63, %v6440_v30  ;;  %1274 = vmatprep.mubr.f32.mxu1 %v5946_v1  ;;  %v1621_v5 = vmul.f32 %v5327_v58, %v6479_v59 }
 0x145   :  { %v5331_v6 = vpop.eup %5330  ;;  %5350 = vtanh.f32 %v631_v61  ;;  %v380_v7 = vadd.f32 %v379_v3, %v6427_v26  ;;  %v381_v8 = vpop.f32.mrb[13].mxu0  ;;  %5221 = vmatmul.mubr.msk.f32.gmra.mrb[118].mxu0 %vm180_vm0, %v6246_v14  ;;  %v6530_v9 = vadd.f32 %v1869_v0, %v1614_v12  ;;  %v1622_v13 = vmul.f32 %v5329_v2, %v6485_v62 }
 0x146   :  { %v5333_v10 = vpop.eup %5332  ;;  %v1627_v22 = vmul.f32 %v5331_v6, %v6466_v50  ;;  %v382_v29 = vadd.f32 %v381_v8, %v6431_v27  ;;  %5352 = vtanh.f32 %v633_v4  ;;  %v636_v31 = vpop.f32.mrb[12].mxu1  ;;  %1023 = vmatprep.mubr.f32.mxu0 %v5946_v1  ;;  %v1877_v32 = vadd.f32 %v1620_v60, %v1619_v54 }
 0x147   :  { %v5335_v33 = vpop.eup %5334  ;;  %v1628_v11 = vmul.f32 %v5333_v10, %v6471_v53  ;;  %5354 = vtanh.f32 %v380_v7  ;;  %v637_v34 = vadd.f32 %v636_v31, %v6436_v28  ;;  %v638_v35 = vpop.f32.mrb[13].mxu1  ;;  %5253 = vmatmul.mubr.msk.f32.gmra.mrb[118].mxu1 %vm180_vm0, %v6246_v14 }
 0x148   :  { %v5337_v36 = vpop.eup %5336  ;;  %v1629_v37 = vmul.f32 %v5335_v33, %v6479_v59  ;;  %5356 = vtanh.f32 %v382_v29  ;;  %v385_v38 = vpop.f32.mrb[14].mxu0  ;;  %v639_v39 = vadd.f32 %v638_v35, %v6440_v30  ;;  %1280 = vmatprep.mubr.f32.mxu1 %v5946_v1  ;;  %v1878_v40 = vadd.f32 %v1877_v32, %v1621_v5 }
 0x149   :  { %v5339_v41 = vpop.eup %5338  ;;  %5358 = vtanh.f32 %v637_v34  ;;  %v386_v42 = vadd.f32 %v385_v38, %v6427_v26  ;;  %v387_v43 = vpop.f32.mrb[15].mxu0  ;;  %5222 = vmatmul.mubr.msk.f32.gmra.mrb[120].mxu0 %vm180_vm0, %v6254_v15  ;;  %v1630_v14 = vmul.f32 %v5337_v36, %v6485_v62  ;;  %v1886_v44 = vadd.f32 %v1628_v11, %v1627_v22 }
 0x14a   :  { %v5341_v45 = vpop.eup %5340  ;;  %v1635_v46 = vmul.f32 %v5339_v41, %v6466_v50  ;;  %v388_v47 = vadd.f32 %v387_v43, %v6431_v27  ;;  %5360 = vtanh.f32 %v639_v39  ;;  %v642_v48 = vpop.f32.mrb[14].mxu1  ;;  %1029 = vmatprep.mubr.f32.mxu0 %v5946_v1  ;;  %v6550_v49 = vadd.f32 %v1878_v40, %v1622_v13 }
 0x14b   :  { %v5343_v12 = vpop.eup %5342  ;;  %v1636_v51 = vmul.f32 %v5341_v45, %v6471_v53  ;;  %5362 = vtanh.f32 %v386_v42  ;;  %v643_v52 = vadd.f32 %v642_v48, %v6436_v28  ;;  %v644_v54 = vpop.f32.mrb[15].mxu1  ;;  %5254 = vmatmul.mubr.msk.f32.gmra.mrb[120].mxu1 %vm180_vm0, %v6254_v15  ;;  %v1887_v55 = vadd.f32 %v1886_v44, %v1629_v37 }
 0x14c   :  { %v5345_v56 = vpop.eup %5344  ;;  %v1637_v58 = vmul.f32 %v5343_v12, %v6479_v59  ;;  %5364 = vtanh.f32 %v388_v47  ;;  %v391_v60 = vpop.f32.mrb[16].mxu0  ;;  %v645_v61 = vadd.f32 %v644_v54, %v6440_v30  ;;  %1286 = vmatprep.mubr.f32.mxu1 %v5946_v1 }
 0x14d   :  { %v5347_v63 = vpop.eup %5346  ;;  %5366 = vtanh.f32 %v643_v52  ;;  %v392_v0 = vadd.f32 %v391_v60, %v6427_v26  ;;  %v393_v2 = vpop.f32.mrb[17].mxu0  ;;  %5223 = vmatmul.mubr.msk.f32.gmra.mrb[122].mxu0 %vm180_vm0, %v6262_v16  ;;  %v6562_v3 = vadd.f32 %v1887_v55, %v1630_v14  ;;  %v1638_v15 = vmul.f32 %v5345_v56, %v6485_v62 }
 0x14e   :  { %v5349_v4 = vpop.eup %5348  ;;  %v1643_v5 = vmul.f32 %v5347_v63, %v6466_v50  ;;  %v394_v6 = vadd.f32 %v393_v2, %v6431_v27  ;;  %5368 = vtanh.f32 %v645_v61  ;;  %v648_v7 = vpop.f32.mrb[16].mxu1  ;;  %1035 = vmatprep.mubr.f32.mxu0 %v5946_v1  ;;  %v1895_v8 = vadd.f32 %v1636_v51, %v1635_v46 }
 0x14f   :  { %v5351_v13 = vpop.eup %5350  ;;  %v1644_v10 = vmul.f32 %v5349_v4, %v6471_v53  ;;  %5370 = vtanh.f32 %v392_v0  ;;  %v649_v22 = vadd.f32 %v648_v7, %v6436_v28  ;;  %v650_v29 = vpop.f32.mrb[17].mxu1  ;;  %5255 = vmatmul.mubr.msk.f32.gmra.mrb[122].mxu1 %vm180_vm0, %v6262_v16 }
 0x150   :  { %v5353_v31 = vpop.eup %5352  ;;  %v1645_v32 = vmul.f32 %v5351_v13, %v6479_v59  ;;  %5372 = vtanh.f32 %v394_v6  ;;  %v397_v33 = vpop.f32.mrb[18].mxu0  ;;  %v651_v11 = vadd.f32 %v650_v29, %v6440_v30  ;;  %1292 = vmatprep.mubr.f32.mxu1 %v5946_v1  ;;  %v1896_v34 = vadd.f32 %v1895_v8, %v1637_v58 }
 0x151   :  { %v5355_v35 = vpop.eup %5354  ;;  %5374 = vtanh.f32 %v649_v22  ;;  %v398_v36 = vadd.f32 %v397_v33, %v6427_v26  ;;  %v399_v37 = vpop.f32.mrb[19].mxu0  ;;  %5224 = vmatmul.mubr.msk.f32.gmra.mrb[124].mxu0 %vm180_vm0, %v6270_v17  ;;  %v1646_v16 = vmul.f32 %v5353_v31, %v6485_v62  ;;  %v1904_v38 = vadd.f32 %v1644_v10, %v1643_v5 }
 0x152   :  { %v5357_v39 = vpop.eup %5356  ;;  %v1651_v40 = vmul.f32 %v5355_v35, %v6466_v50  ;;  %v400_v41 = vadd.f32 %v399_v37, %v6431_v27  ;;  %5376 = vtanh.f32 %v651_v11  ;;  %v654_v42 = vpop.f32.mrb[18].mxu1  ;;  %1041 = vmatprep.mubr.f32.mxu0 %v5946_v1  ;;  %v6582_v43 = vadd.f32 %v1896_v34, %v1638_v15 }
 0x153   :  { %v5359_v14 = vpop.eup %5358  ;;  %v1652_v44 = vmul.f32 %v5357_v39, %v6471_v53  ;;  %5378 = vtanh.f32 %v398_v36  ;;  %v655_v45 = vadd.f32 %v654_v42, %v6436_v28  ;;  %v656_v46 = vpop.f32.mrb[19].mxu1  ;;  %5256 = vmatmul.mubr.msk.f32.gmra.mrb[124].mxu1 %vm180_vm0, %v6270_v17  ;;  %v1905_v47 = vadd.f32 %v1904_v38, %v1645_v32 }
 0x154   :  { %v5361_v48 = vpop.eup %5360  ;;  %v1653_v12 = vmul.f32 %v5359_v14, %v6479_v59  ;;  %5380 = vtanh.f32 %v400_v41  ;;  %v403_v51 = vpop.f32.mrb[20].mxu0  ;;  %v657_v52 = vadd.f32 %v656_v46, %v6440_v30  ;;  %1298 = vmatprep.mubr.f32.mxu1 %v5946_v1 }
 0x155   :  { %v5363_v54 = vpop.eup %5362  ;;  %5382 = vtanh.f32 %v655_v45  ;;  %v404_v55 = vadd.f32 %v403_v51, %v6427_v26  ;;  %v405_v56 = vpop.f32.mrb[21].mxu0  ;;  %5225 = vmatmul.mubr.msk.f32.gmra.mrb[126].mxu0 %vm180_vm0, %v6278_v18  ;;  %v6594_v58 = vadd.f32 %v1905_v47, %v1646_v16  ;;  %v1654_v17 = vmul.f32 %v5361_v48, %v6485_v62 }
 0x156   :  { %v5365_v60 = vpop.eup %5364  ;;  %v1659_v61 = vmul.f32 %v5363_v54, %v6466_v50  ;;  %v406_v63 = vadd.f32 %v405_v56, %v6431_v27  ;;  %5384 = vtanh.f32 %v657_v52  ;;  %v660_v0 = vpop.f32.mrb[20].mxu1  ;;  %v1913_v1 = vadd.f32 %v1652_v44, %v1651_v40 }
 0x157   :  { %v5367_v2 = vpop.eup %5366  ;;  %v1660_v15 = vmul.f32 %v5365_v60, %v6471_v53  ;;  %5386 = vtanh.f32 %v404_v55  ;;  %v661_v4 = vadd.f32 %v660_v0, %v6436_v28  ;;  %v662_v5 = vpop.f32.mrb[21].mxu1  ;;  %5257 = vmatmul.mubr.msk.f32.gmra.mrb[126].mxu1 %vm180_vm0, %v6278_v18 }
 0x158   :  { %v5369_v6 = vpop.eup %5368  ;;  %v1661_v7 = vmul.f32 %v5367_v2, %v6479_v59  ;;  %5388 = vtanh.f32 %v406_v63  ;;  %v409_v8 = vpop.f32.mrb[22].mxu0  ;;  %v663_v13 = vadd.f32 %v662_v5, %v6440_v30  ;;  %v1914_v10 = vadd.f32 %v1913_v1, %v1653_v12 }
 0x159   :  { %v5371_v22 = vpop.eup %5370  ;;  %5390 = vtanh.f32 %v661_v4  ;;  %v410_v29 = vadd.f32 %v409_v8, %v6427_v26  ;;  %v411_v31 = vpop.f32.mrb[23].mxu0  ;;  %v1662_v32 = vmul.f32 %v5369_v6, %v6485_v62  ;;  %v1922_v33 = vadd.f32 %v1660_v15, %v1659_v61 }
 0x15a   :  { %v5373_v11 = vpop.eup %5372  ;;  %v1667_v34 = vmul.f32 %v5371_v22, %v6466_v50  ;;  %v412_v18 = vadd.f32 %v411_v31, %v6431_v27  ;;  %5392 = vtanh.f32 %v663_v13  ;;  %v666_v35 = vpop.f32.mrb[22].mxu1  ;;  %v6609_v36 = vadd.f32 %v1914_v10, %v1654_v17 }
 0x15b   :  { %v5375_v37 = vpop.eup %5374  ;;  %v1668_v16 = vmul.f32 %v5373_v11, %v6471_v53  ;;  %5394 = vtanh.f32 %v410_v29  ;;  %v667_v38 = vadd.f32 %v666_v35, %v6436_v28  ;;  %v668_v39 = vpop.f32.mrb[23].mxu1  ;;  %v1923_v40 = vadd.f32 %v1922_v33, %v1661_v7 }
 0x15c   :  { %v5377_v41 = vpop.eup %5376  ;;  %v1669_v42 = vmul.f32 %v5375_v37, %v6479_v59  ;;  %5396 = vtanh.f32 %v412_v18  ;;  %v415_v14 = vpop.f32.mrb[24].mxu0  ;;  %v669_v44 = vadd.f32 %v668_v39, %v6440_v30 }
 0x15d   :  { %v5379_v45 = vpop.eup %5378  ;;  %5398 = vtanh.f32 %v667_v38  ;;  %v416_v46 = vadd.f32 %v415_v14, %v6427_v26  ;;  %v417_v47 = vpop.f32.mrb[25].mxu0  ;;  %v6616_v48 = vadd.f32 %v1923_v40, %v1662_v32  ;;  %v1670_v12 = vmul.f32 %v5377_v41, %v6485_v62 }
 0x15e   :  { %v5381_v51 = vpop.eup %5380  ;;  %v1675_v52 = vmul.f32 %v5379_v45, %v6466_v50  ;;  %v418_v54 = vadd.f32 %v417_v47, %v6431_v27  ;;  %5400 = vtanh.f32 %v669_v44  ;;  %v672_v55 = vpop.f32.mrb[24].mxu1  ;;  %v1931_v56 = vadd.f32 %v1668_v16, %v1667_v34 }
 0x15f   :  { %v5383_v17 = vpop.eup %5382  ;;  %v1676_v60 = vmul.f32 %v5381_v51, %v6471_v53  ;;  %5402 = vtanh.f32 %v416_v46  ;;  %v673_v61 = vadd.f32 %v672_v55, %v6436_v28  ;;  %v674_v63 = vpop.f32.mrb[25].mxu1 }
 0x160   :  { %v5385_v0 = vpop.eup %5384  ;;  %v1677_v1 = vmul.f32 %v5383_v17, %v6479_v59  ;;  %5404 = vtanh.f32 %v418_v54  ;;  %v421_v2 = vpop.f32.mrb[26].mxu0  ;;  %v675_v15 = vadd.f32 %v674_v63, %v6440_v30  ;;  %v1932_v4 = vadd.f32 %v1931_v56, %v1669_v42 }
 0x161   :  { %v5387_v5 = vpop.eup %5386  ;;  %5406 = vtanh.f32 %v673_v61  ;;  %v422_v6 = vadd.f32 %v421_v2, %v6427_v26  ;;  %v423_v7 = vpop.f32.mrb[27].mxu0  ;;  %v1678_v8 = vmul.f32 %v5385_v0, %v6485_v62  ;;  %v1940_v13 = vadd.f32 %v1676_v60, %v1675_v52 }
 0x162   :  { %v5389_v10 = vpop.eup %5388  ;;  %v1683_v22 = vmul.f32 %v5387_v5, %v6466_v50  ;;  %v424_v29 = vadd.f32 %v423_v7, %v6431_v27  ;;  %5408 = vtanh.f32 %v675_v15  ;;  %v678_v31 = vpop.f32.mrb[26].mxu1  ;;  %v6629_v32 = vadd.f32 %v1932_v4, %v1670_v12 }
 0x163   :  { %v5391_v33 = vpop.eup %5390  ;;  %v1684_v11 = vmul.f32 %v5389_v10, %v6471_v53  ;;  %5410 = vtanh.f32 %v422_v6  ;;  %v679_v34 = vadd.f32 %v678_v31, %v6436_v28  ;;  %v680_v18 = vpop.f32.mrb[27].mxu1  ;;  %v1941_v35 = vadd.f32 %v1940_v13, %v1677_v1 }
 0x164   :  { %v5393_v37 = vpop.eup %5392  ;;  %v1685_v16 = vmul.f32 %v5391_v33, %v6479_v59  ;;  %5412 = vtanh.f32 %v424_v29  ;;  %v427_v38 = vpop.f32.mrb[28].mxu0  ;;  %v681_v39 = vadd.f32 %v680_v18, %v6440_v30 }
 0x165   :  { %v5395_v40 = vpop.eup %5394  ;;  %5414 = vtanh.f32 %v679_v34  ;;  %v428_v41 = vadd.f32 %v427_v38, %v6427_v26  ;;  %v429_v42 = vpop.f32.mrb[29].mxu0  ;;  %v6636_v14 = vadd.f32 %v1941_v35, %v1678_v8  ;;  %v1686_v44 = vmul.f32 %v5393_v37, %v6485_v62 }
 0x166   :  { %v5397_v45 = vpop.eup %5396  ;;  %v1691_v46 = vmul.f32 %v5395_v40, %v6466_v50  ;;  %v430_v47 = vadd.f32 %v429_v42, %v6431_v27  ;;  %5416 = vtanh.f32 %v681_v39  ;;  %v684_v12 = vpop.f32.mrb[28].mxu1  ;;  %v1949_v51 = vadd.f32 %v1684_v11, %v1683_v22 }
 0x167   :  { %v5399_v52 = vpop.eup %5398  ;;  %v1692_v54 = vmul.f32 %v5397_v45, %v6471_v53  ;;  %5418 = vtanh.f32 %v428_v41  ;;  %v685_v55 = vadd.f32 %v684_v12, %v6436_v28  ;;  %v686_v56 = vpop.f32.mrb[29].mxu1 }
 0x168   :  { %v5401_v17 = vpop.eup %5400  ;;  %v1693_v60 = vmul.f32 %v5399_v52, %v6479_v59  ;;  %5420 = vtanh.f32 %v430_v47  ;;  %v433_v61 = vpop.f32.mrb[30].mxu0  ;;  %v687_v63 = vadd.f32 %v686_v56, %v6440_v30  ;;  %v1950_v0 = vadd.f32 %v1949_v51, %v1685_v16 }
 0x169   :  { %v5403_v1 = vpop.eup %5402  ;;  %5422 = vtanh.f32 %v685_v55  ;;  %v434_v2 = vadd.f32 %v433_v61, %v6427_v26  ;;  %v435_v15 = vpop.f32.mrb[31].mxu0  ;;  %v1694_v4 = vmul.f32 %v5401_v17, %v6485_v62  ;;  %v1958_v5 = vadd.f32 %v1692_v54, %v1691_v46 }
 0x16a   :  { %v5405_v6 = vpop.eup %5404  ;;  %v1699_v7 = vmul.f32 %v5403_v1, %v6466_v50  ;;  %v436_v8 = vadd.f32 %v435_v15, %v6431_v27  ;;  %5424 = vtanh.f32 %v687_v63  ;;  %v690_v13 = vpop.f32.mrb[30].mxu1  ;;  %v6649_v10 = vadd.f32 %v1950_v0, %v1686_v44 }
 0x16b   :  { %v5407_v22 = vpop.eup %5406  ;;  %v1700_v29 = vmul.f32 %v5405_v6, %v6471_v53  ;;  %5426 = vtanh.f32 %v434_v2  ;;  %v691_v31 = vadd.f32 %v690_v13, %v6436_v28  ;;  %v692_v33 = vpop.f32.mrb[31].mxu1  ;;  %v1959_v11 = vadd.f32 %v1958_v5, %v1693_v60 }
 0x16c   :  { %v5409_v34 = vpop.eup %5408  ;;  %v1701_v18 = vmul.f32 %v5407_v22, %v6479_v59  ;;  %5428 = vtanh.f32 %v436_v8  ;;  %v439_v35 = vpop.f32.mrb[32].mxu0  ;;  %v693_v37 = vadd.f32 %v692_v33, %v6440_v30 }
 0x16d   :  { %v5411_v16 = vpop.eup %5410  ;;  %5430 = vtanh.f32 %v691_v31  ;;  %v440_v38 = vadd.f32 %v439_v35, %v6427_v26  ;;  %v441_v39 = vpop.f32.mrb[33].mxu0  ;;  %v6656_v40 = vadd.f32 %v1959_v11, %v1694_v4  ;;  %v1702_v41 = vmul.f32 %v5409_v34, %v6485_v62 }
 0x16e   :  { %v5413_v42 = vpop.eup %5412  ;;  %v1707_v44 = vmul.f32 %v5411_v16, %v6466_v50  ;;  %v442_v45 = vadd.f32 %v441_v39, %v6431_v27  ;;  %5432 = vtanh.f32 %v693_v37  ;;  %v696_v46 = vpop.f32.mrb[32].mxu1  ;;  %v1967_v47 = vadd.f32 %v1700_v29, %v1699_v7 }
 0x16f   :  { %v5415_v12 = vpop.eup %5414  ;;  %v1708_v51 = vmul.f32 %v5413_v42, %v6471_v53  ;;  %5434 = vtanh.f32 %v440_v38  ;;  %v697_v52 = vadd.f32 %v696_v46, %v6436_v28  ;;  %v698_v54 = vpop.f32.mrb[33].mxu1 }
 0x170   :  { %v5417_v55 = vpop.eup %5416  ;;  %v1709_v56 = vmul.f32 %v5415_v12, %v6479_v59  ;;  %5436 = vtanh.f32 %v442_v45  ;;  %v445_v17 = vpop.f32.mrb[34].mxu0  ;;  %v699_v60 = vadd.f32 %v698_v54, %v6440_v30  ;;  %v1968_v61 = vadd.f32 %v1967_v47, %v1701_v18 }
 0x171   :  { %v5419_v63 = vpop.eup %5418  ;;  %5438 = vtanh.f32 %v697_v52  ;;  %v446_v0 = vadd.f32 %v445_v17, %v6427_v26  ;;  %v447_v1 = vpop.f32.mrb[35].mxu0  ;;  %v1710_v2 = vmul.f32 %v5417_v55, %v6485_v62  ;;  %v1976_v15 = vadd.f32 %v1708_v51, %v1707_v44 }
 0x172   :  { %v5421_v4 = vpop.eup %5420  ;;  %v1715_v5 = vmul.f32 %v5419_v63, %v6466_v50  ;;  %v448_v6 = vadd.f32 %v447_v1, %v6431_v27  ;;  %5440 = vtanh.f32 %v699_v60  ;;  %v702_v7 = vpop.f32.mrb[34].mxu1  ;;  %v6669_v8 = vadd.f32 %v1968_v61, %v1702_v41 }
 0x173   :  { %v5423_v13 = vpop.eup %5422  ;;  %v1716_v22 = vmul.f32 %v5421_v4, %v6471_v53  ;;  %5442 = vtanh.f32 %v446_v0  ;;  %v703_v29 = vadd.f32 %v702_v7, %v6436_v28  ;;  %v704_v31 = vpop.f32.mrb[35].mxu1  ;;  %v1977_v33 = vadd.f32 %v1976_v15, %v1709_v56 }
 0x174   :  { %v5425_v11 = vpop.eup %5424  ;;  %v1717_v34 = vmul.f32 %v5423_v13, %v6479_v59  ;;  %5444 = vtanh.f32 %v448_v6  ;;  %v451_v18 = vpop.f32.mrb[36].mxu0  ;;  %v705_v35 = vadd.f32 %v704_v31, %v6440_v30 }
 0x175   :  { %v5427_v37 = vpop.eup %5426  ;;  %5446 = vtanh.f32 %v703_v29  ;;  %v452_v16 = vadd.f32 %v451_v18, %v6427_v26  ;;  %v453_v38 = vpop.f32.mrb[37].mxu0  ;;  %v6676_v39 = vadd.f32 %v1977_v33, %v1710_v2  ;;  %v1718_v41 = vmul.f32 %v5425_v11, %v6485_v62 }
 0x176   :  { %v5429_v42 = vpop.eup %5428  ;;  %v1723_v44 = vmul.f32 %v5427_v37, %v6466_v50  ;;  %v454_v45 = vadd.f32 %v453_v38, %v6431_v27  ;;  %5448 = vtanh.f32 %v705_v35  ;;  %v708_v46 = vpop.f32.mrb[36].mxu1  ;;  %v1985_v47 = vadd.f32 %v1716_v22, %v1715_v5 }
 0x177   :  { %v5431_v12 = vpop.eup %5430  ;;  %v1724_v51 = vmul.f32 %v5429_v42, %v6471_v53  ;;  %5450 = vtanh.f32 %v452_v16  ;;  %v709_v52 = vadd.f32 %v708_v46, %v6436_v28  ;;  %v710_v54 = vpop.f32.mrb[37].mxu1 }
 0x178   :  { %v5433_v55 = vpop.eup %5432  ;;  %v1725_v56 = vmul.f32 %v5431_v12, %v6479_v59  ;;  %5452 = vtanh.f32 %v454_v45  ;;  %v457_v17 = vpop.f32.mrb[38].mxu0  ;;  %v711_v60 = vadd.f32 %v710_v54, %v6440_v30  ;;  %v1986_v61 = vadd.f32 %v1985_v47, %v1717_v34 }
 0x179   :  { %v5435_v63 = vpop.eup %5434  ;;  %5454 = vtanh.f32 %v709_v52  ;;  %v458_v0 = vadd.f32 %v457_v17, %v6427_v26  ;;  %v459_v1 = vpop.f32.mrb[39].mxu0  ;;  %v1726_v2 = vmul.f32 %v5433_v55, %v6485_v62  ;;  %v1994_v15 = vadd.f32 %v1724_v51, %v1723_v44 }
 0x17a   :  { %v5437_v4 = vpop.eup %5436  ;;  %v1731_v5 = vmul.f32 %v5435_v63, %v6466_v50  ;;  %v460_v6 = vadd.f32 %v459_v1, %v6431_v27  ;;  %5456 = vtanh.f32 %v711_v60  ;;  %v714_v7 = vpop.f32.mrb[38].mxu1  ;;  %v6689_v13 = vadd.f32 %v1986_v61, %v1718_v41 }
 0x17b   :  { %v5439_v22 = vpop.eup %5438  ;;  %v1732_v29 = vmul.f32 %v5437_v4, %v6471_v53  ;;  %5458 = vtanh.f32 %v458_v0  ;;  %v715_v31 = vadd.f32 %v714_v7, %v6436_v28  ;;  %v716_v33 = vpop.f32.mrb[39].mxu1  ;;  %v1995_v11 = vadd.f32 %v1994_v15, %v1725_v56 }
 0x17c   :  { %v5441_v34 = vpop.eup %5440  ;;  %v1733_v18 = vmul.f32 %v5439_v22, %v6479_v59  ;;  %5460 = vtanh.f32 %v460_v6  ;;  %v463_v35 = vpop.f32.mrb[40].mxu0  ;;  %v717_v37 = vadd.f32 %v716_v33, %v6440_v30 }
 0x17d   :  { %v5443_v16 = vpop.eup %5442  ;;  %5462 = vtanh.f32 %v715_v31  ;;  %v464_v38 = vadd.f32 %v463_v35, %v6427_v26  ;;  %v465_v41 = vpop.f32.mrb[41].mxu0  ;;  %v6696_v42 = vadd.f32 %v1995_v11, %v1726_v2  ;;  %v1734_v44 = vmul.f32 %v5441_v34, %v6485_v62 }
 0x17e   :  { %v5445_v45 = vpop.eup %5444  ;;  %v1739_v46 = vmul.f32 %v5443_v16, %v6466_v50  ;;  %v466_v47 = vadd.f32 %v465_v41, %v6431_v27  ;;  %5464 = vtanh.f32 %v717_v37  ;;  %v720_v12 = vpop.f32.mrb[40].mxu1  ;;  %v2003_v51 = vadd.f32 %v1732_v29, %v1731_v5 }
 0x17f   :  { %v5447_v52 = vpop.eup %5446  ;;  %v1740_v54 = vmul.f32 %v5445_v45, %v6471_v53  ;;  %5466 = vtanh.f32 %v464_v38  ;;  %v721_v55 = vadd.f32 %v720_v12, %v6436_v28  ;;  %v722_v56 = vpop.f32.mrb[41].mxu1 }
 0x180   :  { %v5449_v17 = vpop.eup %5448  ;;  %v1741_v60 = vmul.f32 %v5447_v52, %v6479_v59  ;;  %5468 = vtanh.f32 %v466_v47  ;;  %v469_v61 = vpop.f32.mrb[42].mxu0  ;;  %v723_v63 = vadd.f32 %v722_v56, %v6440_v30  ;;  %v2004_v0 = vadd.f32 %v2003_v51, %v1733_v18 }
 0x181   :  { %v5451_v1 = vpop.eup %5450  ;;  %5470 = vtanh.f32 %v721_v55  ;;  %v470_v2 = vadd.f32 %v469_v61, %v6427_v26  ;;  %v471_v15 = vpop.f32.mrb[43].mxu0  ;;  %v1742_v4 = vmul.f32 %v5449_v17, %v6485_v62  ;;  %v2012_v5 = vadd.f32 %v1740_v54, %v1739_v46 }
 0x182   :  { %v5453_v6 = vpop.eup %5452  ;;  %v1747_v7 = vmul.f32 %v5451_v1, %v6466_v50  ;;  %v472_v22 = vadd.f32 %v471_v15, %v6431_v27  ;;  %5472 = vtanh.f32 %v723_v63  ;;  %v726_v29 = vpop.f32.mrb[42].mxu1  ;;  %v6709_v31 = vadd.f32 %v2004_v0, %v1734_v44 }
 0x183   :  { %v5455_v33 = vpop.eup %5454  ;;  %v1748_v11 = vmul.f32 %v5453_v6, %v6471_v53  ;;  %5474 = vtanh.f32 %v470_v2  ;;  %v727_v34 = vadd.f32 %v726_v29, %v6436_v28  ;;  %v728_v18 = vpop.f32.mrb[43].mxu1  ;;  %v2013_v35 = vadd.f32 %v2012_v5, %v1741_v60 }
 0x184   :  { %v5457_v37 = vpop.eup %5456  ;;  %v1749_v16 = vmul.f32 %v5455_v33, %v6479_v59  ;;  %5476 = vtanh.f32 %v472_v22  ;;  %v475_v38 = vpop.f32.mrb[44].mxu0  ;;  %v729_v41 = vadd.f32 %v728_v18, %v6440_v30 }
 0x185   :  { %v5459_v45 = vpop.eup %5458  ;;  %5478 = vtanh.f32 %v727_v34  ;;  %v476_v44 = vadd.f32 %v475_v38, %v6427_v26  ;;  %v477_v46 = vpop.f32.mrb[45].mxu0  ;;  %v6716_v47 = vadd.f32 %v2013_v35, %v1742_v4  ;;  %v1750_v12 = vmul.f32 %v5457_v37, %v6485_v62 }
 0x186   :  { %v5461_v51 = vpop.eup %5460  ;;  %v1755_v52 = vmul.f32 %v5459_v45, %v6466_v50  ;;  %v478_v54 = vadd.f32 %v477_v46, %v6431_v27  ;;  %5480 = vtanh.f32 %v729_v41  ;;  %v732_v55 = vpop.f32.mrb[44].mxu1  ;;  %v2021_v56 = vadd.f32 %v1748_v11, %v1747_v7 }
 0x187   :  { %v5463_v17 = vpop.eup %5462  ;;  %v1756_v60 = vmul.f32 %v5461_v51, %v6471_v53  ;;  %5482 = vtanh.f32 %v476_v44  ;;  %v733_v61 = vadd.f32 %v732_v55, %v6436_v28  ;;  %v734_v63 = vpop.f32.mrb[45].mxu1 }
 0x188   :  { %v5465_v0 = vpop.eup %5464  ;;  %v1757_v1 = vmul.f32 %v5463_v17, %v6479_v59  ;;  %5484 = vtanh.f32 %v478_v54  ;;  %v481_v2 = vpop.f32.mrb[46].mxu0  ;;  %v735_v15 = vadd.f32 %v734_v63, %v6440_v30  ;;  %v2022_v4 = vadd.f32 %v2021_v56, %v1749_v16 }
 0x189   :  { %v5467_v5 = vpop.eup %5466  ;;  %5486 = vtanh.f32 %v733_v61  ;;  %v482_v6 = vadd.f32 %v481_v2, %v6427_v26  ;;  %v483_v7 = vpop.f32.mrb[47].mxu0  ;;  %v1758_v22 = vmul.f32 %v5465_v0, %v6485_v62  ;;  %v2030_v29 = vadd.f32 %v1756_v60, %v1755_v52 }
 0x18a   :  { %v5469_v33 = vpop.eup %5468  ;;  %v1763_v11 = vmul.f32 %v5467_v5, %v6466_v50  ;;  %v484_v34 = vadd.f32 %v483_v7, %v6431_v27  ;;  %5488 = vtanh.f32 %v735_v15  ;;  %v738_v18 = vpop.f32.mrb[46].mxu1  ;;  %v6729_v35 = vadd.f32 %v2022_v4, %v1750_v12 }
 0x18b   :  { %v5471_v37 = vpop.eup %5470  ;;  %v1764_v16 = vmul.f32 %v5469_v33, %v6471_v53  ;;  %5490 = vtanh.f32 %v482_v6  ;;  %v739_v38 = vadd.f32 %v738_v18, %v6436_v28  ;;  %v740_v41 = vpop.f32.mrb[47].mxu1  ;;  %v2031_v45 = vadd.f32 %v2030_v29, %v1757_v1 }
 0x18c   :  { %v5473_v44 = vpop.eup %5472  ;;  %v1765_v46 = vmul.f32 %v5471_v37, %v6479_v59  ;;  %5492 = vtanh.f32 %v484_v34  ;;  %v487_v51 = vpop.f32.mrb[48].mxu0  ;;  %v741_v52 = vadd.f32 %v740_v41, %v6440_v30  ;;  %v6736_v54 = vsub.s32 4, %v6400_v20 }
 0x18d   :  { %v5475_v12 = vpop.eup %5474  ;;  %5494 = vtanh.f32 %v739_v38  ;;  %v488_v55 = vadd.f32 %v487_v51, %v6427_v26  ;;  %v489_v56 = vpop.f32.mrb[49].mxu0  ;;  %v6739_v17 = vadd.f32 %v2031_v45, %v1758_v22  ;;  %v1766_v60 = vmul.f32 %v5473_v44, %v6485_v62 }
 0x18e   :  { %v5477_v61 = vpop.eup %5476  ;;  %v1771_v63 = vmul.f32 %v5475_v12, %v6466_v50  ;;  %v490_v0 = vadd.f32 %v489_v56, %v6431_v27  ;;  %5496 = vtanh.f32 %v741_v52  ;;  %v744_v1 = vpop.f32.mrb[48].mxu1  ;;  %v2039_v2 = vadd.f32 %v1764_v16, %v1763_v11 }
 0x18f   :  { %v5479_v15 = vpop.eup %5478  ;;  %v1772_v4 = vmul.f32 %v5477_v61, %v6471_v53  ;;  %5498 = vtanh.f32 %v488_v55  ;;  %v745_v5 = vadd.f32 %v744_v1, %v6436_v28  ;;  %v746_v6 = vpop.f32.mrb[49].mxu1  ;;  %v6747_v7 = vsub.s32 5, %v6400_v20 }
 0x190   :  { %v5481_v22 = vpop.eup %5480  ;;  %v1773_v29 = vmul.f32 %v5479_v15, %v6479_v59  ;;  %5500 = vtanh.f32 %v490_v0  ;;  %v493_v33 = vpop.f32.mrb[50].mxu0  ;;  %v747_v34 = vadd.f32 %v746_v6, %v6440_v30  ;;  %v2040_v18 = vadd.f32 %v2039_v2, %v1765_v46 }
 0x191   :  { %8080 = vst [vmem:[#allocation21_spill] sm:$0xff] %v6747_v7  ;;  %v5483_v37 = vpop.eup %5482  ;;  %5502 = vtanh.f32 %v745_v5  ;;  %v494_v11 = vadd.f32 %v493_v33, %v6427_v26  ;;  %v495_v16 = vpop.f32.mrb[51].mxu0  ;;  %v1774_v38 = vmul.f32 %v5481_v22, %v6485_v62  ;;  %v2048_v41 = vadd.f32 %v1772_v4, %v1771_v63  ;;  %v6761_v4 = vld [vmem:[#allocation8] sm:$0xff] }
 0x192   :  { %v5485_v45 = vpop.eup %5484  ;;  %v1779_v44 = vmul.f32 %v5483_v37, %v6466_v50  ;;  %v496_v51 = vadd.f32 %v495_v16, %v6431_v27  ;;  %5504 = vtanh.f32 %v747_v34  ;;  %v750_v52 = vpop.f32.mrb[50].mxu1  ;;  %v6755_v12 = vadd.f32 %v2040_v18, %v1766_v60 }
 0x193   :  { %v5487_v55 = vpop.eup %5486  ;;  %v1780_v46 = vmul.f32 %v5485_v45, %v6471_v53  ;;  %5506 = vtanh.f32 %v494_v11  ;;  %v751_v56 = vadd.f32 %v750_v52, %v6436_v28  ;;  %v752_v61 = vpop.f32.mrb[51].mxu1  ;;  %v2049_v0 = vadd.f32 %v2048_v41, %v1773_v29 }
 0x194   :  { %v5489_v1 = vpop.eup %5488  ;;  %v1781_v63 = vmul.f32 %v5487_v55, %v6479_v59  ;;  %5508 = vtanh.f32 %v496_v51  ;;  %v499_v2 = vpop.f32.mrb[52].mxu0  ;;  %v753_v15 = vadd.f32 %v752_v61, %v6440_v30  ;;  %v6765_v60 = vrot.slane %v6761_v4, %v6736_v54 }
 0x195   :  { %v5491_v5 = vpop.eup %5490  ;;  %5510 = vtanh.f32 %v751_v56  ;;  %v500_v6 = vadd.f32 %v499_v2, %v6427_v26  ;;  %v501_v22 = vpop.f32.mrb[53].mxu0  ;;  %v6768_v33 = vadd.f32 %v2049_v0, %v1774_v38  ;;  %v1782_v29 = vmul.f32 %v5489_v1, %v6485_v62 }
 0x196   :  { %v5493_v34 = vpop.eup %5492  ;;  %v1787_v18 = vmul.f32 %v5491_v5, %v6466_v50  ;;  %v502_v37 = vadd.f32 %v501_v22, %v6431_v27  ;;  %5512 = vtanh.f32 %v753_v15  ;;  %v756_v11 = vpop.f32.mrb[52].mxu1  ;;  %v2057_v16 = vadd.f32 %v1780_v46, %v1779_v44 }
 0x197   :  { %v5495_v41 = vpop.eup %5494  ;;  %v1788_v45 = vmul.f32 %v5493_v34, %v6471_v53  ;;  %5514 = vtanh.f32 %v500_v6  ;;  %v757_v51 = vadd.f32 %v756_v11, %v6436_v28  ;;  %v758_v52 = vpop.f32.mrb[53].mxu1  ;;  %v6777_v38 = vrot.slane %v6761_v4, %v6747_v7 }
 0x198   :  { %v5497_v55 = vpop.eup %5496  ;;  %v1789_v56 = vmul.f32 %v5495_v41, %v6479_v59  ;;  %5516 = vtanh.f32 %v502_v37  ;;  %v505_v61 = vpop.f32.mrb[54].mxu0  ;;  %v759_v0 = vadd.f32 %v758_v52, %v6440_v30  ;;  %v2058_v1 = vadd.f32 %v2057_v16, %v1781_v63 }
 0x199   :  { %v5499_v44 = vpop.eup %5498  ;;  %5518 = vtanh.f32 %v757_v51  ;;  %v506_v46 = vadd.f32 %v505_v61, %v6427_v26  ;;  %v507_v2 = vpop.f32.mrb[55].mxu0  ;;  %v1790_v15 = vmul.f32 %v5497_v55, %v6485_v62  ;;  %v2066_v5 = vadd.f32 %v1788_v45, %v1787_v18 }
 0x19a   :  { %v5501_v6 = vpop.eup %5500  ;;  %v1795_v22 = vmul.f32 %v5499_v44, %v6466_v50  ;;  %v508_v34 = vadd.f32 %v507_v2, %v6431_v27  ;;  %5520 = vtanh.f32 %v759_v0  ;;  %v762_v11 = vpop.f32.mrb[54].mxu1  ;;  %v6785_v37 = vadd.f32 %v2058_v1, %v1782_v29 }
 0x19b   :  { %v5503_v41 = vpop.eup %5502  ;;  %v1796_v63 = vmul.f32 %v5501_v6, %v6471_v53  ;;  %5522 = vtanh.f32 %v506_v46  ;;  %v763_v16 = vadd.f32 %v762_v11, %v6436_v28  ;;  %v764_v51 = vpop.f32.mrb[55].mxu1  ;;  %v2067_v52 = vadd.f32 %v2066_v5, %v1789_v56 }
 0x19c   :  { %v5505_v61 = vpop.eup %5504  ;;  %v1797_v18 = vmul.f32 %v5503_v41, %v6479_v59  ;;  %5524 = vtanh.f32 %v508_v34  ;;  %v511_v45 = vpop.f32.mrb[56].mxu0  ;;  %v765_v55 = vadd.f32 %v764_v51, %v6440_v30  ;;  %v6792_v0 = vsub.s32 6, %v6400_v20 }
 0x19d   :  { %v5507_v29 = vpop.eup %5506  ;;  %5526 = vtanh.f32 %v763_v16  ;;  %v512_v1 = vadd.f32 %v511_v45, %v6427_v26  ;;  %v513_v44 = vpop.f32.mrb[57].mxu0  ;;  %v6795_v46 = vadd.f32 %v2067_v52, %v1790_v15  ;;  %v1798_v2 = vmul.f32 %v5505_v61, %v6485_v62  ;;  %v2147_v52 = vld [vmem:[#allocation2] sm:$0x1] }
 0x19e   :  { %v5509_v56 = vpop.eup %5508  ;;  %v1803_v5 = vmul.f32 %v5507_v29, %v6466_v50  ;;  %v514_v6 = vadd.f32 %v513_v44, %v6431_v27  ;;  %5528 = vtanh.f32 %v765_v55  ;;  %v768_v34 = vpop.f32.mrb[56].mxu1  ;;  %v2075_v11 = vadd.f32 %v1796_v63, %v1795_v22  ;;  %5290 = vpush %v2147_v52 }
 0x19f   :  { %v5511_v41 = vpop.eup %5510  ;;  %v1804_v51 = vmul.f32 %v5509_v56, %v6471_v53  ;;  %5530 = vtanh.f32 %v512_v1  ;;  %v769_v16 = vadd.f32 %v768_v34, %v6436_v28  ;;  %v770_v45 = vpop.f32.mrb[57].mxu1  ;;  %v6803_v15 = vsub.s32 7, %v6400_v20 }
 0x1a0   :  { %v5513_v61 = vpop.eup %5512  ;;  %v1805_v19 = vmul.f32 %v5511_v41, %v6479_v59  ;;  %5532 = vtanh.f32 %v514_v6  ;;  %v517_v29 = vpop.f32.mrb[58].mxu0  ;;  %v771_v55 = vadd.f32 %v770_v45, %v6440_v30  ;;  %v2076_v22 = vadd.f32 %v2075_v11, %v1797_v18 }
 0x1a1   :  { %v5515_v63 = vpop.eup %5514  ;;  %5534 = vtanh.f32 %v769_v16  ;;  %v518_v1 = vadd.f32 %v517_v29, %v6427_v26  ;;  %v519_v44 = vpop.f32.mrb[59].mxu0  ;;  %v1806_v56 = vmul.f32 %v5513_v61, %v6485_v62  ;;  %v2084_v34 = vadd.f32 %v1804_v51, %v1803_v5 }
 0x1a2   :  { %v5517_v25 = vpop.eup %5516  ;;  %v1811_v24 = vmul.f32 %v5515_v63, %v6466_v50  ;;  %v520_v23 = vadd.f32 %v519_v44, %v6431_v27  ;;  %5536 = vtanh.f32 %v771_v55  ;;  %v774_v6 = vpop.f32.mrb[58].mxu1  ;;  %v6811_v41 = vadd.f32 %v2076_v22, %v1798_v2 }
 0x1a3   :  { %v5519_v45 = vpop.eup %5518  ;;  %v1812_v18 = vmul.f32 %v5517_v25, %v6471_v53  ;;  %5538 = vtanh.f32 %v518_v1  ;;  %v775_v11 = vadd.f32 %v774_v6, %v6436_v28  ;;  %v776_v16 = vpop.f32.mrb[59].mxu1  ;;  %v2085_v52 = vadd.f32 %v2084_v34, %v1805_v19 }
 0x1a4   :  { %v5521_v29 = vpop.eup %5520  ;;  %v1813_v5 = vmul.f32 %v5519_v45, %v6479_v59  ;;  %5540 = vtanh.f32 %v520_v23  ;;  %v523_v51 = vpop.f32.mrb[60].mxu0  ;;  %v777_v61 = vadd.f32 %v776_v16, %v6440_v30  ;;  %v6819_v55 = vrot.slane %v6761_v4, %v6792_v0 }
 0x1a5   :  { %v5523_v2 = vpop.eup %5522  ;;  %5542 = vtanh.f32 %v775_v11  ;;  %v524_v25 = vadd.f32 %v523_v51, %v6427_v26  ;;  %v525_v22 = vpop.f32.mrb[61].mxu0  ;;  %v6822_v63 = vadd.f32 %v2085_v52, %v1806_v56  ;;  %v1814_v19 = vmul.f32 %v5521_v29, %v6485_v62 }
 0x1a6   :  { %v5525_v1 = vpop.eup %5524  ;;  %v1819_v44 = vmul.f32 %v5523_v2, %v6466_v50  ;;  %v526_v23 = vadd.f32 %v525_v22, %v6431_v27  ;;  %5544 = vtanh.f32 %v777_v61  ;;  %v780_v34 = vpop.f32.mrb[60].mxu1  ;;  %v2093_v6 = vadd.f32 %v1812_v18, %v1811_v24 }
 0x1a7   :  { %8081 = vst [vmem:[#allocation22_spill] sm:$0xff] %v6822_v63  ;;  %v5527_v45 = vpop.eup %5526  ;;  %v1820_v16 = vmul.f32 %v5525_v1, %v6471_v53  ;;  %5546 = vtanh.f32 %v524_v25  ;;  %v781_v11 = vadd.f32 %v780_v34, %v6436_v28  ;;  %v782_v51 = vpop.f32.mrb[61].mxu1  ;;  %v6831_v56 = vrot.slane %v6761_v4, %v6803_v15 }
 0x1a8   :  { %v5529_v52 = vpop.eup %5528  ;;  %v1821_v29 = vmul.f32 %v5527_v45, %v6479_v59  ;;  %5548 = vtanh.f32 %v526_v23  ;;  %v529_v2 = vpop.f32.mrb[62].mxu0  ;;  %v783_v61 = vadd.f32 %v782_v51, %v6440_v30  ;;  %v2094_v22 = vadd.f32 %v2093_v6, %v1813_v5 }
 0x1a9   :  { %v5531_v24 = vpop.eup %5530  ;;  %5550 = vtanh.f32 %v781_v11  ;;  %v530_v18 = vadd.f32 %v529_v2, %v6427_v26  ;;  %v531_v25 = vpop.f32.mrb[63].mxu0  ;;  %v1822_v1 = vmul.f32 %v5529_v52, %v6485_v62  ;;  %v2102_v34 = vadd.f32 %v1820_v16, %v1819_v44 }
 0x1aa   :  { %v5533_v21 = vpop.eup %5532  ;;  %v1827_v4 = vmul.f32 %v5531_v24, %v6466_v50  ;;  %v532_v20 = vadd.f32 %v531_v25, %v6431_v27  ;;  %5552 = vtanh.f32 %v783_v61  ;;  %v786_v45 = vpop.f32.mrb[62].mxu1  ;;  %v6839_v23 = vadd.f32 %v2094_v22, %v1814_v19  ;;  %v6845_v27 = vld [vmem:[#allocation9] sm:$0xff] }
 0x1ab   :  { %v5535_v63 = vpop.eup %5534  ;;  %v1828_v5 = vmul.f32 %v5533_v21, %v6471_v53  ;;  %5554 = vtanh.f32 %v530_v18  ;;  %v787_v6 = vadd.f32 %v786_v45, %v6436_v28  ;;  %v788_v26 = vpop.f32.mrb[63].mxu1  ;;  %v2103_v11 = vadd.f32 %v2102_v34, %v1821_v29 }
 0x1ac   :  { %v5537_v51 = vpop.eup %5536  ;;  %v1829_v44 = vmul.f32 %v5535_v63, %v6479_v59  ;;  %5556 = vtanh.f32 %v532_v20  ;;  %v857_v16 = vpop.f32.mrb[64].mxu0  ;;  %v789_v52 = vadd.f32 %v788_v26, %v6440_v30  ;;  %v6849_v19 = vrot.slane %v6845_v27, %v6736_v54 }
 0x1ad   :  { %v5539_v2 = vpop.eup %5538  ;;  %5558 = vtanh.f32 %v787_v6  ;;  %v858_v21 = vadd.f32 %v857_v16, %v6765_v60  ;;  %v859_v28 = vpop.f32.mrb[65].mxu0  ;;  %v6852_v61 = vadd.f32 %v2103_v11, %v1822_v1  ;;  %v1830_v29 = vmul.f32 %v5537_v51, %v6485_v62 }
 0x1ae   :  { %v5541_v63 = vpop.eup %5540  ;;  %v1835_v20 = vmul.f32 %v5539_v2, %v6466_v50  ;;  %5560 = vtanh.f32 %v789_v52  ;;  %v860_v30 = vadd.f32 %v859_v28, %v6777_v38  ;;  %v1114_v22 = vpop.f32.mrb[64].mxu1  ;;  %v2111_v24 = vadd.f32 %v1828_v5, %v1827_v4 }
 0x1af   :  { %v5543_v18 = vpop.eup %5542  ;;  %v1836_v25 = vmul.f32 %v5541_v63, %v6471_v53  ;;  %5562 = vtanh.f32 %v858_v21  ;;  %v1115_v34 = vadd.f32 %v1114_v22, %v6819_v55  ;;  %v1116_v45 = vpop.f32.mrb[65].mxu1  ;;  %v6861_v1 = vrot.slane %v6845_v27, %v6747_v7 }
 0x1b0   :  { %v5545_v6 = vpop.eup %5544  ;;  %v1837_v26 = vmul.f32 %v5543_v18, %v6479_v59  ;;  %5564 = vtanh.f32 %v860_v30  ;;  %v863_v11 = vpop.f32.mrb[66].mxu0  ;;  %v1117_v51 = vadd.f32 %v1116_v45, %v6831_v56  ;;  %v2112_v16 = vadd.f32 %v2111_v24, %v1829_v44 }
 0x1b1   :  { %v5547_v4 = vpop.eup %5546  ;;  %v864_v5 = vadd.f32 %v863_v11, %v6765_v60  ;;  %5566 = vtanh.f32 %v1115_v34  ;;  %v865_v52 = vpop.f32.mrb[67].mxu0  ;;  %v1838_v2 = vmul.f32 %v5545_v6, %v6485_v62  ;;  %v2120_v21 = vadd.f32 %v1836_v25, %v1835_v20 }
 0x1b2   :  { %v5549_v28 = vpop.eup %5548  ;;  %v1843_v63 = vmul.f32 %v5547_v4, %v6466_v50  ;;  %v866_v22 = vadd.f32 %v865_v52, %v6777_v38  ;;  %5568 = vtanh.f32 %v1117_v51  ;;  %v1120_v18 = vpop.f32.mrb[66].mxu1  ;;  %v6869_v30 = vadd.f32 %v2112_v16, %v1830_v29 }
 0x1b3   :  { %v5551_v7 = vpop.eup %5550  ;;  %v1844_v44 = vmul.f32 %v5549_v28, %v6471_v53  ;;  %5570 = vtanh.f32 %v864_v5  ;;  %v1121_v24 = vadd.f32 %v1120_v18, %v6819_v55  ;;  %v1122_v34 = vpop.f32.mrb[67].mxu1  ;;  %v2121_v45 = vadd.f32 %v2120_v21, %v1837_v26 }
 0x1b4   :  { %v5553_v11 = vpop.eup %5552  ;;  %v1845_v20 = vmul.f32 %v5551_v7, %v6479_v59  ;;  %5572 = vtanh.f32 %v866_v22  ;;  %v869_v25 = vpop.f32.mrb[68].mxu0  ;;  %v1123_v6 = vadd.f32 %v1122_v34, %v6831_v56  ;;  %v6877_v51 = vrot.slane %v6845_v27, %v6792_v0 }
 0x1b5   :  { %v5555_v29 = vpop.eup %5554  ;;  %v870_v16 = vadd.f32 %v869_v25, %v6765_v60  ;;  %5574 = vtanh.f32 %v1121_v24  ;;  %v871_v4 = vpop.f32.mrb[69].mxu0  ;;  %v6880_v5 = vadd.f32 %v2121_v45, %v1838_v2  ;;  %v1846_v26 = vmul.f32 %v5553_v11, %v6485_v62 }
 0x1b6   :  { %v5557_v52 = vpop.eup %5556  ;;  %v1851_v7 = vmul.f32 %v5555_v29, %v6466_v50  ;;  %v872_v21 = vadd.f32 %v871_v4, %v6777_v38  ;;  %5576 = vtanh.f32 %v1123_v6  ;;  %v1126_v28 = vpop.f32.mrb[68].mxu1  ;;  %v2129_v22 = vadd.f32 %v1844_v44, %v1843_v63 }
 0x1b7   :  { %v5559_v18 = vpop.eup %5558  ;;  %v1852_v34 = vmul.f32 %v5557_v52, %v6471_v53  ;;  %5578 = vtanh.f32 %v870_v16  ;;  %v1127_v25 = vadd.f32 %v1126_v28, %v6819_v55  ;;  %v1128_v24 = vpop.f32.mrb[69].mxu1  ;;  %v6889_v2 = vrot.slane %v6845_v27, %v6803_v15 }
 0x1b8   :  { %v5561_v45 = vpop.eup %5560  ;;  %v1853_v11 = vmul.f32 %v5559_v18, %v6479_v59  ;;  %5580 = vtanh.f32 %v872_v21  ;;  %v875_v50 = vpop.f32.mrb[70].mxu0  ;;  %v1129_v6 = vadd.f32 %v1128_v24, %v6831_v56  ;;  %v2130_v29 = vadd.f32 %v2129_v22, %v1845_v20 }
 0x1b9   :  { %v5563_v63 = vpop.eup %5562  ;;  %v876_v44 = vadd.f32 %v875_v50, %v6765_v60  ;;  %5582 = vtanh.f32 %v1127_v25  ;;  %v877_v53 = vpop.f32.mrb[71].mxu0  ;;  %v1854_v16 = vmul.f32 %v5561_v45, %v6485_v62  ;;  %v2138_v4 = vadd.f32 %v1852_v34, %v1851_v7 }
 0x1ba   :  { %v5565_v52 = vpop.eup %5564  ;;  %v878_v27 = vadd.f32 %v877_v53, %v6777_v38  ;;  %5584 = vtanh.f32 %v1129_v6  ;;  %v1132_v28 = vpop.f32.mrb[70].mxu1  ;;  %v1607_v59 = vmul.f32 %v5563_v63, %v6849_v19  ;;  %v6897_v21 = vadd.f32 %v2130_v29, %v1846_v26 }
 0x1bb   :  { %v5567_v18 = vpop.eup %5566  ;;  %5586 = vtanh.f32 %v876_v44  ;;  %v1133_v20 = vadd.f32 %v1132_v28, %v6819_v55  ;;  %v1134_v22 = vpop.f32.mrb[71].mxu1  ;;  %v1608_v25 = vmul.f32 %v5565_v52, %v6861_v1  ;;  %v2139_v24 = vadd.f32 %v2138_v4, %v1853_v11 }
 0x1bc   :  { %v5569_v50 = vpop.eup %5568  ;;  %5588 = vtanh.f32 %v878_v27  ;;  %v881_v62 = vpop.f32.mrb[72].mxu0  ;;  %v1135_v7 = vadd.f32 %v1134_v22, %v6831_v56  ;;  %v1609_v34 = vmul.f32 %v5567_v18, %v6877_v51  ;;  %v1862_v45 = vadd.f32 %v6518_v57, %v1607_v59 }
 0x1bd   :  { %v5571_v6 = vpop.eup %5570  ;;  %v882_v26 = vadd.f32 %v881_v62, %v6765_v60  ;;  %5590 = vtanh.f32 %v1133_v20  ;;  %v883_v29 = vpop.f32.mrb[73].mxu0  ;;  %v6905_v63 = vadd.f32 %v2139_v24, %v1854_v16  ;;  %v1610_v22 = vmul.f32 %v5569_v50, %v6889_v2 }
 0x1be   :  { %v5573_v44 = vpop.eup %5572  ;;  %v884_v53 = vadd.f32 %v883_v29, %v6777_v38  ;;  %5592 = vtanh.f32 %v1135_v7  ;;  %v1138_v11 = vpop.f32.mrb[72].mxu1  ;;  %v1863_v4 = vadd.f32 %v1862_v45, %v1608_v25  ;;  %v1615_v52 = vmul.f32 %v5571_v6, %v6849_v19 }
 0x1bf   :  { %v5575_v27 = vpop.eup %5574  ;;  %5594 = vtanh.f32 %v882_v26  ;;  %v1139_v28 = vadd.f32 %v1138_v11, %v6819_v55  ;;  %v1140_v57 = vpop.f32.mrb[73].mxu1  ;;  %v1616_v59 = vmul.f32 %v5573_v44, %v6861_v1 }
 0x1c0   :  { %v5577_v18 = vpop.eup %5576  ;;  %5596 = vtanh.f32 %v884_v53  ;;  %v887_v20 = vpop.f32.mrb[74].mxu0  ;;  %v1141_v16 = vadd.f32 %v1140_v57, %v6831_v56  ;;  %v1864_v24 = vadd.f32 %v1863_v4, %v1609_v34  ;;  %v1617_v45 = vmul.f32 %v5575_v27, %v6877_v51 }
 0x1c1   :  { %v5579_v62 = vpop.eup %5578  ;;  %v888_v25 = vadd.f32 %v887_v20, %v6765_v60  ;;  %5598 = vtanh.f32 %v1139_v28  ;;  %v889_v7 = vpop.f32.mrb[75].mxu0  ;;  %v1871_v6 = vadd.f32 %v6530_v9, %v1615_v52 }
 0x1c2   :  { %v5581_v26 = vpop.eup %5580  ;;  %v890_v29 = vadd.f32 %v889_v7, %v6777_v38  ;;  %5600 = vtanh.f32 %v1141_v16  ;;  %v1144_v44 = vpop.f32.mrb[74].mxu1  ;;  %v1865_v53 = vadd.f32 %v1864_v24, %v1610_v22  ;;  %v1623_v11 = vmul.f32 %v5579_v62, %v6849_v19 }
 0x1c3   :  { %v5583_v57 = vpop.eup %5582  ;;  %5602 = vtanh.f32 %v888_v25  ;;  %v1145_v50 = vadd.f32 %v1144_v44, %v6819_v55  ;;  %v1146_v34 = vpop.f32.mrb[75].mxu1  ;;  %v1872_v4 = vadd.f32 %v1871_v6, %v1616_v59  ;;  %v1624_v28 = vmul.f32 %v5581_v26, %v6861_v1 }
 0x1c4   :  { %v5585_v20 = vpop.eup %5584  ;;  %5604 = vtanh.f32 %v890_v29  ;;  %v893_v27 = vpop.f32.mrb[76].mxu0  ;;  %1866 = vadd.xlane.f32.xlu0 %v1865_v53  ;;  %v1147_v9 = vadd.f32 %v1146_v34, %v6831_v56  ;;  %v1625_v52 = vmul.f32 %v5583_v57, %v6877_v51  ;;  %v1880_v16 = vadd.f32 %v6550_v49, %v1623_v11 }
 0x1c5   :  { %v5587_v22 = vpop.eup %5586  ;;  %v894_v24 = vadd.f32 %v893_v27, %v6765_v60  ;;  %5606 = vtanh.f32 %v1145_v50  ;;  %v895_v62 = vpop.f32.mrb[77].mxu0  ;;  %v1618_v25 = vmul.f32 %v5577_v18, %v6889_v2  ;;  %v1873_v59 = vadd.f32 %v1872_v4, %v1617_v45 }
 0x1c6   :  { %v5589_v7 = vpop.eup %5588  ;;  %v896_v6 = vadd.f32 %v895_v62, %v6777_v38  ;;  %5608 = vtanh.f32 %v1147_v9  ;;  %v1150_v26 = vpop.f32.mrb[76].mxu1  ;;  %v1881_v29 = vadd.f32 %v1880_v16, %v1624_v28  ;;  %v1631_v44 = vmul.f32 %v5587_v22, %v6849_v19 }
 0x1c7   :  { %v5591_v53 = vpop.eup %5590  ;;  %5610 = vtanh.f32 %v894_v24  ;;  %v1151_v49 = vadd.f32 %v1150_v26, %v6819_v55  ;;  %v1874_v11 = vadd.f32 %v1873_v59, %v1618_v25  ;;  %v1152_v57 = vpop.f32.mrb[77].mxu1  ;;  %v1632_v50 = vmul.f32 %v5589_v7, %v6861_v1 }
 0x1c8   :  { %v5593_v34 = vpop.eup %5592  ;;  %5612 = vtanh.f32 %v896_v6  ;;  %v899_v18 = vpop.f32.mrb[78].mxu0  ;;  %v1153_v45 = vadd.f32 %v1152_v57, %v6831_v56  ;;  %v1626_v4 = vmul.f32 %v5585_v20, %v6889_v2  ;;  %v1882_v27 = vadd.f32 %v1881_v29, %v1625_v52 }
 0x1c9   :  { %v5595_v9 = vpop.eup %5594  ;;  %v900_v28 = vadd.f32 %v899_v18, %v6765_v60  ;;  %5614 = vtanh.f32 %v1151_v49  ;;  %1875 = vadd.xlane.f32.xlu0 %v1874_v11  ;;  %v901_v16 = vpop.f32.mrb[79].mxu0  ;;  %v1633_v22 = vmul.f32 %v5591_v53, %v6877_v51  ;;  %v1889_v24 = vadd.f32 %v6562_v3, %v1631_v44 }
 0x1ca   :  { %v5597_v62 = vpop.eup %5596  ;;  %v902_v25 = vadd.f32 %v901_v16, %v6777_v38  ;;  %5616 = vtanh.f32 %v1153_v45  ;;  %v1156_v59 = vpop.f32.mrb[78].mxu1  ;;  %v1883_v7 = vadd.f32 %v1882_v27, %v1626_v4  ;;  %v1639_v6 = vmul.f32 %v5595_v9, %v6849_v19 }
 0x1cb   :  { %v5599_v20 = vpop.eup %5598  ;;  %5618 = vtanh.f32 %v900_v28  ;;  %v1157_v52 = vadd.f32 %v1156_v59, %v6819_v55  ;;  %v1158_v26 = vpop.f32.mrb[79].mxu1  ;;  %v1890_v29 = vadd.f32 %v1889_v24, %v1632_v50  ;;  %v1640_v49 = vmul.f32 %v5597_v62, %v6861_v1 }
 0x1cc   :  { %v5601_v11 = vpop.eup %5600  ;;  %5620 = vtanh.f32 %v902_v25  ;;  %v905_v53 = vpop.f32.mrb[80].mxu0  ;;  %1884 = vadd.xlane.f32.xlu1 %v1883_v7  ;;  %v1159_v3 = vadd.f32 %v1158_v26, %v6831_v56  ;;  %v1641_v44 = vmul.f32 %v5599_v20, %v6877_v51  ;;  %v1898_v57 = vadd.f32 %v6582_v43, %v1639_v6 }
 0x1cd   :  { %v5603_v18 = vpop.eup %5602  ;;  %v906_v45 = vadd.f32 %v905_v53, %v6765_v60  ;;  %5622 = vtanh.f32 %v1157_v52  ;;  %v907_v4 = vpop.f32.mrb[81].mxu0  ;;  %v1634_v27 = vmul.f32 %v5593_v34, %v6889_v2  ;;  %v1891_v50 = vadd.f32 %v1890_v29, %v1633_v22 }
 0x1ce   :  { %v5605_v9 = vpop.eup %5604  ;;  %v908_v28 = vadd.f32 %v907_v4, %v6777_v38  ;;  %5624 = vtanh.f32 %v1159_v3  ;;  %v1162_v16 = vpop.f32.mrb[80].mxu1  ;;  %v1899_v24 = vadd.f32 %v1898_v57, %v1640_v49  ;;  %v1647_v62 = vmul.f32 %v5603_v18, %v6849_v19 }
 0x1cf   :  { %v5607_v25 = vpop.eup %5606  ;;  %5626 = vtanh.f32 %v906_v45  ;;  %v1163_v43 = vadd.f32 %v1162_v16, %v6819_v55  ;;  %v1892_v59 = vadd.f32 %v1891_v50, %v1634_v27  ;;  %v1164_v7 = vpop.f32.mrb[81].mxu1  ;;  %v1648_v6 = vmul.f32 %v5605_v9, %v6861_v1  ;;  %s5291_s3 = spop %5290 }
 0x1d0   :  { %v5609_v20 = vpop.eup %5608  ;;  %5628 = vtanh.f32 %v908_v28  ;;  %v911_v34 = vpop.f32.mrb[82].mxu0  ;;  %v1165_v22 = vadd.f32 %v1164_v7, %v6831_v56  ;;  %v1642_v52 = vmul.f32 %v5601_v11, %v6889_v2  ;;  %v1900_v26 = vadd.f32 %v1899_v24, %v1641_v44 }
 0x1d1   :  { %v5611_v29 = vpop.eup %5610  ;;  %v912_v49 = vadd.f32 %v911_v34, %v6765_v60  ;;  %5630 = vtanh.f32 %v1163_v43  ;;  %1893 = vadd.xlane.f32.xlu1 %v1892_v59  ;;  %v913_v53 = vpop.f32.mrb[83].mxu0  ;;  %v1649_v3 = vmul.f32 %v5607_v25, %v6877_v51  ;;  %v1907_v57 = vadd.f32 %v6594_v58, %v1647_v62 }
 0x1d2   :  { %v5613_v18 = vpop.eup %5612  ;;  %v914_v45 = vadd.f32 %v913_v53, %v6777_v38  ;;  %5632 = vtanh.f32 %v1165_v22  ;;  %v1168_v4 = vpop.f32.mrb[82].mxu1  ;;  %v1901_v27 = vadd.f32 %v1900_v26, %v1642_v52  ;;  %v1655_v50 = vmul.f32 %v5611_v29, %v6849_v19 }
 0x1d3   :  { %v5615_v11 = vpop.eup %5614  ;;  %5634 = vtanh.f32 %v912_v49  ;;  %v1169_v44 = vadd.f32 %v1168_v4, %v6819_v55  ;;  %v1170_v9 = vpop.f32.mrb[83].mxu1  ;;  %v1908_v28 = vadd.f32 %v1907_v57, %v1648_v6  ;;  %v1656_v16 = vmul.f32 %v5613_v18, %v6861_v1 }
 0x1d4   :  { %v5617_v24 = vpop.eup %5616  ;;  %5636 = vtanh.f32 %v914_v45  ;;  %v917_v25 = vpop.f32.mrb[84].mxu0  ;;  %1902 = vadd.xlane.f32.xlu0 %v1901_v27  ;;  %v1171_v58 = vadd.f32 %v1170_v9, %v6831_v56  ;;  %v1657_v62 = vmul.f32 %v5615_v11, %v6877_v51  ;;  %v1916_v43 = vadd.f32 %v6609_v36, %v1655_v50 }
 0x1d5   :  { %v5619_v59 = vpop.eup %5618  ;;  %v918_v7 = vadd.f32 %v917_v25, %v6765_v60  ;;  %5638 = vtanh.f32 %v1169_v44  ;;  %v919_v34 = vpop.f32.mrb[85].mxu0  ;;  %v1650_v22 = vmul.f32 %v5609_v20, %v6889_v2  ;;  %v1909_v6 = vadd.f32 %v1908_v28, %v1649_v3 }
 0x1d6   :  { %v5621_v52 = vpop.eup %5620  ;;  %v920_v26 = vadd.f32 %v919_v34, %v6777_v38  ;;  %5640 = vtanh.f32 %v1171_v58  ;;  %v1174_v29 = vpop.f32.mrb[84].mxu1  ;;  %v1917_v49 = vadd.f32 %v1916_v43, %v1656_v16  ;;  %v1663_v53 = vmul.f32 %v5619_v59, %v6849_v19 }
 0x1d7   :  { %v5623_v57 = vpop.eup %5622  ;;  %5642 = vtanh.f32 %v918_v7  ;;  %v1175_v36 = vadd.f32 %v1174_v29, %v6819_v55  ;;  %v1910_v18 = vadd.f32 %v1909_v6, %v1650_v22  ;;  %v1176_v45 = vpop.f32.mrb[85].mxu1  ;;  %v1664_v4 = vmul.f32 %v5621_v52, %v6861_v1 }
 0x1d8   :  { %v5625_v27 = vpop.eup %5624  ;;  %5644 = vtanh.f32 %v920_v26  ;;  %v923_v20 = vpop.f32.mrb[86].mxu0  ;;  %v1177_v3 = vadd.f32 %v1176_v45, %v6831_v56  ;;  %v1658_v50 = vmul.f32 %v5617_v24, %v6889_v2  ;;  %v1918_v11 = vadd.f32 %v1917_v49, %v1657_v62 }
 0x1d9   :  { %v5627_v44 = vpop.eup %5626  ;;  %v924_v9 = vadd.f32 %v923_v20, %v6765_v60  ;;  %5646 = vtanh.f32 %v1175_v36  ;;  %1911 = vadd.xlane.f32.xlu1 %v1910_v18  ;;  %v925_v28 = vpop.f32.mrb[87].mxu0  ;;  %v1665_v16 = vmul.f32 %v5623_v57, %v6877_v51  ;;  %v1925_v25 = vadd.f32 %v6616_v48, %v1663_v53 }
 0x1da   :  { %v5629_v58 = vpop.eup %5628  ;;  %v926_v43 = vadd.f32 %v925_v28, %v6777_v38  ;;  %5648 = vtanh.f32 %v1177_v3  ;;  %v1180_v59 = vpop.f32.mrb[86].mxu1  ;;  %v1919_v7 = vadd.f32 %v1918_v11, %v1658_v50  ;;  %v1671_v34 = vmul.f32 %v5627_v44, %v6849_v19 }
 0x1db   :  { %v5631_v24 = vpop.eup %5630  ;;  %5650 = vtanh.f32 %v924_v9  ;;  %v1181_v62 = vadd.f32 %v1180_v59, %v6819_v55  ;;  %v1182_v22 = vpop.f32.mrb[87].mxu1  ;;  %v1926_v6 = vadd.f32 %v1925_v25, %v1664_v4  ;;  %v1672_v52 = vmul.f32 %v5629_v58, %v6861_v1 }
 0x1dc   :  { %v5633_v26 = vpop.eup %5632  ;;  %5652 = vtanh.f32 %v926_v43  ;;  %v929_v29 = vpop.f32.mrb[88].mxu0  ;;  %1920 = vadd.xlane.f32.xlu0 %v1919_v7  ;;  %v1183_v48 = vadd.f32 %v1182_v22, %v6831_v56  ;;  %v1673_v49 = vmul.f32 %v5631_v24, %v6877_v51  ;;  %v1934_v53 = vadd.f32 %v6629_v32, %v1671_v34 }
 0x1dd   :  { %v5635_v57 = vpop.eup %5634  ;;  %v930_v36 = vadd.f32 %v929_v29, %v6765_v60  ;;  %5654 = vtanh.f32 %v1181_v62  ;;  %v931_v18 = vpop.f32.mrb[89].mxu0  ;;  %v1666_v45 = vmul.f32 %v5625_v27, %v6889_v2  ;;  %v1927_v4 = vadd.f32 %v1926_v6, %v1665_v16 }
 0x1de   :  { %v5637_v20 = vpop.eup %5636  ;;  %v932_v3 = vadd.f32 %v931_v18, %v6777_v38  ;;  %5656 = vtanh.f32 %v1183_v48  ;;  %v1186_v50 = vpop.f32.mrb[88].mxu1  ;;  %v1935_v11 = vadd.f32 %v1934_v53, %v1672_v52  ;;  %v1679_v44 = vmul.f32 %v5635_v57, %v6849_v19 }
 0x1df   :  { %v5639_v9 = vpop.eup %5638  ;;  %5658 = vtanh.f32 %v930_v36  ;;  %v1187_v32 = vadd.f32 %v1186_v50, %v6819_v55  ;;  %v1928_v28 = vadd.f32 %v1927_v4, %v1666_v45  ;;  %v1188_v25 = vpop.f32.mrb[89].mxu1  ;;  %v1680_v58 = vmul.f32 %v5637_v20, %v6861_v1 }
 0x1e0   :  { %v5641_v43 = vpop.eup %5640  ;;  %5660 = vtanh.f32 %v932_v3  ;;  %v935_v27 = vpop.f32.mrb[90].mxu0  ;;  %v1189_v16 = vadd.f32 %v1188_v25, %v6831_v56  ;;  %v1674_v59 = vmul.f32 %v5633_v26, %v6889_v2  ;;  %v1936_v7 = vadd.f32 %v1935_v11, %v1673_v49 }
 0x1e1   :  { %v5643_v34 = vpop.eup %5642  ;;  %v936_v24 = vadd.f32 %v935_v27, %v6765_v60  ;;  %5662 = vtanh.f32 %v1187_v32  ;;  %1929 = vadd.xlane.f32.xlu1 %v1928_v28  ;;  %v937_v62 = vpop.f32.mrb[91].mxu0  ;;  %v1681_v22 = vmul.f32 %v5639_v9, %v6877_v51  ;;  %v1943_v6 = vadd.f32 %v6636_v14, %v1679_v44 }
 0x1e2   :  { %v5645_v52 = vpop.eup %5644  ;;  %v938_v29 = vadd.f32 %v937_v62, %v6777_v38  ;;  %5664 = vtanh.f32 %v1189_v16  ;;  %v1192_v48 = vpop.f32.mrb[90].mxu1  ;;  %v1937_v53 = vadd.f32 %v1936_v7, %v1674_v59  ;;  %v1687_v57 = vmul.f32 %v5643_v34, %v6849_v19 }
 0x1e3   :  { %v5647_v26 = vpop.eup %5646  ;;  %5666 = vtanh.f32 %v936_v24  ;;  %v1193_v49 = vadd.f32 %v1192_v48, %v6819_v55  ;;  %v1194_v36 = vpop.f32.mrb[91].mxu1  ;;  %v1944_v18 = vadd.f32 %v1943_v6, %v1680_v58  ;;  %v1688_v45 = vmul.f32 %v5645_v52, %v6861_v1 }
 0x1e4   :  { %v5649_v4 = vpop.eup %5648  ;;  %5668 = vtanh.f32 %v938_v29  ;;  %v941_v20 = vpop.f32.mrb[92].mxu0  ;;  %1938 = vadd.xlane.f32.xlu0 %v1937_v53  ;;  %v1195_v14 = vadd.f32 %v1194_v36, %v6831_v56  ;;  %v1689_v3 = vmul.f32 %v5647_v26, %v6877_v51  ;;  %v1952_v50 = vadd.f32 %v6649_v10, %v1687_v57 }
 0x1e5   :  { %v5651_v11 = vpop.eup %5650  ;;  %v942_v44 = vadd.f32 %v941_v20, %v6765_v60  ;;  %5670 = vtanh.f32 %v1193_v49  ;;  %v943_v9 = vpop.f32.mrb[93].mxu0  ;;  %v1682_v32 = vmul.f32 %v5641_v43, %v6889_v2  ;;  %v1945_v28 = vadd.f32 %v1944_v18, %v1681_v22 }
 0x1e6   :  { %v5653_v25 = vpop.eup %5652  ;;  %v944_v58 = vadd.f32 %v943_v9, %v6777_v38  ;;  %5672 = vtanh.f32 %v1195_v14  ;;  %v1198_v27 = vpop.f32.mrb[92].mxu1  ;;  %v1953_v16 = vadd.f32 %v1952_v50, %v1688_v45  ;;  %v1695_v59 = vmul.f32 %v5651_v11, %v6849_v19 }
 0x1e7   :  { %v5655_v7 = vpop.eup %5654  ;;  %5674 = vtanh.f32 %v942_v44  ;;  %v1199_v10 = vadd.f32 %v1198_v27, %v6819_v55  ;;  %v1946_v34 = vadd.f32 %v1945_v28, %v1682_v32  ;;  %v1200_v24 = vpop.f32.mrb[93].mxu1  ;;  %v1696_v62 = vmul.f32 %v5653_v25, %v6861_v1 }
 0x1e8   :  { %v5657_v6 = vpop.eup %5656  ;;  %5676 = vtanh.f32 %v944_v58  ;;  %v947_v43 = vpop.f32.mrb[94].mxu0  ;;  %v1201_v22 = vadd.f32 %v1200_v24, %v6831_v56  ;;  %v1690_v52 = vmul.f32 %v5649_v4, %v6889_v2  ;;  %v1954_v29 = vadd.f32 %v1953_v16, %v1689_v3 }
 0x1e9   :  { %v5659_v48 = vpop.eup %5658  ;;  %v948_v53 = vadd.f32 %v947_v43, %v6765_v60  ;;  %5678 = vtanh.f32 %v1199_v10  ;;  %1947 = vadd.xlane.f32.xlu1 %v1946_v34  ;;  %v949_v57 = vpop.f32.mrb[95].mxu0  ;;  %v1697_v26 = vmul.f32 %v5655_v7, %v6877_v51  ;;  %v1961_v49 = vadd.f32 %v6656_v40, %v1695_v59 }
 0x1ea   :  { %v5661_v36 = vpop.eup %5660  ;;  %v950_v18 = vadd.f32 %v949_v57, %v6777_v38  ;;  %5680 = vtanh.f32 %v1201_v22  ;;  %v1204_v45 = vpop.f32.mrb[94].mxu1  ;;  %v1955_v20 = vadd.f32 %v1954_v29, %v1690_v52  ;;  %v1703_v14 = vmul.f32 %v5659_v48, %v6849_v19 }
 0x1eb   :  { %v5663_v4 = vpop.eup %5662  ;;  %5682 = vtanh.f32 %v948_v53  ;;  %v1205_v3 = vadd.f32 %v1204_v45, %v6819_v55  ;;  %v1206_v50 = vpop.f32.mrb[95].mxu1  ;;  %v1962_v11 = vadd.f32 %v1961_v49, %v1696_v62  ;;  %v1704_v44 = vmul.f32 %v5661_v36, %v6861_v1 }
 0x1ec   :  { %v5665_v9 = vpop.eup %5664  ;;  %5684 = vtanh.f32 %v950_v18  ;;  %v953_v32 = vpop.f32.mrb[96].mxu0  ;;  %1956 = vadd.xlane.f32.xlu0 %v1955_v20  ;;  %v1207_v40 = vadd.f32 %v1206_v50, %v6831_v56  ;;  %v1705_v28 = vmul.f32 %v5663_v4, %v6877_v51  ;;  %v1970_v25 = vadd.f32 %v6669_v8, %v1703_v14 }
 0x1ed   :  { %v5667_v58 = vpop.eup %5666  ;;  %v954_v27 = vadd.f32 %v953_v32, %v6765_v60  ;;  %5686 = vtanh.f32 %v1205_v3  ;;  %v955_v16 = vpop.f32.mrb[97].mxu0  ;;  %v1698_v59 = vmul.f32 %v5657_v6, %v6889_v2  ;;  %v1963_v7 = vadd.f32 %v1962_v11, %v1697_v26 }
 0x1ee   :  { %v5669_v10 = vpop.eup %5668  ;;  %v956_v34 = vadd.f32 %v955_v16, %v6777_v38  ;;  %5688 = vtanh.f32 %v1207_v40  ;;  %v1210_v24 = vpop.f32.mrb[96].mxu1  ;;  %v1971_v62 = vadd.f32 %v1970_v25, %v1704_v44  ;;  %v1711_v43 = vmul.f32 %v5667_v58, %v6849_v19 }
 0x1ef   :  { %v5671_v22 = vpop.eup %5670  ;;  %5690 = vtanh.f32 %v954_v27  ;;  %v1211_v8 = vadd.f32 %v1210_v24, %v6819_v55  ;;  %v1964_v52 = vadd.f32 %v1963_v7, %v1698_v59  ;;  %v1212_v29 = vpop.f32.mrb[97].mxu1  ;;  %v1712_v48 = vmul.f32 %v5669_v10, %v6861_v1 }
 0x1f0   :  { %v5673_v53 = vpop.eup %5672  ;;  %5692 = vtanh.f32 %v956_v34  ;;  %v959_v6 = vpop.f32.mrb[98].mxu0  ;;  %v1213_v57 = vadd.f32 %v1212_v29, %v6831_v56  ;;  %v1706_v26 = vmul.f32 %v5665_v9, %v6889_v2  ;;  %v1972_v49 = vadd.f32 %v1971_v62, %v1705_v28 }
 0x1f1   :  { %v5675_v36 = vpop.eup %5674  ;;  %v960_v18 = vadd.f32 %v959_v6, %v6765_v60  ;;  %5694 = vtanh.f32 %v1211_v8  ;;  %1965 = vadd.xlane.f32.xlu1 %v1964_v52  ;;  %v961_v45 = vpop.f32.mrb[99].mxu0  ;;  %v1713_v20 = vmul.f32 %v5671_v22, %v6877_v51  ;;  %v1979_v14 = vadd.f32 %v6676_v39, %v1711_v43 }
 0x1f2   :  { %v5677_v4 = vpop.eup %5676  ;;  %v962_v3 = vadd.f32 %v961_v45, %v6777_v38  ;;  %5696 = vtanh.f32 %v1213_v57  ;;  %v1216_v50 = vpop.f32.mrb[98].mxu1  ;;  %v1973_v11 = vadd.f32 %v1972_v49, %v1706_v26  ;;  %v1719_v44 = vmul.f32 %v5675_v36, %v6849_v19 }
 0x1f3   :  { %v5679_v9 = vpop.eup %5678  ;;  %5698 = vtanh.f32 %v960_v18  ;;  %v1217_v32 = vadd.f32 %v1216_v50, %v6819_v55  ;;  %v1218_v40 = vpop.f32.mrb[99].mxu1  ;;  %v1980_v28 = vadd.f32 %v1979_v14, %v1712_v48  ;;  %v1720_v25 = vmul.f32 %v5677_v4, %v6861_v1 }
 0x1f4   :  { %v5681_v58 = vpop.eup %5680  ;;  %5700 = vtanh.f32 %v962_v3  ;;  %v965_v27 = vpop.f32.mrb[100].mxu0  ;;  %1974 = vadd.xlane.f32.xlu0 %v1973_v11  ;;  %v1219_v39 = vadd.f32 %v1218_v40, %v6831_v56  ;;  %v1721_v16 = vmul.f32 %v5679_v9, %v6877_v51  ;;  %v1988_v59 = vadd.f32 %v6689_v13, %v1719_v44 }
 0x1f5   :  { %v5683_v7 = vpop.eup %5682  ;;  %v966_v10 = vadd.f32 %v965_v27, %v6765_v60  ;;  %5702 = vtanh.f32 %v1217_v32  ;;  %v967_v34 = vpop.f32.mrb[101].mxu0  ;;  %v1714_v24 = vmul.f32 %v5673_v53, %v6889_v2  ;;  %v1981_v62 = vadd.f32 %v1980_v28, %v1713_v20 }
 0x1f6   :  { %v5685_v43 = vpop.eup %5684  ;;  %v968_v22 = vadd.f32 %v967_v34, %v6777_v38  ;;  %5704 = vtanh.f32 %v1219_v39  ;;  %v1222_v8 = vpop.f32.mrb[100].mxu1  ;;  %v1989_v52 = vadd.f32 %v1988_v59, %v1720_v25  ;;  %v1727_v29 = vmul.f32 %v5683_v7, %v6849_v19 }
 0x1f7   :  { %v5687_v48 = vpop.eup %5686  ;;  %5706 = vtanh.f32 %v966_v10  ;;  %v1223_v13 = vadd.f32 %v1222_v8, %v6819_v55  ;;  %v1982_v6 = vadd.f32 %v1981_v62, %v1714_v24  ;;  %v1224_v57 = vpop.f32.mrb[101].mxu1  ;;  %v1728_v26 = vmul.f32 %v5685_v43, %v6861_v1 }
 0x1f8   :  { %v5689_v49 = vpop.eup %5688  ;;  %5708 = vtanh.f32 %v968_v22  ;;  %v971_v53 = vpop.f32.mrb[102].mxu0  ;;  %v1225_v36 = vadd.f32 %v1224_v57, %v6831_v56  ;;  %v1722_v18 = vmul.f32 %v5681_v58, %v6889_v2  ;;  %v1990_v45 = vadd.f32 %v1989_v52, %v1721_v16 }
 0x1f9   :  { %v5691_v20 = vpop.eup %5690  ;;  %v972_v14 = vadd.f32 %v971_v53, %v6765_v60  ;;  %5710 = vtanh.f32 %v1223_v13  ;;  %1983 = vadd.xlane.f32.xlu1 %v1982_v6  ;;  %v973_v4 = vpop.f32.mrb[103].mxu0  ;;  %v1729_v3 = vmul.f32 %v5687_v48, %v6877_v51  ;;  %v1997_v50 = vadd.f32 %v6696_v42, %v1727_v29 }
 0x1fa   :  { %v5693_v11 = vpop.eup %5692  ;;  %v974_v44 = vadd.f32 %v973_v4, %v6777_v38  ;;  %5712 = vtanh.f32 %v1225_v36  ;;  %v1228_v9 = vpop.f32.mrb[102].mxu1  ;;  %v1991_v32 = vadd.f32 %v1990_v45, %v1722_v18  ;;  %v1735_v40 = vmul.f32 %v5691_v20, %v6849_v19 }
 0x1fb   :  { %v5695_v28 = vpop.eup %5694  ;;  %5714 = vtanh.f32 %v972_v14  ;;  %v1229_v25 = vadd.f32 %v1228_v9, %v6819_v55  ;;  %v1230_v58 = vpop.f32.mrb[103].mxu1  ;;  %v1998_v27 = vadd.f32 %v1997_v50, %v1728_v26  ;;  %v1736_v39 = vmul.f32 %v5693_v11, %v6861_v1 }
 0x1fc   :  { %v5697_v16 = vpop.eup %5696  ;;  %5716 = vtanh.f32 %v974_v44  ;;  %v977_v59 = vpop.f32.mrb[104].mxu0  ;;  %1992 = vadd.xlane.f32.xlu0 %v1991_v32  ;;  %v1231_v42 = vadd.f32 %v1230_v58, %v6831_v56  ;;  %v1737_v7 = vmul.f32 %v5695_v28, %v6877_v51  ;;  %v2006_v10 = vadd.f32 %v6709_v31, %v1735_v40 }
 0x1fd   :  { %v5699_v34 = vpop.eup %5698  ;;  %v978_v24 = vadd.f32 %v977_v59, %v6765_v60  ;;  %5718 = vtanh.f32 %v1229_v25  ;;  %v979_v62 = vpop.f32.mrb[105].mxu0  ;;  %v1730_v43 = vmul.f32 %v5689_v49, %v6889_v2  ;;  %v1999_v22 = vadd.f32 %v1998_v27, %v1729_v3 }
 0x1fe   :  { %v5701_v8 = vpop.eup %5700  ;;  %v980_v52 = vadd.f32 %v979_v62, %v6777_v38  ;;  %5720 = vtanh.f32 %v1231_v42  ;;  %v1234_v29 = vpop.f32.mrb[104].mxu1  ;;  %v2007_v48 = vadd.f32 %v2006_v10, %v1736_v39  ;;  %v1743_v13 = vmul.f32 %v5699_v34, %v6849_v19 }
 0x1ff   :  { %v5703_v6 = vpop.eup %5702  ;;  %5722 = vtanh.f32 %v978_v24  ;;  %v1235_v31 = vadd.f32 %v1234_v29, %v6819_v55  ;;  %v2000_v57 = vadd.f32 %v1999_v22, %v1730_v43  ;;  %v1236_v26 = vpop.f32.mrb[105].mxu1  ;;  %v1744_v53 = vmul.f32 %v5701_v8, %v6861_v1 }
 0x200   :  { %v5705_v36 = vpop.eup %5704  ;;  %5724 = vtanh.f32 %v980_v52  ;;  %v983_v49 = vpop.f32.mrb[106].mxu0  ;;  %v1237_v18 = vadd.f32 %v1236_v26, %v6831_v56  ;;  %v1738_v45 = vmul.f32 %v5697_v16, %v6889_v2  ;;  %v2008_v20 = vadd.f32 %v2007_v48, %v1737_v7 }
 0x201   :  { %v5707_v14 = vpop.eup %5706  ;;  %v984_v4 = vadd.f32 %v983_v49, %v6765_v60  ;;  %5726 = vtanh.f32 %v1235_v31  ;;  %2001 = vadd.xlane.f32.xlu1 %v2000_v57  ;;  %v985_v3 = vpop.f32.mrb[107].mxu0  ;;  %v1745_v50 = vmul.f32 %v5703_v6, %v6877_v51  ;;  %v2015_v11 = vadd.f32 %v6716_v47, %v1743_v13 }
 0x202   :  { %v5709_v44 = vpop.eup %5708  ;;  %v986_v9 = vadd.f32 %v985_v3, %v6777_v38  ;;  %5728 = vtanh.f32 %v1237_v18  ;;  %v1240_v32 = vpop.f32.mrb[106].mxu1  ;;  %v2009_v40 = vadd.f32 %v2008_v20, %v1738_v45  ;;  %v1751_v28 = vmul.f32 %v5707_v14, %v6849_v19 }
 0x203   :  { %v5711_v25 = vpop.eup %5710  ;;  %5730 = vtanh.f32 %v984_v4  ;;  %v1241_v58 = vadd.f32 %v1240_v32, %v6819_v55  ;;  %v1242_v27 = vpop.f32.mrb[107].mxu1  ;;  %v2016_v39 = vadd.f32 %v2015_v11, %v1744_v53  ;;  %v1752_v16 = vmul.f32 %v5709_v44, %v6861_v1 }
 0x204   :  { %v5713_v59 = vpop.eup %5712  ;;  %5732 = vtanh.f32 %v986_v9  ;;  %v989_v42 = vpop.f32.mrb[108].mxu0  ;;  %2010 = vadd.xlane.f32.xlu0 %v2009_v40  ;;  %v1243_v47 = vadd.f32 %v1242_v27, %v6831_v56  ;;  %v1753_v7 = vmul.f32 %v5711_v25, %v6877_v51  ;;  %v2024_v10 = vadd.f32 %v6729_v35, %v1751_v28 }
 0x205   :  { %v5715_v34 = vpop.eup %5714  ;;  %v990_v24 = vadd.f32 %v989_v42, %v6765_v60  ;;  %5734 = vtanh.f32 %v1241_v58  ;;  %v991_v62 = vpop.f32.mrb[109].mxu0  ;;  %v1746_v43 = vmul.f32 %v5705_v36, %v6889_v2  ;;  %v2017_v22 = vadd.f32 %v2016_v39, %v1745_v50 }
 0x206   :  { %v5717_v8 = vpop.eup %5716  ;;  %v992_v52 = vadd.f32 %v991_v62, %v6777_v38  ;;  %5736 = vtanh.f32 %v1243_v47  ;;  %v1246_v29 = vpop.f32.mrb[108].mxu1  ;;  %v2025_v48 = vadd.f32 %v2024_v10, %v1752_v16  ;;  %v1759_v13 = vmul.f32 %v5715_v34, %v6849_v19 }
 0x207   :  { %v5719_v6 = vpop.eup %5718  ;;  %5738 = vtanh.f32 %v990_v24  ;;  %v1247_v35 = vadd.f32 %v1246_v29, %v6819_v55  ;;  %v2018_v31 = vadd.f32 %v2017_v22, %v1746_v43  ;;  %v1248_v57 = vpop.f32.mrb[109].mxu1  ;;  %v1760_v26 = vmul.f32 %v5717_v8, %v6861_v1 }
 0x208   :  { %v5721_v53 = vpop.eup %5720  ;;  %5740 = vtanh.f32 %v992_v52  ;;  %v995_v36 = vpop.f32.mrb[110].mxu0  ;;  %v1249_v49 = vadd.f32 %v1248_v57, %v6831_v56  ;;  %v1754_v18 = vmul.f32 %v5713_v59, %v6889_v2  ;;  %v2026_v45 = vadd.f32 %v2025_v48, %v1753_v7 }
 0x209   :  { %v5723_v20 = vpop.eup %5722  ;;  %v996_v14 = vadd.f32 %v995_v36, %v6765_v60  ;;  %5742 = vtanh.f32 %v1247_v35  ;;  %2019 = vadd.xlane.f32.xlu1 %v2018_v31  ;;  %v997_v4 = vpop.f32.mrb[111].mxu0  ;;  %v1761_v3 = vmul.f32 %v5719_v6, %v6877_v51  ;;  %v2033_v50 = vadd.f32 %v6739_v17, %v1759_v13 }
 0x20a   :  { %v5725_v11 = vpop.eup %5724  ;;  %v998_v44 = vadd.f32 %v997_v4, %v6777_v38  ;;  %5744 = vtanh.f32 %v1249_v49  ;;  %v1252_v9 = vpop.f32.mrb[110].mxu1  ;;  %v2027_v32 = vadd.f32 %v2026_v45, %v1754_v18  ;;  %v1767_v40 = vmul.f32 %v5723_v20, %v6849_v19 }
 0x20b   :  { %v5727_v28 = vpop.eup %5726  ;;  %5746 = vtanh.f32 %v996_v14  ;;  %v1253_v25 = vadd.f32 %v1252_v9, %v6819_v55  ;;  %v1254_v58 = vpop.f32.mrb[111].mxu1  ;;  %v2034_v27 = vadd.f32 %v2033_v50, %v1760_v26  ;;  %v1768_v39 = vmul.f32 %v5725_v11, %v6861_v1 }
 0x20c   :  { %v5729_v16 = vpop.eup %5728  ;;  %5748 = vtanh.f32 %v998_v44  ;;  %v1001_v59 = vpop.f32.mrb[112].mxu0  ;;  %2028 = vadd.xlane.f32.xlu0 %v2027_v32  ;;  %v1255_v17 = vadd.f32 %v1254_v58, %v6831_v56  ;;  %v1769_v42 = vmul.f32 %v5727_v28, %v6877_v51  ;;  %v2042_v47 = vadd.f32 %v6755_v12, %v1767_v40 }
 0x20d   :  { %v5731_v7 = vpop.eup %5730  ;;  %v1002_v10 = vadd.f32 %v1001_v59, %v6765_v60  ;;  %5750 = vtanh.f32 %v1253_v25  ;;  %v1003_v34 = vpop.f32.mrb[113].mxu0  ;;  %v1762_v24 = vmul.f32 %v5721_v53, %v6889_v2  ;;  %v2035_v62 = vadd.f32 %v2034_v27, %v1761_v3 }
 0x20e   :  { %v5733_v43 = vpop.eup %5732  ;;  %v1004_v22 = vadd.f32 %v1003_v34, %v6777_v38  ;;  %5752 = vtanh.f32 %v1255_v17  ;;  %v1258_v8 = vpop.f32.mrb[112].mxu1  ;;  %v2043_v52 = vadd.f32 %v2042_v47, %v1768_v39  ;;  %v1775_v29 = vmul.f32 %v5731_v7, %v6849_v19 }
 0x20f   :  { %v5735_v48 = vpop.eup %5734  ;;  %5754 = vtanh.f32 %v1002_v10  ;;  %v1259_v12 = vadd.f32 %v1258_v8, %v6819_v55  ;;  %v2036_v13 = vadd.f32 %v2035_v62, %v1762_v24  ;;  %v1260_v6 = vpop.f32.mrb[113].mxu1  ;;  %v1776_v35 = vmul.f32 %v5733_v43, %v6861_v1 }
 0x210   :  { %v5737_v31 = vpop.eup %5736  ;;  %5756 = vtanh.f32 %v1004_v22  ;;  %v1007_v57 = vpop.f32.mrb[114].mxu0  ;;  %v1261_v26 = vadd.f32 %v1260_v6, %v6831_v56  ;;  %v1770_v53 = vmul.f32 %v5729_v16, %v6889_v2  ;;  %v2044_v36 = vadd.f32 %v2043_v52, %v1769_v42 }
 0x211   :  { %v5739_v49 = vpop.eup %5738  ;;  %v1008_v18 = vadd.f32 %v1007_v57, %v6765_v60  ;;  %5758 = vtanh.f32 %v1259_v12  ;;  %2037 = vadd.xlane.f32.xlu1 %v2036_v13  ;;  %v1009_v45 = vpop.f32.mrb[115].mxu0  ;;  %v1777_v20 = vmul.f32 %v5735_v48, %v6877_v51  ;;  %v2051_v14 = vadd.f32 %v6768_v33, %v1775_v29 }
 0x212   :  { %v5741_v4 = vpop.eup %5740  ;;  %v1010_v3 = vadd.f32 %v1009_v45, %v6777_v38  ;;  %5760 = vtanh.f32 %v1261_v26  ;;  %v1264_v50 = vpop.f32.mrb[114].mxu1  ;;  %v2045_v11 = vadd.f32 %v2044_v36, %v1770_v53  ;;  %v1783_v44 = vmul.f32 %v5739_v49, %v6849_v19 }
 0x213   :  { %v5743_v9 = vpop.eup %5742  ;;  %5762 = vtanh.f32 %v1008_v18  ;;  %v1265_v32 = vadd.f32 %v1264_v50, %v6819_v55  ;;  %v1266_v40 = vpop.f32.mrb[115].mxu1  ;;  %v2052_v28 = vadd.f32 %v2051_v14, %v1776_v35  ;;  %v1784_v25 = vmul.f32 %v5741_v4, %v6861_v1 }
 0x214   :  { %v5745_v58 = vpop.eup %5744  ;;  %5764 = vtanh.f32 %v1010_v3  ;;  %v1013_v27 = vpop.f32.mrb[116].mxu0  ;;  %2046 = vadd.xlane.f32.xlu0 %v2045_v11  ;;  %v1267_v33 = vadd.f32 %v1266_v40, %v6831_v56  ;;  %v1785_v39 = vmul.f32 %v5743_v9, %v6877_v51  ;;  %v2060_v16 = vadd.f32 %v6785_v37, %v1783_v44 }
 0x215   :  { %v5747_v59 = vpop.eup %5746  ;;  %v1014_v17 = vadd.f32 %v1013_v27, %v6765_v60  ;;  %5766 = vtanh.f32 %v1265_v32  ;;  %v1015_v42 = vpop.f32.mrb[117].mxu0  ;;  %v1778_v47 = vmul.f32 %v5737_v31, %v6889_v2  ;;  %v2053_v7 = vadd.f32 %v2052_v28, %v1777_v20 }
 0x216   :  { %v5749_v10 = vpop.eup %5748  ;;  %v1016_v34 = vadd.f32 %v1015_v42, %v6777_v38  ;;  %5768 = vtanh.f32 %v1267_v33  ;;  %v1270_v24 = vpop.f32.mrb[116].mxu1  ;;  %v2061_v62 = vadd.f32 %v2060_v16, %v1784_v25  ;;  %v1791_v43 = vmul.f32 %v5747_v59, %v6849_v19 }
 0x217   :  { %v5751_v22 = vpop.eup %5750  ;;  %5770 = vtanh.f32 %v1014_v17  ;;  %v1271_v37 = vadd.f32 %v1270_v24, %v6819_v55  ;;  %v2054_v8 = vadd.f32 %v2053_v7, %v1778_v47  ;;  %v1272_v52 = vpop.f32.mrb[117].mxu1  ;;  %v1792_v29 = vmul.f32 %v5749_v10, %v6861_v1 }
 0x218   :  { %v5753_v48 = vpop.eup %5752  ;;  %5772 = vtanh.f32 %v1016_v34  ;;  %v1019_v12 = vpop.f32.mrb[118].mxu0  ;;  %v1273_v13 = vadd.f32 %v1272_v52, %v6831_v56  ;;  %v1786_v6 = vmul.f32 %v5745_v58, %v6889_v2  ;;  %v2062_v35 = vadd.f32 %v2061_v62, %v1785_v39 }
 0x219   :  { %v5755_v31 = vpop.eup %5754  ;;  %v1020_v57 = vadd.f32 %v1019_v12, %v6765_v60  ;;  %5774 = vtanh.f32 %v1271_v37  ;;  %2055 = vadd.xlane.f32.xlu1 %v2054_v8  ;;  %v1021_v26 = vpop.f32.mrb[119].mxu0  ;;  %v1793_v53 = vmul.f32 %v5751_v22, %v6877_v51  ;;  %v2069_v36 = vadd.f32 %v6795_v46, %v1791_v43 }
 0x21a   :  { %v5757_v49 = vpop.eup %5756  ;;  %v1022_v18 = vadd.f32 %v1021_v26, %v6777_v38  ;;  %5776 = vtanh.f32 %v1273_v13  ;;  %v1276_v45 = vpop.f32.mrb[118].mxu1  ;;  %v2063_v20 = vadd.f32 %v2062_v35, %v1786_v6  ;;  %v1799_v14 = vmul.f32 %v5755_v31, %v6849_v19  ;;  %v8082_v13 = vld [vmem:[#allocation22_spill] sm:$0xff] }
 0x21b   :  { %v5759_v4 = vpop.eup %5758  ;;  %5778 = vtanh.f32 %v1020_v57  ;;  %v1277_v3 = vadd.f32 %v1276_v45, %v6819_v55  ;;  %v1278_v50 = vpop.f32.mrb[119].mxu1  ;;  %v2070_v11 = vadd.f32 %v2069_v36, %v1792_v29  ;;  %v1800_v44 = vmul.f32 %v5757_v49, %v6861_v1 }
 0x21c   :  { %v5761_v9 = vpop.eup %5760  ;;  %5780 = vtanh.f32 %v1022_v18  ;;  %v1025_v32 = vpop.f32.mrb[120].mxu0  ;;  %2064 = vadd.xlane.f32.xlu0 %v2063_v20  ;;  %v1279_v46 = vadd.f32 %v1278_v50, %v6831_v56  ;;  %v1801_v40 = vmul.f32 %v5759_v4, %v6877_v51  ;;  %v2078_v28 = vadd.f32 %v6811_v41, %v1799_v14 }
 0x21d   :  { %v5763_v25 = vpop.eup %5762  ;;  %v1026_v58 = vadd.f32 %v1025_v32, %v6765_v60  ;;  %5782 = vtanh.f32 %v1277_v3  ;;  %v1027_v27 = vpop.f32.mrb[121].mxu0  ;;  %v1794_v33 = vmul.f32 %v5753_v48, %v6889_v2  ;;  %v2071_v39 = vadd.f32 %v2070_v11, %v1793_v53 }
 0x21e   :  { %v5765_v16 = vpop.eup %5764  ;;  %v1028_v59 = vadd.f32 %v1027_v27, %v6777_v38  ;;  %5784 = vtanh.f32 %v1279_v46  ;;  %v1282_v17 = vpop.f32.mrb[120].mxu1  ;;  %v2079_v42 = vadd.f32 %v2078_v28, %v1800_v44  ;;  %v1807_v47 = vmul.f32 %v5763_v25, %v6849_v19 }
 0x21f   :  { %v5767_v7 = vpop.eup %5766  ;;  %5786 = vtanh.f32 %v1026_v58  ;;  %v1283_v41 = vadd.f32 %v1282_v17, %v6819_v55  ;;  %v2072_v10 = vadd.f32 %v2071_v39, %v1794_v33  ;;  %v1284_v34 = vpop.f32.mrb[121].mxu1  ;;  %v1808_v24 = vmul.f32 %v5765_v16, %v6861_v1 }
 0x220   :  { %v5769_v62 = vpop.eup %5768  ;;  %5788 = vtanh.f32 %v1028_v59  ;;  %v1031_v43 = vpop.f32.mrb[122].mxu0  ;;  %v1285_v22 = vadd.f32 %v1284_v34, %v6831_v56  ;;  %v1802_v37 = vmul.f32 %v5761_v9, %v6889_v2  ;;  %v2080_v8 = vadd.f32 %v2079_v42, %v1801_v40 }
 0x221   :  { %v5771_v52 = vpop.eup %5770  ;;  %v1032_v29 = vadd.f32 %v1031_v43, %v6765_v60  ;;  %5790 = vtanh.f32 %v1283_v41  ;;  %2073 = vadd.xlane.f32.xlu1 %v2072_v10  ;;  %v1033_v48 = vpop.f32.mrb[123].mxu0  ;;  %v1809_v12 = vmul.f32 %v5767_v7, %v6877_v51  ;;  %v2087_v6 = vadd.f32 %v8082_v13, %v1807_v47 }
 0x222   :  { %v5773_v35 = vpop.eup %5772  ;;  %v1034_v31 = vadd.f32 %v1033_v48, %v6777_v38  ;;  %5792 = vtanh.f32 %v1285_v22  ;;  %v1288_v57 = vpop.f32.mrb[122].mxu1  ;;  %v2081_v26 = vadd.f32 %v2080_v8, %v1802_v37  ;;  %v1815_v53 = vmul.f32 %v5771_v52, %v6849_v19 }
 0x223   :  { %v5775_v36 = vpop.eup %5774  ;;  %5794 = vtanh.f32 %v1032_v29  ;;  %v1289_v49 = vadd.f32 %v1288_v57, %v6819_v55  ;;  %v1290_v18 = vpop.f32.mrb[123].mxu1  ;;  %v2088_v45 = vadd.f32 %v2087_v6, %v1808_v24  ;;  %v1816_v20 = vmul.f32 %v5773_v35, %v6861_v1 }
 0x224   :  { %v5777_v14 = vpop.eup %5776  ;;  %5796 = vtanh.f32 %v1034_v31  ;;  %v1037_v4 = vpop.f32.mrb[124].mxu0  ;;  %2082 = vadd.xlane.f32.xlu0 %v2081_v26  ;;  %v1291_v3 = vadd.f32 %v1290_v18, %v6831_v56  ;;  %v1817_v50 = vmul.f32 %v5775_v36, %v6877_v51  ;;  %v2096_v11 = vadd.f32 %v6839_v23, %v1815_v53 }
 0x225   :  { %v5779_v44 = vpop.eup %5778  ;;  %v1038_v9 = vadd.f32 %v1037_v4, %v6765_v60  ;;  %5798 = vtanh.f32 %v1289_v49  ;;  %v1039_v32 = vpop.f32.mrb[125].mxu0  ;;  %v1810_v46 = vmul.f32 %v5769_v62, %v6889_v2  ;;  %v2089_v40 = vadd.f32 %v2088_v45, %v1809_v12 }
 0x226   :  { %v5781_v28 = vpop.eup %5780  ;;  %v1040_v25 = vadd.f32 %v1039_v32, %v6777_v38  ;;  %5800 = vtanh.f32 %v1291_v3  ;;  %v1294_v58 = vpop.f32.mrb[124].mxu1  ;;  %v2097_v27 = vadd.f32 %v2096_v11, %v1816_v20  ;;  %v1823_v33 = vmul.f32 %v5779_v44, %v6849_v19 }
 0x227   :  { %v5783_v39 = vpop.eup %5782  ;;  %5802 = vtanh.f32 %v1038_v9  ;;  %v1295_v23 = vadd.f32 %v1294_v58, %v6819_v55  ;;  %v2090_v16 = vadd.f32 %v2089_v40, %v1810_v46  ;;  %v1296_v59 = vpop.f32.mrb[125].mxu1  ;;  %v1824_v17 = vmul.f32 %v5781_v28, %v6861_v1 }
 0x228   :  { %v5785_v42 = vpop.eup %5784  ;;  %5804 = vtanh.f32 %v1040_v25  ;;  %v1043_v47 = vpop.f32.mrb[126].mxu0  ;;  %v1297_v7 = vadd.f32 %v1296_v59, %v6831_v56  ;;  %v1818_v41 = vmul.f32 %v5777_v14, %v6889_v2  ;;  %v2098_v10 = vadd.f32 %v2097_v27, %v1817_v50 }
 0x229   :  { %v5787_v34 = vpop.eup %5786  ;;  %v1044_v24 = vadd.f32 %v1043_v47, %v6765_v60  ;;  %5806 = vtanh.f32 %v1295_v23  ;;  %2091 = vadd.xlane.f32.xlu1 %v2090_v16  ;;  %v1045_v62 = vpop.f32.mrb[127].mxu0  ;;  %v1825_v43 = vmul.f32 %v5783_v39, %v6877_v51  ;;  %v2105_v22 = vadd.f32 %v6852_v61, %v1823_v33 }
 0x22a   :  { %v5789_v37 = vpop.eup %5788  ;;  %v1046_v8 = vadd.f32 %v1045_v62, %v6777_v38  ;;  %5808 = vtanh.f32 %v1297_v7  ;;  %v1300_v52 = vpop.f32.mrb[126].mxu1  ;;  %v2099_v29 = vadd.f32 %v2098_v10, %v1818_v41  ;;  %v1831_v48 = vmul.f32 %v5787_v34, %v6849_v19 }
 0x22b   :  { %v5791_v12 = vpop.eup %5790  ;;  %5810 = vtanh.f32 %v1044_v24  ;;  %v1301_v13 = vadd.f32 %v1300_v52, %v6819_v55  ;;  %v1302_v60 = vpop.f32.mrb[127].mxu1  ;;  %v2106_v6 = vadd.f32 %v2105_v22, %v1824_v17  ;;  %v1832_v35 = vmul.f32 %v5789_v37, %v6861_v1 }
 0x22c   :  { %v5793_v31 = vpop.eup %5792  ;;  %5812 = vtanh.f32 %v1046_v8  ;;  %2100 = vadd.xlane.f32.xlu0 %v2099_v29  ;;  %v1303_v61 = vadd.f32 %v1302_v60, %v6831_v56  ;;  %v1833_v38 = vmul.f32 %v5791_v12, %v6877_v51  ;;  %v2114_v57 = vadd.f32 %v6869_v30, %v1831_v48  ;;  %v8083_v12 = vld [vmem:[#allocation16_spill] sm:$0xff] }
 0x22d   :  { %v5795_v26 = vpop.eup %5794  ;;  %5814 = vtanh.f32 %v1301_v13  ;;  %v1826_v53 = vmul.f32 %v5785_v42, %v6889_v2  ;;  %v2107_v36 = vadd.f32 %v2106_v6, %v1825_v43  ;;  %v5947_v4 = vmov 0   ;;  %v8084_v13 = vld [vmem:[#allocation17_spill] sm:$0xff]  ;;  %v8085_v6 = vld [vmem:[#allocation18_spill] sm:$0xff] }
 0x22e   :  { %v5797_v49 = vpop.eup %5796  ;;  %v2115_v55 = vadd.f32 %v2114_v57, %v1832_v35  ;;  %v1839_v18 = vmul.f32 %v5795_v26, %v6849_v19  ;;  %5816 = vtanh.f32 %v1303_v61  ;;  %5304 = vset.pattern.permute.xlu0 %v5947_v4  ;;  %5305 = vset.pattern.permute.xlu1 %v5947_v4  ;;  %v1834_v30 = vmul.f32 %v5793_v31, %v6889_v2  ;;  %v8087_v61 = vld [vmem:[#allocation20_spill] sm:$0xff]  ;;  %v8088_v26 = vld [vmem:[#allocation21_spill] sm:$0xff] }
 0x22f   :  { %v5799_v45 = vpop.eup %5798  ;;  %v2108_v20 = vadd.f32 %v2107_v36, %v1826_v53  ;;  %v1840_v14 = vmul.f32 %v5797_v49, %v6861_v1 }
 0x230   :  { %v5801_v56 = vpop.eup %5800  ;;  %v2116_v3 = vadd.f32 %v2115_v55, %v1833_v38  ;;  %v1841_v50 = vmul.f32 %v5799_v45, %v6877_v51  ;;  %v2123_v11 = vadd.f32 %v6880_v5, %v1839_v18 }
 0x231   :  { %v5803_v44 = vpop.eup %5802  ;;  %2109 = vadd.xlane.f32.xlu1 %v2108_v20  ;;  %v1842_v27 = vmul.f32 %v5801_v56, %v6889_v2 }
 0x232   :  { %v5805_v9 = vpop.eup %5804  ;;  %v2117_v32 = vadd.f32 %v2116_v3, %v1834_v30  ;;  %v2124_v46 = vadd.f32 %v2123_v11, %v1840_v14  ;;  %v1847_v40 = vmul.f32 %v5803_v44, %v6849_v19 }
 0x233   :  { %v5807_v28 = vpop.eup %5806  ;;  %v1848_v25 = vmul.f32 %v5805_v9, %v6861_v1 }
 0x234   :  { %v5809_v58 = vpop.eup %5808  ;;  %2118 = vadd.xlane.f32.xlu0 %v2117_v32  ;;  %v2125_v33 = vadd.f32 %v2124_v46, %v1841_v50  ;;  %v1849_v39 = vmul.f32 %v5807_v28, %v6877_v51  ;;  %v2132_v23 = vadd.f32 %v6897_v21, %v1847_v40 }
 0x235   :  { %v5811_v5 = vpop.eup %5810  ;;  %v1850_v41 = vmul.f32 %v5809_v58, %v6889_v2 }
 0x236   :  { %v5813_v16 = vpop.eup %5812  ;;  %v2126_v59 = vadd.f32 %v2125_v33, %v1842_v27  ;;  %v2133_v17 = vadd.f32 %v2132_v23, %v1848_v25  ;;  %v1855_v42 = vmul.f32 %v5811_v5, %v6849_v19  ;;  %v5948_v19 = vmov 1966171168  }
 0x237   :  { %v5815_v47 = vpop.eup %5814  ;;  %v1856_v7 = vmul.f32 %v5813_v16, %v6861_v1  ;;  %v3243_v52 = vunpack.c.l.s4 %v5948_v19  ;;  %v7174_v1 = vstv %s5291_s3 }
 0x238   :  { %2127 = vadd.xlane.f32.xlu1 %v2126_v59  ;;  %v2134_v10 = vadd.f32 %v2133_v17, %v1849_v39  ;;  %v1857_v34 = vmul.f32 %v5815_v47, %v6877_v51  ;;  %v2141_v24 = vadd.f32 %v6905_v63, %v1855_v42  ;;  %v5817_v62 = vpop.eup %5816 }
 0x239   :  { %v1858_v22 = vmul.f32 %v5817_v62, %v6889_v2  ;;  %v3244_v29 = vunpack.c.0.s8 %v3243_v52  ;;  %v8086_v2 = vld [vmem:[#allocation19_spill] sm:$0xff] }
 0x23a   :  { %v2135_v43 = vadd.f32 %v2134_v10, %v1850_v41  ;;  %v2142_v21 = vadd.f32 %v2141_v24, %v1856_v7 }
 0x23b   :  { %v7178_v63 = vsub.s32 %v3244_v29, %v8083_v12 }
 0x23c   :  { %2136 = vadd.xlane.f32.xlu0 %v2135_v43  ;;  %v2143_v37 = vadd.f32 %v2142_v21, %v1857_v34 }
 0x23e   :  { %v2144_v8 = vadd.f32 %v2143_v37, %v1858_v22 }
 0x240   :  { %2145 = vadd.xlane.f32.xlu1 %v2144_v8 }
 0x251   :  { %v1867_v48 = vpop.xlane.xlu0 %1866 }
 0x252   :  { %v2150_v51 = vadd.f32 %v7174_v1, %v1867_v48 }
 0x254   :  { %v2217_v60 = vrot.slane %v2150_v51, %v8084_v13  ;;  %v2221_v35 = vrot.slane %v2150_v51, %v8085_v6  ;;  %v2225_v31 = vrot.slane %v2150_v51, %v8086_v2  ;;  %v2229_v38 = vrot.slane %v2150_v51, %v8087_v61 }
 0x255   :  { %v2233_v57 = vrot.slane %v2150_v51, %v6736_v54  ;;  %v2237_v53 = vrot.slane %v2150_v51, %v8088_v26  ;;  %v2241_v36 = vrot.slane %v2150_v51, %v6792_v0  ;;  %v2245_v49 = vrot.slane %v2150_v51, %v6803_v15 }
 0x256   :  { %v1876_v55 = vpop.xlane.xlu0 %1875  ;;  %v3238_v18 = vcombine.low %v2217_v60, %v2221_v35  ;;  %v3239_v45 = vcombine.low %v2225_v31, %v2229_v38 }
 0x257   :  { %v2151_v20 = vadd.f32 %v7174_v1, %v1876_v55  ;;  %v3240_v14 = vcombine.low %v2233_v57, %v2237_v53  ;;  %v3241_v4 = vcombine.low %v2241_v36, %v2245_v49 }
 0x258   :  { %v3248_v56 = vrot.slane %v3238_v18, %v7178_v63  ;;  %v3255_v30 = vrot.slane %v3239_v45, %v7178_v63 }
 0x259   :  { %v1885_v3 = vpop.xlane.xlu1 %1884  ;;  %v3262_v50 = vrot.slane %v3240_v14, %v7178_v63  ;;  %v3269_v11 = vrot.slane %v3241_v4, %v7178_v63  ;;  %v2249_v44 = vrot.slane %v2151_v20, %v8084_v13  ;;  %v2253_v9 = vrot.slane %v2151_v20, %v8085_v6 }
 0x25a   :  { %v2152_v32 = vadd.f32 %v7174_v1, %v1885_v3  ;;  %v3270_v46 = vcombine.low %v3248_v56, %v3255_v30  ;;  %v2257_v40 = vrot.slane %v2151_v20, %v8086_v2  ;;  %v2261_v28 = vrot.slane %v2151_v20, %v8087_v61 }
 0x25b   :  { %v3271_v25 = vcombine.low %v3262_v50, %v3269_v11  ;;  %v2265_v58 = vrot.slane %v2151_v20, %v6736_v54  ;;  %v2269_v27 = vrot.slane %v2151_v20, %v8088_v26  ;;  %v2273_v33 = vrot.slane %v2151_v20, %v6792_v0 }
 0x25c   :  { %v3278_v39 = vrot.slane %v3270_v46, %v7178_v63  ;;  %v2277_v23 = vrot.slane %v2151_v20, %v6803_v15  ;;  %v3287_v5 = vcombine.low %v2249_v44, %v2253_v9  ;;  %v3288_v16 = vcombine.low %v2257_v40, %v2261_v28 }
 0x25d   :  { %v3285_v59 = vrot.slane %v3271_v25, %v7178_v63  ;;  %v3289_v17 = vcombine.low %v2265_v58, %v2269_v27  ;;  %v2281_v42 = vrot.slane %v2152_v32, %v8084_v13  ;;  %v2285_v47 = vrot.slane %v2152_v32, %v8085_v6 }
 0x25e   :  { %v1894_v7 = vpop.xlane.xlu1 %1893  ;;  %v3290_v41 = vcombine.low %v2273_v33, %v2277_v23  ;;  %v3297_v10 = vrot.slane %v3287_v5, %v7178_v63  ;;  %v3304_v34 = vrot.slane %v3288_v16, %v7178_v63  ;;  %v2289_v24 = vrot.slane %v2152_v32, %v8086_v2 }
 0x25f   :  { %v2153_v62 = vadd.f32 %v7174_v1, %v1894_v7  ;;  %v3286_v43 = vcombine.low %v3278_v39, %v3285_v59  ;;  %v3311_v21 = vrot.slane %v3289_v17, %v7178_v63  ;;  %v2293_v22 = vrot.slane %v2152_v32, %v8087_v61 }
 0x260   :  { %v3318_v37 = vrot.slane %v3290_v41, %v7178_v63  ;;  %v3319_v8 = vcombine.low %v3297_v10, %v3304_v34  ;;  %v2297_v19 = vrot.slane %v2152_v32, %v6736_v54  ;;  %v2301_v52 = vrot.slane %v2152_v32, %v8088_v26 }
 0x261   :  { %4807 = vperm.xlu0 %5304, %v3286_v43   ;;  %v1903_v29 = vpop.xlane.xlu0 %1902  ;;  %v2305_v48 = vrot.slane %v2152_v32, %v6792_v0  ;;  %v2309_v51 = vrot.slane %v2152_v32, %v6803_v15  ;;  %v3336_v60 = vcombine.low %v2281_v42, %v2285_v47  ;;  %v3337_v35 = vcombine.low %v2289_v24, %v2293_v22 }
 0x262   :  { %v2154_v31 = vadd.f32 %v7174_v1, %v1903_v29  ;;  %v3320_v38 = vcombine.low %v3311_v21, %v3318_v37  ;;  %v3327_v57 = vrot.slane %v3319_v8, %v7178_v63  ;;  %v3338_v53 = vcombine.low %v2297_v19, %v2301_v52 }
 0x263   :  { %v3339_v36 = vcombine.low %v2305_v48, %v2309_v51  ;;  %v3346_v49 = vrot.slane %v3336_v60, %v7178_v63  ;;  %v3353_v55 = vrot.slane %v3337_v35, %v7178_v63  ;;  %v2313_v18 = vrot.slane %v2153_v62, %v8084_v13 }
 0x264   :  { %v3334_v45 = vrot.slane %v3320_v38, %v7178_v63  ;;  %v3360_v20 = vrot.slane %v3338_v53, %v7178_v63  ;;  %v2317_v14 = vrot.slane %v2153_v62, %v8085_v6  ;;  %v2321_v4 = vrot.slane %v2153_v62, %v8086_v2 }
 0x265   :  { %v3367_v56 = vrot.slane %v3339_v36, %v7178_v63  ;;  %v3368_v30 = vcombine.low %v3346_v49, %v3353_v55  ;;  %v2325_v3 = vrot.slane %v2153_v62, %v8087_v61  ;;  %v2329_v50 = vrot.slane %v2153_v62, %v6736_v54 }
 0x266   :  { %v3335_v11 = vcombine.low %v3327_v57, %v3334_v45  ;;  %v1912_v44 = vpop.xlane.xlu1 %1911  ;;  %v2333_v9 = vrot.slane %v2153_v62, %v8088_v26  ;;  %v2337_v32 = vrot.slane %v2153_v62, %v6792_v0  ;;  %v2341_v46 = vrot.slane %v2153_v62, %v6803_v15 }
 0x267   :  { %v2155_v40 = vadd.f32 %v7174_v1, %v1912_v44  ;;  %v3369_v28 = vcombine.low %v3360_v20, %v3367_v56  ;;  %v3376_v25 = vrot.slane %v3368_v30, %v7178_v63  ;;  %v3385_v58 = vcombine.low %v2313_v18, %v2317_v14 }
 0x268   :  { %4810 = vperm.xlu1 %5305, %v3335_v11   ;;  %v3386_v27 = vcombine.low %v2321_v4, %v2325_v3  ;;  %v3387_v33 = vcombine.low %v2329_v50, %v2333_v9  ;;  %v3388_v39 = vcombine.low %v2337_v32, %v2341_v46  ;;  %v2345_v23 = vrot.slane %v2154_v31, %v8084_v13 }
 0x269   :  { %v3383_v5 = vrot.slane %v3369_v28, %v7178_v63  ;;  %v1921_v16 = vpop.xlane.xlu0 %1920  ;;  %v3395_v59 = vrot.slane %v3385_v58, %v7178_v63  ;;  %v2349_v17 = vrot.slane %v2154_v31, %v8085_v6  ;;  %v2353_v42 = vrot.slane %v2154_v31, %v8086_v2 }
 0x26a   :  { %v7240_v47 = vadd.f32 %v7174_v1, %v1921_v16  ;;  %v3402_v7 = vrot.slane %v3386_v27, %v7178_v63  ;;  %v3409_v41 = vrot.slane %v3387_v33, %v7178_v63  ;;  %v3416_v10 = vrot.slane %v3388_v39, %v7178_v63 }
 0x26b   :  { %v3384_v34 = vcombine.low %v3376_v25, %v3383_v5  ;;  %v2357_v24 = vrot.slane %v2154_v31, %v8087_v61  ;;  %v2361_v62 = vrot.slane %v2154_v31, %v6736_v54  ;;  %v2365_v43 = vrot.slane %v2154_v31, %v8088_v26 }
 0x26c   :  { %v3417_v21 = vcombine.low %v3395_v59, %v3402_v7  ;;  %v3418_v22 = vcombine.low %v3409_v41, %v3416_v10  ;;  %v2369_v37 = vrot.slane %v2154_v31, %v6792_v0  ;;  %v2373_v8 = vrot.slane %v2154_v31, %v6803_v15 }
 0x26d   :  { %4813 = vperm.xlu1 %5305, %v3384_v34   ;;  %v3434_v19 = vcombine.low %v2345_v23, %v2349_v17  ;;  %v3435_v52 = vcombine.low %v2353_v42, %v2357_v24  ;;  %v3436_v29 = vcombine.low %v2361_v62, %v2365_v43  ;;  %v2377_v48 = vrot.slane %v2155_v40, %v8084_v13 }
 0x26e   :  { %v3425_v51 = vrot.slane %v3417_v21, %v7178_v63  ;;  %v3432_v60 = vrot.slane %v3418_v22, %v7178_v63  ;;  %v1930_v35 = vpop.xlane.xlu1 %1929  ;;  %v3437_v38 = vcombine.low %v2369_v37, %v2373_v8  ;;  %v2381_v57 = vrot.slane %v2155_v40, %v8085_v6 }
 0x26f   :  { %v7255_v53 = vadd.f32 %v7174_v1, %v1930_v35  ;;  %v3444_v36 = vrot.slane %v3434_v19, %v7178_v63  ;;  %v3451_v31 = vrot.slane %v3435_v52, %v7178_v63  ;;  %v3458_v49 = vrot.slane %v3436_v29, %v7178_v63 }
 0x270   :  { %v3433_v55 = vcombine.low %v3425_v51, %v3432_v60  ;;  %v3465_v18 = vrot.slane %v3437_v38, %v7178_v63  ;;  %v2385_v45 = vrot.slane %v2155_v40, %v8086_v2  ;;  %v2389_v20 = vrot.slane %v2155_v40, %v8087_v61 }
 0x271   :  { %v3466_v14 = vcombine.low %v3444_v36, %v3451_v31  ;;  %v1939_v4 = vpop.xlane.xlu0 %1938  ;;  %v2393_v56 = vrot.slane %v2155_v40, %v6736_v54  ;;  %v2397_v30 = vrot.slane %v2155_v40, %v8088_v26  ;;  %v2401_v3 = vrot.slane %v2155_v40, %v6792_v0 }
 0x272   :  { %4816 = vperm.xlu1 %5305, %v3433_v55   ;;  %v3467_v50 = vcombine.low %v3458_v49, %v3465_v18  ;;  %v7267_v11 = vadd.f32 %v7174_v1, %v1939_v4  ;;  %v2405_v44 = vrot.slane %v2155_v40, %v6803_v15  ;;  %v3483_v9 = vcombine.low %v2377_v48, %v2381_v57 }
 0x273   :  { %v3474_v32 = vrot.slane %v3466_v14, %v7178_v63  ;;  %v3484_v46 = vcombine.low %v2385_v45, %v2389_v20  ;;  %v3485_v28 = vcombine.low %v2393_v56, %v2397_v30  ;;  %v2409_v25 = vrot.slane %v7240_v47, %v8084_v13 }
 0x274   :  { %v3481_v58 = vrot.slane %v3467_v50, %v7178_v63  ;;  %v3486_v27 = vcombine.low %v2401_v3, %v2405_v44  ;;  %v3493_v33 = vrot.slane %v3483_v9, %v7178_v63  ;;  %v2413_v39 = vrot.slane %v7240_v47, %v8085_v6 }
 0x275   :  { %v3500_v23 = vrot.slane %v3484_v46, %v7178_v63  ;;  %v3507_v40 = vrot.slane %v3485_v28, %v7178_v63  ;;  %v2417_v5 = vrot.slane %v7240_v47, %v8086_v2  ;;  %v2421_v16 = vrot.slane %v7240_v47, %v8087_v61 }
 0x276   :  { %v3482_v59 = vcombine.low %v3474_v32, %v3481_v58  ;;  %v3514_v17 = vrot.slane %v3486_v27, %v7178_v63  ;;  %v1948_v42 = vpop.xlane.xlu1 %1947  ;;  %v2425_v7 = vrot.slane %v7240_v47, %v6736_v54  ;;  %v2429_v41 = vrot.slane %v7240_v47, %v8088_v26 }
 0x277   :  { %v3515_v10 = vcombine.low %v3493_v33, %v3500_v23  ;;  %v7289_v34 = vadd.f32 %v7174_v1, %v1948_v42  ;;  %v2433_v24 = vrot.slane %v7240_v47, %v6792_v0  ;;  %v2437_v62 = vrot.slane %v7240_v47, %v6803_v15 }
 0x278   :  { %4819 = vperm.xlu1 %5305, %v3482_v59   ;;  %v3516_v43 = vcombine.low %v3507_v40, %v3514_v17  ;;  %v3532_v21 = vcombine.low %v2409_v25, %v2413_v39  ;;  %v3533_v22 = vcombine.low %v2417_v5, %v2421_v16  ;;  %v3534_v37 = vcombine.low %v2425_v7, %v2429_v41 }
 0x279   :  { %v3523_v8 = vrot.slane %v3515_v10, %v7178_v63  ;;  %v3535_v19 = vcombine.low %v2433_v24, %v2437_v62  ;;  %v1957_v52 = vpop.xlane.xlu0 %1956  ;;  %v2441_v29 = vrot.slane %v7255_v53, %v8084_v13  ;;  %v2445_v48 = vrot.slane %v7255_v53, %v8085_v6 }
 0x27a   :  { %v3530_v51 = vrot.slane %v3516_v43, %v7178_v63  ;;  %v3542_v60 = vrot.slane %v3532_v21, %v7178_v63  ;;  %v3549_v47 = vrot.slane %v3533_v22, %v7178_v63  ;;  %v3556_v35 = vrot.slane %v3534_v37, %v7178_v63 }
 0x27b   :  { %v3563_v38 = vrot.slane %v3535_v19, %v7178_v63  ;;  %v7306_v57 = vadd.f32 %v7174_v1, %v1957_v52  ;;  %v2449_v36 = vrot.slane %v7255_v53, %v8086_v2  ;;  %v2453_v31 = vrot.slane %v7255_v53, %v8087_v61 }
 0x27c   :  { %v3531_v49 = vcombine.low %v3523_v8, %v3530_v51  ;;  %v3564_v55 = vcombine.low %v3542_v60, %v3549_v47  ;;  %v2457_v18 = vrot.slane %v7255_v53, %v6736_v54  ;;  %v2461_v45 = vrot.slane %v7255_v53, %v8088_v26 }
 0x27d   :  { %v3565_v20 = vcombine.low %v3556_v35, %v3563_v38  ;;  %v2465_v14 = vrot.slane %v7255_v53, %v6792_v0  ;;  %v2469_v4 = vrot.slane %v7255_v53, %v6803_v15  ;;  %v3581_v56 = vcombine.low %v2441_v29, %v2445_v48 }
 0x27e   :  { %4822 = vperm.xlu1 %5305, %v3531_v49   ;;  %v3572_v30 = vrot.slane %v3564_v55, %v7178_v63  ;;  %v3582_v3 = vcombine.low %v2449_v36, %v2453_v31  ;;  %v3583_v50 = vcombine.low %v2457_v18, %v2461_v45  ;;  %v1966_v44 = vpop.xlane.xlu1 %1965  ;;  %v2473_v9 = vrot.slane %v7267_v11, %v8084_v13 }
 0x27f   :  { %v3579_v32 = vrot.slane %v3565_v20, %v7178_v63  ;;  %v3584_v46 = vcombine.low %v2465_v14, %v2469_v4  ;;  %v3591_v28 = vrot.slane %v3581_v56, %v7178_v63  ;;  %v7326_v25 = vadd.f32 %v7174_v1, %v1966_v44 }
 0x280   :  { %v3598_v53 = vrot.slane %v3582_v3, %v7178_v63  ;;  %v3605_v58 = vrot.slane %v3583_v50, %v7178_v63  ;;  %v2477_v27 = vrot.slane %v7267_v11, %v8085_v6  ;;  %v2481_v33 = vrot.slane %v7267_v11, %v8086_v2 }
 0x281   :  { %v3580_v39 = vcombine.low %v3572_v30, %v3579_v32  ;;  %v3612_v23 = vrot.slane %v3584_v46, %v7178_v63  ;;  %v2485_v40 = vrot.slane %v7267_v11, %v8087_v61  ;;  %v2489_v5 = vrot.slane %v7267_v11, %v6736_v54  ;;  %v1975_v16 = vpop.xlane.xlu0 %1974 }
 0x282   :  { %v3613_v59 = vcombine.low %v3591_v28, %v3598_v53  ;;  %v2493_v17 = vrot.slane %v7267_v11, %v8088_v26  ;;  %v2497_v42 = vrot.slane %v7267_v11, %v6792_v0  ;;  %v2501_v7 = vrot.slane %v7267_v11, %v6803_v15 }
 0x283   :  { %4825 = vperm.xlu1 %5305, %v3580_v39   ;;  %v3614_v41 = vcombine.low %v3605_v58, %v3612_v23  ;;  %v3630_v10 = vcombine.low %v2473_v9, %v2477_v27  ;;  %v3631_v24 = vcombine.low %v2481_v33, %v2485_v40  ;;  %v7346_v62 = vadd.f32 %v7174_v1, %v1975_v16 }
 0x284   :  { %v3621_v43 = vrot.slane %v3613_v59, %v7178_v63  ;;  %v3632_v21 = vcombine.low %v2489_v5, %v2493_v17  ;;  %v3633_v22 = vcombine.low %v2497_v42, %v2501_v7  ;;  %v2505_v37 = vrot.slane %v7289_v34, %v8084_v13 }
 0x285   :  { %v3628_v8 = vrot.slane %v3614_v41, %v7178_v63  ;;  %v3640_v19 = vrot.slane %v3630_v10, %v7178_v63  ;;  %v3647_v11 = vrot.slane %v3631_v24, %v7178_v63  ;;  %v2509_v52 = vrot.slane %v7289_v34, %v8085_v6 }
 0x286   :  { %v3654_v29 = vrot.slane %v3632_v21, %v7178_v63  ;;  %v3661_v48 = vrot.slane %v3633_v22, %v7178_v63  ;;  %v2513_v51 = vrot.slane %v7289_v34, %v8086_v2  ;;  %v2517_v60 = vrot.slane %v7289_v34, %v8087_v61  ;;  %v1984_v47 = vpop.xlane.xlu1 %1983 }
 0x287   :  { %v3629_v35 = vcombine.low %v3621_v43, %v3628_v8  ;;  %v3662_v38 = vcombine.low %v3640_v19, %v3647_v11  ;;  %v2521_v36 = vrot.slane %v7289_v34, %v6736_v54  ;;  %v2525_v31 = vrot.slane %v7289_v34, %v8088_v26 }
 0x288   :  { %v3663_v49 = vcombine.low %v3654_v29, %v3661_v48  ;;  %v2529_v55 = vrot.slane %v7289_v34, %v6792_v0  ;;  %v2533_v18 = vrot.slane %v7289_v34, %v6803_v15  ;;  %v3679_v45 = vcombine.low %v2505_v37, %v2509_v52 }
 0x289   :  { %4828 = vperm.xlu1 %5305, %v3629_v35   ;;  %v3670_v20 = vrot.slane %v3662_v38, %v7178_v63  ;;  %v3680_v14 = vcombine.low %v2513_v51, %v2517_v60  ;;  %v3681_v4 = vcombine.low %v2521_v36, %v2525_v31  ;;  %v7372_v56 = vadd.f32 %v7174_v1, %v1984_v47  ;;  %v1993_v28 = vpop.xlane.xlu0 %1992 }
 0x28a   :  { %v3677_v30 = vrot.slane %v3663_v49, %v7178_v63  ;;  %v3682_v3 = vcombine.low %v2529_v55, %v2533_v18  ;;  %v3689_v50 = vrot.slane %v3679_v45, %v7178_v63  ;;  %v2537_v44 = vrot.slane %v7306_v57, %v8084_v13 }
 0x28b   :  { %v3696_v9 = vrot.slane %v3680_v14, %v7178_v63  ;;  %v3703_v34 = vrot.slane %v3681_v4, %v7178_v63  ;;  %v2541_v32 = vrot.slane %v7306_v57, %v8085_v6  ;;  %v2545_v46 = vrot.slane %v7306_v57, %v8086_v2 }
 0x28c   :  { %v3678_v53 = vcombine.low %v3670_v20, %v3677_v30  ;;  %v3710_v58 = vrot.slane %v3682_v3, %v7178_v63  ;;  %v2549_v27 = vrot.slane %v7306_v57, %v8087_v61  ;;  %v2553_v33 = vrot.slane %v7306_v57, %v6736_v54 }
 0x28d   :  { %v3711_v39 = vcombine.low %v3689_v50, %v3696_v9  ;;  %v2557_v23 = vrot.slane %v7306_v57, %v8088_v26  ;;  %v2561_v40 = vrot.slane %v7306_v57, %v6792_v0  ;;  %v2565_v5 = vrot.slane %v7306_v57, %v6803_v15 }
 0x28e   :  { %4831 = vperm.xlu1 %5305, %v3678_v53   ;;  %v3712_v16 = vcombine.low %v3703_v34, %v3710_v58  ;;  %v3728_v59 = vcombine.low %v2537_v44, %v2541_v32  ;;  %v3729_v17 = vcombine.low %v2545_v46, %v2549_v27  ;;  %v7396_v42 = vadd.f32 %v7174_v1, %v1993_v28  ;;  %v2002_v52 = vpop.xlane.xlu1 %2001 }
 0x28f   :  { %v3719_v7 = vrot.slane %v3711_v39, %v7178_v63  ;;  %v3730_v41 = vcombine.low %v2553_v33, %v2557_v23  ;;  %v3731_v10 = vcombine.low %v2561_v40, %v2565_v5  ;;  %v2569_v24 = vrot.slane %v7326_v25, %v8084_v13 }
 0x290   :  { %v3726_v43 = vrot.slane %v3712_v16, %v7178_v63  ;;  %v3738_v21 = vrot.slane %v3728_v59, %v7178_v63  ;;  %v3745_v57 = vrot.slane %v3729_v17, %v7178_v63  ;;  %v2573_v22 = vrot.slane %v7326_v25, %v8085_v6 }
 0x291   :  { %v3752_v37 = vrot.slane %v3730_v41, %v7178_v63  ;;  %v3759_v8 = vrot.slane %v3731_v10, %v7178_v63  ;;  %v2577_v19 = vrot.slane %v7326_v25, %v8086_v2  ;;  %v2581_v11 = vrot.slane %v7326_v25, %v8087_v61  ;;  %v2011_v44 = vpop.xlane.xlu0 %2010 }
 0x292   :  { %v3727_v29 = vcombine.low %v3719_v7, %v3726_v43  ;;  %v3760_v48 = vcombine.low %v3738_v21, %v3745_v57  ;;  %v2585_v51 = vrot.slane %v7326_v25, %v6736_v54  ;;  %v2589_v60 = vrot.slane %v7326_v25, %v8088_v26 }
 0x293   :  { %v3761_v47 = vcombine.low %v3752_v37, %v3759_v8  ;;  %v2593_v35 = vrot.slane %v7326_v25, %v6792_v0  ;;  %v2597_v38 = vrot.slane %v7326_v25, %v6803_v15  ;;  %v3777_v36 = vcombine.low %v2569_v24, %v2573_v22 }
 0x294   :  { %4834 = vperm.xlu0 %5304, %v3727_v29   ;;  %v3768_v31 = vrot.slane %v3760_v48, %v7178_v63  ;;  %v3778_v49 = vcombine.low %v2577_v19, %v2581_v11  ;;  %v3779_v55 = vcombine.low %v2585_v51, %v2589_v60  ;;  %v7422_v18 = vadd.f32 %v7174_v1, %v2002_v52 }
 0x295   :  { %v3775_v45 = vrot.slane %v3761_v47, %v7178_v63  ;;  %v3780_v20 = vcombine.low %v2593_v35, %v2597_v38  ;;  %v3787_v14 = vrot.slane %v3777_v36, %v7178_v63  ;;  %v2601_v4 = vrot.slane %v7346_v62, %v8084_v13 }
 0x296   :  { %v3794_v30 = vrot.slane %v3778_v49, %v7178_v63  ;;  %v3801_v25 = vrot.slane %v3779_v55, %v7178_v63  ;;  %v2605_v3 = vrot.slane %v7346_v62, %v8085_v6  ;;  %v2609_v50 = vrot.slane %v7346_v62, %v8086_v2  ;;  %v2020_v7 = vpop.xlane.xlu1 %2019 }
 0x297   :  { %v3776_v9 = vcombine.low %v3768_v31, %v3775_v45  ;;  %v3808_v34 = vrot.slane %v3780_v20, %v7178_v63  ;;  %v2613_v32 = vrot.slane %v7346_v62, %v8087_v61  ;;  %v2617_v46 = vrot.slane %v7346_v62, %v6736_v54 }
 0x298   :  { %v3809_v28 = vcombine.low %v3787_v14, %v3794_v30  ;;  %v2621_v53 = vrot.slane %v7346_v62, %v8088_v26  ;;  %v2625_v58 = vrot.slane %v7346_v62, %v6792_v0  ;;  %v2629_v27 = vrot.slane %v7346_v62, %v6803_v15 }
 0x299   :  { %4837 = vperm.xlu1 %5305, %v3776_v9   ;;  %v3810_v33 = vcombine.low %v3801_v25, %v3808_v34  ;;  %v3826_v39 = vcombine.low %v2601_v4, %v2605_v3  ;;  %v3827_v23 = vcombine.low %v2609_v50, %v2613_v32  ;;  %v2166_v40 = vadd.f32 %v7174_v1, %v2011_v44  ;;  %v2029_v52 = vpop.xlane.xlu0 %2028 }
 0x29a   :  { %v3817_v5 = vrot.slane %v3809_v28, %v7178_v63  ;;  %v3828_v16 = vcombine.low %v2617_v46, %v2621_v53  ;;  %v3829_v59 = vcombine.low %v2625_v58, %v2629_v27  ;;  %v2633_v17 = vrot.slane %v7372_v56, %v8084_v13 }
 0x29b   :  { %v3824_v41 = vrot.slane %v3810_v33, %v7178_v63  ;;  %v3836_v10 = vrot.slane %v3826_v39, %v7178_v63  ;;  %v3843_v62 = vrot.slane %v3827_v23, %v7178_v63  ;;  %v2637_v24 = vrot.slane %v7372_v56, %v8085_v6 }
 0x29c   :  { %v3850_v43 = vrot.slane %v3828_v16, %v7178_v63  ;;  %v3857_v21 = vrot.slane %v3829_v59, %v7178_v63  ;;  %v2641_v57 = vrot.slane %v7372_v56, %v8086_v2  ;;  %v2645_v22 = vrot.slane %v7372_v56, %v8087_v61 }
 0x29d   :  { %v3825_v37 = vcombine.low %v3817_v5, %v3824_v41  ;;  %v3858_v8 = vcombine.low %v3836_v10, %v3843_v62  ;;  %v2649_v19 = vrot.slane %v7372_v56, %v6736_v54  ;;  %v2653_v11 = vrot.slane %v7372_v56, %v8088_v26 }
 0x29e   :  { %v3859_v29 = vcombine.low %v3850_v43, %v3857_v21  ;;  %v2657_v48 = vrot.slane %v7372_v56, %v6792_v0  ;;  %v2661_v51 = vrot.slane %v7372_v56, %v6803_v15  ;;  %v3875_v60 = vcombine.low %v2633_v17, %v2637_v24  ;;  %v2038_v47 = vpop.xlane.xlu1 %2037 }
 0x29f   :  { %4840 = vperm.xlu1 %5305, %v3825_v37   ;;  %v3866_v35 = vrot.slane %v3858_v8, %v7178_v63  ;;  %v3876_v38 = vcombine.low %v2641_v57, %v2645_v22  ;;  %v3877_v36 = vcombine.low %v2649_v19, %v2653_v11  ;;  %v2167_v31 = vadd.f32 %v7174_v1, %v2020_v7 }
 0x2a0   :  { %v3873_v49 = vrot.slane %v3859_v29, %v7178_v63  ;;  %v3878_v55 = vcombine.low %v2657_v48, %v2661_v51  ;;  %v3885_v45 = vrot.slane %v3875_v60, %v7178_v63  ;;  %v7473_v20 = vadd.f32 %v7174_v1, %v2029_v52 }
 0x2a1   :  { %v3892_v14 = vrot.slane %v3876_v38, %v7178_v63  ;;  %v3899_v56 = vrot.slane %v3877_v36, %v7178_v63  ;;  %v7478_v4 = vadd.f32 %v7174_v1, %v2038_v47  ;;  %v2729_v30 = vrot.slane %v2166_v40, %v8084_v13  ;;  %v2047_v9 = vpop.xlane.xlu0 %2046 }
 0x2a2   :  { %v3874_v25 = vcombine.low %v3866_v35, %v3873_v49  ;;  %v3906_v3 = vrot.slane %v3878_v55, %v7178_v63  ;;  %v2733_v50 = vrot.slane %v2166_v40, %v8085_v6  ;;  %v2737_v44 = vrot.slane %v2166_v40, %v8086_v2 }
 0x2a3   :  { %v3907_v34 = vcombine.low %v3885_v45, %v3892_v14  ;;  %v2741_v32 = vrot.slane %v2166_v40, %v8087_v61  ;;  %v2745_v46 = vrot.slane %v2166_v40, %v6736_v54  ;;  %v2749_v28 = vrot.slane %v2166_v40, %v8088_v26 }
 0x2a4   :  { %4843 = vperm.xlu1 %5305, %v3874_v25   ;;  %v3908_v53 = vcombine.low %v3899_v56, %v3906_v3  ;;  %v2753_v58 = vrot.slane %v2166_v40, %v6792_v0  ;;  %v2757_v27 = vrot.slane %v2166_v40, %v6803_v15  ;;  %v4022_v33 = vcombine.low %v2729_v30, %v2733_v50 }
 0x2a5   :  { %v3915_v39 = vrot.slane %v3907_v34, %v7178_v63  ;;  %v4023_v23 = vcombine.low %v2737_v44, %v2741_v32  ;;  %v4024_v5 = vcombine.low %v2745_v46, %v2749_v28  ;;  %v7491_v16 = vadd.f32 %v7174_v1, %v2047_v9 }
 0x2a6   :  { %v3922_v59 = vrot.slane %v3908_v53, %v7178_v63  ;;  %v4025_v17 = vcombine.low %v2753_v58, %v2757_v27  ;;  %v4032_v7 = vrot.slane %v4022_v33, %v7178_v63  ;;  %v2761_v41 = vrot.slane %v2167_v31, %v8084_v13  ;;  %v2056_v43 = vpop.xlane.xlu1 %2055 }
 0x2a7   :  { %v4039_v10 = vrot.slane %v4023_v23, %v7178_v63  ;;  %v4046_v62 = vrot.slane %v4024_v5, %v7178_v63  ;;  %v2765_v40 = vrot.slane %v2167_v31, %v8085_v6  ;;  %v2769_v24 = vrot.slane %v2167_v31, %v8086_v2 }
 0x2a8   :  { %v3923_v21 = vcombine.low %v3915_v39, %v3922_v59  ;;  %v4053_v57 = vrot.slane %v4025_v17, %v7178_v63  ;;  %v2773_v22 = vrot.slane %v2167_v31, %v8087_v61  ;;  %v2777_v37 = vrot.slane %v2167_v31, %v6736_v54 }
 0x2a9   :  { %v4054_v8 = vcombine.low %v4032_v7, %v4039_v10  ;;  %v2781_v19 = vrot.slane %v2167_v31, %v8088_v26  ;;  %v2785_v11 = vrot.slane %v2167_v31, %v6792_v0  ;;  %v2789_v52 = vrot.slane %v2167_v31, %v6803_v15  ;;  %v2065_v3 = vpop.xlane.xlu0 %2064 }
 0x2aa   :  { %4846 = vperm.xlu1 %5305, %v3923_v21   ;;  %v4055_v29 = vcombine.low %v4046_v62, %v4053_v57  ;;  %v4071_v48 = vcombine.low %v2761_v41, %v2765_v40  ;;  %v4072_v51 = vcombine.low %v2769_v24, %v2773_v22  ;;  %v7507_v60 = vadd.f32 %v7174_v1, %v2056_v43 }
 0x2ab   :  { %v4062_v47 = vrot.slane %v4054_v8, %v7178_v63  ;;  %v4073_v35 = vcombine.low %v2777_v37, %v2781_v19  ;;  %v4074_v38 = vcombine.low %v2785_v11, %v2789_v52  ;;  %v2793_v36 = vrot.slane %v7473_v20, %v8084_v13 }
 0x2ac   :  { %v4069_v49 = vrot.slane %v4055_v29, %v7178_v63  ;;  %v4081_v55 = vrot.slane %v4071_v48, %v7178_v63  ;;  %v4088_v31 = vrot.slane %v4072_v51, %v7178_v63  ;;  %v2797_v45 = vrot.slane %v7473_v20, %v8085_v6 }
 0x2ad   :  { %v4095_v14 = vrot.slane %v4073_v35, %v7178_v63  ;;  %v4102_v56 = vrot.slane %v4074_v38, %v7178_v63  ;;  %v2801_v30 = vrot.slane %v7473_v20, %v8086_v2  ;;  %v2805_v25 = vrot.slane %v7473_v20, %v8087_v61 }
 0x2ae   :  { %v4070_v50 = vcombine.low %v4062_v47, %v4069_v49  ;;  %v4103_v44 = vcombine.low %v4081_v55, %v4088_v31  ;;  %v2809_v9 = vrot.slane %v7473_v20, %v6736_v54  ;;  %v2813_v34 = vrot.slane %v7473_v20, %v8088_v26  ;;  %v2074_v62 = vpop.xlane.xlu1 %2073 }
 0x2af   :  { %v4104_v32 = vcombine.low %v4095_v14, %v4102_v56  ;;  %v2817_v46 = vrot.slane %v7473_v20, %v6792_v0  ;;  %v2821_v28 = vrot.slane %v7473_v20, %v6803_v15  ;;  %v4120_v53 = vcombine.low %v2793_v36, %v2797_v45 }
 0x2b0   :  { %4855 = vperm.xlu1 %5305, %v4070_v50   ;;  %v4111_v58 = vrot.slane %v4103_v44, %v7178_v63  ;;  %v4121_v27 = vcombine.low %v2801_v30, %v2805_v25  ;;  %v4122_v33 = vcombine.low %v2809_v9, %v2813_v34  ;;  %v7533_v39 = vadd.f32 %v7174_v1, %v2065_v3 }
 0x2b1   :  { %v4118_v23 = vrot.slane %v4104_v32, %v7178_v63  ;;  %v4123_v5 = vcombine.low %v2817_v46, %v2821_v28  ;;  %v4130_v59 = vrot.slane %v4120_v53, %v7178_v63  ;;  %v2825_v17 = vrot.slane %v7478_v4, %v8084_v13  ;;  %v2083_v56 = vpop.xlane.xlu0 %2082 }
 0x2b2   :  { %v4137_v7 = vrot.slane %v4121_v27, %v7178_v63  ;;  %v4144_v20 = vrot.slane %v4122_v33, %v7178_v63  ;;  %v2829_v41 = vrot.slane %v7478_v4, %v8085_v6  ;;  %v2833_v10 = vrot.slane %v7478_v4, %v8086_v2 }
 0x2b3   :  { %v4119_v40 = vcombine.low %v4111_v58, %v4118_v23  ;;  %v4151_v24 = vrot.slane %v4123_v5, %v7178_v63  ;;  %v2837_v43 = vrot.slane %v7478_v4, %v8087_v61  ;;  %v2841_v21 = vrot.slane %v7478_v4, %v6736_v54 }
 0x2b4   :  { %v4152_v57 = vcombine.low %v4130_v59, %v4137_v7  ;;  %v2845_v22 = vrot.slane %v7478_v4, %v8088_v26  ;;  %v2849_v37 = vrot.slane %v7478_v4, %v6792_v0  ;;  %v2853_v8 = vrot.slane %v7478_v4, %v6803_v15 }
 0x2b5   :  { %4858 = vperm.xlu0 %5304, %v4119_v40   ;;  %v4153_v19 = vcombine.low %v4144_v20, %v4151_v24  ;;  %v4169_v11 = vcombine.low %v2825_v17, %v2829_v41  ;;  %v4170_v52 = vcombine.low %v2833_v10, %v2837_v43  ;;  %v7557_v29 = vadd.f32 %v7174_v1, %v2074_v62 }
 0x2b6   :  { %v4160_v48 = vrot.slane %v4152_v57, %v7178_v63  ;;  %v4171_v51 = vcombine.low %v2841_v21, %v2845_v22  ;;  %v4172_v47 = vcombine.low %v2849_v37, %v2853_v8  ;;  %v2857_v35 = vrot.slane %v7491_v16, %v8084_v13  ;;  %v2092_v20 = vpop.xlane.xlu1 %2091 }
 0x2b7   :  { %v4167_v38 = vrot.slane %v4153_v19, %v7178_v63  ;;  %v4179_v36 = vrot.slane %v4169_v11, %v7178_v63  ;;  %v4186_v4 = vrot.slane %v4170_v52, %v7178_v63  ;;  %v2861_v49 = vrot.slane %v7491_v16, %v8085_v6 }
 0x2b8   :  { %v4193_v55 = vrot.slane %v4171_v51, %v7178_v63  ;;  %v4200_v31 = vrot.slane %v4172_v47, %v7178_v63  ;;  %v2865_v45 = vrot.slane %v7491_v16, %v8086_v2  ;;  %v2869_v14 = vrot.slane %v7491_v16, %v8087_v61 }
 0x2b9   :  { %v4168_v30 = vcombine.low %v4160_v48, %v4167_v38  ;;  %v4201_v25 = vcombine.low %v4179_v36, %v4186_v4  ;;  %v2873_v3 = vrot.slane %v7491_v16, %v6736_v54  ;;  %v2877_v50 = vrot.slane %v7491_v16, %v8088_v26 }
 0x2ba   :  { %v4202_v44 = vcombine.low %v4193_v55, %v4200_v31  ;;  %v2881_v9 = vrot.slane %v7491_v16, %v6792_v0  ;;  %v2885_v34 = vrot.slane %v7491_v16, %v6803_v15  ;;  %v4218_v32 = vcombine.low %v2857_v35, %v2861_v49  ;;  %v2101_v31 = vpop.xlane.xlu0 %2100 }
 0x2bb   :  { %4861 = vperm.xlu1 %5305, %v4168_v30   ;;  %v4209_v46 = vrot.slane %v4201_v25, %v7178_v63  ;;  %v4219_v28 = vcombine.low %v2865_v45, %v2869_v14  ;;  %v4220_v53 = vcombine.low %v2873_v3, %v2877_v50  ;;  %v7583_v58 = vadd.f32 %v7174_v1, %v2083_v56 }
 0x2bc   :  { %v4216_v27 = vrot.slane %v4202_v44, %v7178_v63  ;;  %v4221_v33 = vcombine.low %v2881_v9, %v2885_v34  ;;  %v4228_v23 = vrot.slane %v4218_v32, %v7178_v63  ;;  %v2889_v5 = vrot.slane %v7507_v60, %v8084_v13 }
 0x2bd   :  { %v4235_v59 = vrot.slane %v4219_v28, %v7178_v63  ;;  %v4242_v16 = vrot.slane %v4220_v53, %v7178_v63  ;;  %v2893_v17 = vrot.slane %v7507_v60, %v8085_v6  ;;  %v2897_v7 = vrot.slane %v7507_v60, %v8086_v2 }
 0x2be   :  { %v4217_v41 = vcombine.low %v4209_v46, %v4216_v27  ;;  %v4249_v10 = vrot.slane %v4221_v33, %v7178_v63  ;;  %v2901_v62 = vrot.slane %v7507_v60, %v8087_v61  ;;  %v2905_v40 = vrot.slane %v7507_v60, %v6736_v54 }
 0x2bf   :  { %v4250_v24 = vcombine.low %v4228_v23, %v4235_v59  ;;  %v2909_v43 = vrot.slane %v7507_v60, %v8088_v26  ;;  %v2913_v21 = vrot.slane %v7507_v60, %v6792_v0  ;;  %v2917_v57 = vrot.slane %v7507_v60, %v6803_v15 }
 0x2c0   :  { %4864 = vperm.xlu0 %5304, %v4217_v41   ;;  %v4251_v22 = vcombine.low %v4242_v16, %v4249_v10  ;;  %v4267_v37 = vcombine.low %v2889_v5, %v2893_v17  ;;  %v4268_v8 = vcombine.low %v2897_v7, %v2901_v62  ;;  %v7607_v19 = vadd.f32 %v7174_v1, %v2092_v20  ;;  %v2110_v16 = vpop.xlane.xlu1 %2109 }
 0x2c1   :  { %v4258_v11 = vrot.slane %v4250_v24, %v7178_v63  ;;  %v4269_v52 = vcombine.low %v2905_v40, %v2909_v43  ;;  %v4270_v48 = vcombine.low %v2913_v21, %v2917_v57  ;;  %v2921_v51 = vrot.slane %v7533_v39, %v8084_v13 }
 0x2c2   :  { %v4265_v47 = vrot.slane %v4251_v22, %v7178_v63  ;;  %v4277_v35 = vrot.slane %v4267_v37, %v7178_v63  ;;  %v4284_v60 = vrot.slane %v4268_v8, %v7178_v63  ;;  %v2925_v38 = vrot.slane %v7533_v39, %v8085_v6 }
 0x2c3   :  { %v4291_v36 = vrot.slane %v4269_v52, %v7178_v63  ;;  %v4298_v4 = vrot.slane %v4270_v48, %v7178_v63  ;;  %v2929_v49 = vrot.slane %v7533_v39, %v8086_v2  ;;  %v2933_v55 = vrot.slane %v7533_v39, %v8087_v61 }
 0x2c4   :  { %v4266_v45 = vcombine.low %v4258_v11, %v4265_v47  ;;  %v4299_v14 = vcombine.low %v4277_v35, %v4284_v60  ;;  %v2937_v56 = vrot.slane %v7533_v39, %v6736_v54  ;;  %v2941_v30 = vrot.slane %v7533_v39, %v8088_v26 }
 0x2c5   :  { %v4300_v25 = vcombine.low %v4291_v36, %v4298_v4  ;;  %v2945_v3 = vrot.slane %v7533_v39, %v6792_v0  ;;  %v2949_v50 = vrot.slane %v7533_v39, %v6803_v15  ;;  %v4316_v44 = vcombine.low %v2921_v51, %v2925_v38  ;;  %v2119_v4 = vpop.xlane.xlu0 %2118 }
 0x2c6   :  { %4867 = vperm.xlu1 %5305, %v4266_v45   ;;  %v4307_v9 = vrot.slane %v4299_v14, %v7178_v63  ;;  %v4317_v34 = vcombine.low %v2929_v49, %v2933_v55  ;;  %v4318_v32 = vcombine.low %v2937_v56, %v2941_v30  ;;  %v7633_v46 = vadd.f32 %v7174_v1, %v2101_v31 }
 0x2c7   :  { %v4314_v28 = vrot.slane %v4300_v25, %v7178_v63  ;;  %v4319_v53 = vcombine.low %v2945_v3, %v2949_v50  ;;  %v4326_v27 = vrot.slane %v4316_v44, %v7178_v63  ;;  %v2953_v33 = vrot.slane %v7557_v29, %v8084_v13 }
 0x2c8   :  { %v4333_v23 = vrot.slane %v4317_v34, %v7178_v63  ;;  %v4340_v39 = vrot.slane %v4318_v32, %v7178_v63  ;;  %v2957_v5 = vrot.slane %v7557_v29, %v8085_v6  ;;  %v2961_v59 = vrot.slane %v7557_v29, %v8086_v2 }
 0x2c9   :  { %v4315_v17 = vcombine.low %v4307_v9, %v4314_v28  ;;  %v4347_v7 = vrot.slane %v4319_v53, %v7178_v63  ;;  %v2965_v20 = vrot.slane %v7557_v29, %v8087_v61  ;;  %v2969_v41 = vrot.slane %v7557_v29, %v6736_v54 }
 0x2ca   :  { %v4348_v10 = vcombine.low %v4326_v27, %v4333_v23  ;;  %v2973_v62 = vrot.slane %v7557_v29, %v8088_v26  ;;  %v2977_v40 = vrot.slane %v7557_v29, %v6792_v0  ;;  %v2981_v24 = vrot.slane %v7557_v29, %v6803_v15 }
 0x2cb   :  { %4870 = vperm.xlu0 %5304, %v4315_v17   ;;  %v4349_v43 = vcombine.low %v4340_v39, %v4347_v7  ;;  %v4365_v21 = vcombine.low %v2953_v33, %v2957_v5  ;;  %v4366_v57 = vcombine.low %v2961_v59, %v2965_v20  ;;  %v7657_v22 = vadd.f32 %v7174_v1, %v2110_v16 }
 0x2cc   :  { %v4356_v37 = vrot.slane %v4348_v10, %v7178_v63  ;;  %v4367_v8 = vcombine.low %v2969_v41, %v2973_v62  ;;  %v4368_v11 = vcombine.low %v2977_v40, %v2981_v24  ;;  %v2985_v52 = vrot.slane %v7583_v58, %v8084_v13 }
 0x2cd   :  { %v4363_v48 = vrot.slane %v4349_v43, %v7178_v63  ;;  %v4375_v51 = vrot.slane %v4365_v21, %v7178_v63  ;;  %v4382_v29 = vrot.slane %v4366_v57, %v7178_v63  ;;  %v2989_v47 = vrot.slane %v7583_v58, %v8085_v6 }
 0x2ce   :  { %v4389_v35 = vrot.slane %v4367_v8, %v7178_v63  ;;  %v4396_v60 = vrot.slane %v4368_v11, %v7178_v63  ;;  %v2993_v38 = vrot.slane %v7583_v58, %v8086_v2  ;;  %v2997_v36 = vrot.slane %v7583_v58, %v8087_v61 }
 0x2cf   :  { %v4364_v49 = vcombine.low %v4356_v37, %v4363_v48  ;;  %v4397_v55 = vcombine.low %v4375_v51, %v4382_v29  ;;  %v3001_v31 = vrot.slane %v7583_v58, %v6736_v54  ;;  %v3005_v45 = vrot.slane %v7583_v58, %v8088_v26 }
 0x2d0   :  { %v4398_v14 = vcombine.low %v4389_v35, %v4396_v60  ;;  %v3009_v56 = vrot.slane %v7583_v58, %v6792_v0  ;;  %v3013_v30 = vrot.slane %v7583_v58, %v6803_v15  ;;  %v4414_v25 = vcombine.low %v2985_v52, %v2989_v47  ;;  %v2128_v35 = vpop.xlane.xlu1 %2127 }
 0x2d1   :  { %4873 = vperm.xlu1 %5305, %v4364_v49   ;;  %v4405_v3 = vrot.slane %v4397_v55, %v7178_v63  ;;  %v4415_v50 = vcombine.low %v2993_v38, %v2997_v36  ;;  %v4416_v44 = vcombine.low %v3001_v31, %v3005_v45  ;;  %v7683_v9 = vadd.f32 %v7174_v1, %v2119_v4 }
 0x2d2   :  { %v4412_v34 = vrot.slane %v4398_v14, %v7178_v63  ;;  %v4417_v32 = vcombine.low %v3009_v56, %v3013_v30  ;;  %v4424_v28 = vrot.slane %v4414_v25, %v7178_v63  ;;  %v3017_v53 = vrot.slane %v7607_v19, %v8084_v13 }
 0x2d3   :  { %v4431_v27 = vrot.slane %v4415_v50, %v7178_v63  ;;  %v4438_v58 = vrot.slane %v4416_v44, %v7178_v63  ;;  %v3021_v33 = vrot.slane %v7607_v19, %v8085_v6  ;;  %v3025_v23 = vrot.slane %v7607_v19, %v8086_v2 }
 0x2d4   :  { %v4413_v39 = vcombine.low %v4405_v3, %v4412_v34  ;;  %v4445_v5 = vrot.slane %v4417_v32, %v7178_v63  ;;  %v3029_v59 = vrot.slane %v7607_v19, %v8087_v61  ;;  %v3033_v16 = vrot.slane %v7607_v19, %v6736_v54 }
 0x2d5   :  { %v4446_v17 = vcombine.low %v4424_v28, %v4431_v27  ;;  %v3037_v7 = vrot.slane %v7607_v19, %v8088_v26  ;;  %v3041_v20 = vrot.slane %v7607_v19, %v6792_v0  ;;  %v3045_v41 = vrot.slane %v7607_v19, %v6803_v15 }
 0x2d6   :  { %4876 = vperm.xlu0 %5304, %v4413_v39   ;;  %v4447_v10 = vcombine.low %v4438_v58, %v4445_v5  ;;  %v4463_v62 = vcombine.low %v3017_v53, %v3021_v33  ;;  %v4464_v40 = vcombine.low %v3025_v23, %v3029_v59  ;;  %v2665_v24 = vrot.slane %v7396_v42, %v8084_v13 }
 0x2d7   :  { %v4454_v43 = vrot.slane %v4446_v17, %v7178_v63  ;;  %v4465_v21 = vcombine.low %v3033_v16, %v3037_v7  ;;  %v4466_v57 = vcombine.low %v3041_v20, %v3045_v41  ;;  %v2669_v37 = vrot.slane %v7396_v42, %v8085_v6 }
 0x2d8   :  { %v4461_v8 = vrot.slane %v4447_v10, %v7178_v63  ;;  %v4473_v11 = vrot.slane %v4463_v62, %v7178_v63  ;;  %v4480_v19 = vrot.slane %v4464_v40, %v7178_v63  ;;  %v2673_v52 = vrot.slane %v7396_v42, %v8086_v2 }
 0x2d9   :  { %v4487_v48 = vrot.slane %v4465_v21, %v7178_v63  ;;  %v4494_v51 = vrot.slane %v4466_v57, %v7178_v63  ;;  %v2677_v29 = vrot.slane %v7396_v42, %v8087_v61  ;;  %v2681_v47 = vrot.slane %v7396_v42, %v6736_v54 }
 0x2da   :  { %v4462_v60 = vcombine.low %v4454_v43, %v4461_v8  ;;  %v4495_v38 = vcombine.low %v4473_v11, %v4480_v19  ;;  %v2685_v36 = vrot.slane %v7396_v42, %v8088_v26  ;;  %v2689_v4 = vrot.slane %v7396_v42, %v6792_v0 }
 0x2db   :  { %v4496_v49 = vcombine.low %v4487_v48, %v4494_v51  ;;  %v2693_v55 = vrot.slane %v7396_v42, %v6803_v15  ;;  %v3924_v31 = vcombine.low %v2665_v24, %v2669_v37  ;;  %v3925_v45 = vcombine.low %v2673_v52, %v2677_v29  ;;  %v2137_v52 = vpop.xlane.xlu0 %2136 }
 0x2dc   :  { %4879 = vperm.xlu1 %5305, %v4462_v60   ;;  %v4503_v14 = vrot.slane %v4495_v38, %v7178_v63  ;;  %v3926_v56 = vcombine.low %v2681_v47, %v2685_v36  ;;  %v7730_v30 = vadd.f32 %v7174_v1, %v2128_v35  ;;  %v2697_v25 = vrot.slane %v7422_v18, %v8084_v13 }
 0x2dd   :  { %v4510_v3 = vrot.slane %v4496_v49, %v7178_v63  ;;  %v3927_v50 = vcombine.low %v2689_v4, %v2693_v55  ;;  %v3934_v44 = vrot.slane %v3924_v31, %v7178_v63  ;;  %v3941_v34 = vrot.slane %v3925_v45, %v7178_v63 }
 0x2de   :  { %v3948_v42 = vrot.slane %v3926_v56, %v7178_v63  ;;  %v2701_v32 = vrot.slane %v7422_v18, %v8085_v6  ;;  %v2705_v28 = vrot.slane %v7422_v18, %v8086_v2  ;;  %v2709_v53 = vrot.slane %v7422_v18, %v8087_v61 }
 0x2df   :  { %v4511_v27 = vcombine.low %v4503_v14, %v4510_v3  ;;  %v3955_v58 = vrot.slane %v3927_v50, %v7178_v63  ;;  %v3956_v33 = vcombine.low %v3934_v44, %v3941_v34  ;;  %v2713_v23 = vrot.slane %v7422_v18, %v6736_v54  ;;  %v2146_v34 = vpop.xlane.xlu1 %2145 }
 0x2e0   :  { %v2717_v39 = vrot.slane %v7422_v18, %v8088_v26  ;;  %v2721_v5 = vrot.slane %v7422_v18, %v6792_v0  ;;  %v2725_v59 = vrot.slane %v7422_v18, %v6803_v15  ;;  %v3973_v16 = vcombine.low %v2697_v25, %v2701_v32 }
 0x2e1   :  { %4882 = vperm.xlu0 %5304, %v4511_v27   ;;  %v3957_v17 = vcombine.low %v3948_v42, %v3955_v58  ;;  %v3964_v7 = vrot.slane %v3956_v33, %v7178_v63  ;;  %v3974_v20 = vcombine.low %v2705_v28, %v2709_v53  ;;  %v3049_v41 = vrot.slane %v7633_v46, %v8084_v13 }
 0x2e2   :  { %v3975_v10 = vcombine.low %v2713_v23, %v2717_v39  ;;  %v3976_v62 = vcombine.low %v2721_v5, %v2725_v59  ;;  %v3983_v40 = vrot.slane %v3973_v16, %v7178_v63  ;;  %v3053_v24 = vrot.slane %v7633_v46, %v8085_v6 }
 0x2e3   :  { %v3971_v43 = vrot.slane %v3957_v17, %v7178_v63  ;;  %v3990_v18 = vrot.slane %v3974_v20, %v7178_v63  ;;  %v3057_v21 = vrot.slane %v7633_v46, %v8086_v2  ;;  %v3061_v57 = vrot.slane %v7633_v46, %v8087_v61 }
 0x2e4   :  { %v3997_v37 = vrot.slane %v3975_v10, %v7178_v63  ;;  %v4004_v8 = vrot.slane %v3976_v62, %v7178_v63  ;;  %v3065_v11 = vrot.slane %v7633_v46, %v6736_v54  ;;  %v3069_v19 = vrot.slane %v7633_v46, %v8088_v26 }
 0x2e5   :  { %v3972_v48 = vcombine.low %v3964_v7, %v3971_v43  ;;  %v4005_v51 = vcombine.low %v3983_v40, %v3990_v18  ;;  %v3073_v29 = vrot.slane %v7633_v46, %v6792_v0  ;;  %v3077_v47 = vrot.slane %v7633_v46, %v6803_v15 }
 0x2e6   :  { %v4006_v35 = vcombine.low %v3997_v37, %v4004_v8  ;;  %v4512_v60 = vcombine.low %v3049_v41, %v3053_v24  ;;  %v4513_v38 = vcombine.low %v3057_v21, %v3061_v57  ;;  %v4514_v36 = vcombine.low %v3065_v11, %v3069_v19 }
 0x2e7   :  { %4849 = vperm.xlu1 %5305, %v3972_v48   ;;  %v4013_v4 = vrot.slane %v4005_v51, %v7178_v63  ;;  %v4515_v49 = vcombine.low %v3073_v29, %v3077_v47  ;;  %v7777_v55 = vadd.f32 %v7174_v1, %v2137_v52  ;;  %v3081_v31 = vrot.slane %v7657_v22, %v8084_v13 }
 0x2e8   :  { %v4020_v45 = vrot.slane %v4006_v35, %v7178_v63  ;;  %v4522_v14 = vrot.slane %v4512_v60, %v7178_v63  ;;  %v4529_v46 = vrot.slane %v4513_v38, %v7178_v63  ;;  %v4536_v56 = vrot.slane %v4514_v36, %v7178_v63 }
 0x2e9   :  { %v4543_v25 = vrot.slane %v4515_v49, %v7178_v63  ;;  %v3085_v3 = vrot.slane %v7657_v22, %v8085_v6  ;;  %v3089_v50 = vrot.slane %v7657_v22, %v8086_v2  ;;  %v3093_v44 = vrot.slane %v7657_v22, %v8087_v61 }
 0x2ea   :  { %v4021_v42 = vcombine.low %v4013_v4, %v4020_v45  ;;  %v4544_v32 = vcombine.low %v4522_v14, %v4529_v46  ;;  %v3097_v28 = vrot.slane %v7657_v22, %v6736_v54  ;;  %v3101_v53 = vrot.slane %v7657_v22, %v8088_v26 }
 0x2eb   :  { %v4545_v27 = vcombine.low %v4536_v56, %v4543_v25  ;;  %v3105_v58 = vrot.slane %v7657_v22, %v6792_v0  ;;  %v3109_v33 = vrot.slane %v7657_v22, %v6803_v15  ;;  %v4561_v23 = vcombine.low %v3081_v31, %v3085_v3 }
 0x2ec   :  { %4852 = vperm.xlu1 %5305, %v4021_v42   ;;  %v4552_v39 = vrot.slane %v4544_v32, %v7178_v63  ;;  %v4562_v5 = vcombine.low %v3089_v50, %v3093_v44  ;;  %v4563_v59 = vcombine.low %v3097_v28, %v3101_v53  ;;  %v7802_v16 = vadd.f32 %v7174_v1, %v2146_v34 }
 0x2ed   :  { %v4559_v17 = vrot.slane %v4545_v27, %v7178_v63  ;;  %v4564_v7 = vcombine.low %v3105_v58, %v3109_v33  ;;  %v4571_v20 = vrot.slane %v4561_v23, %v7178_v63  ;;  %v3113_v41 = vrot.slane %v7683_v9, %v8084_v13 }
 0x2ee   :  { %v4578_v10 = vrot.slane %v4562_v5, %v7178_v63  ;;  %v4585_v22 = vrot.slane %v4563_v59, %v7178_v63  ;;  %v3117_v62 = vrot.slane %v7683_v9, %v8085_v6  ;;  %v3121_v40 = vrot.slane %v7683_v9, %v8086_v2 }
 0x2ef   :  { %v4560_v1 = vcombine.low %v4552_v39, %v4559_v17  ;;  %v4592_v24 = vrot.slane %v4564_v7, %v7178_v63  ;;  %v3125_v43 = vrot.slane %v7683_v9, %v8087_v61  ;;  %v3129_v18 = vrot.slane %v7683_v9, %v6736_v54 }
 0x2f0   :  { %v4593_v21 = vcombine.low %v4571_v20, %v4578_v10  ;;  %v3133_v57 = vrot.slane %v7683_v9, %v8088_v26  ;;  %v3137_v37 = vrot.slane %v7683_v9, %v6792_v0  ;;  %v3141_v8 = vrot.slane %v7683_v9, %v6803_v15 }
 0x2f1   :  { %4885 = vperm.xlu0 %5304, %v4560_v1   ;;  %v4594_v11 = vcombine.low %v4585_v22, %v4592_v24  ;;  %v4610_v19 = vcombine.low %v3113_v41, %v3117_v62  ;;  %v4611_v52 = vcombine.low %v3121_v40, %v3125_v43  ;;  %v3145_v48 = vrot.slane %v7730_v30, %v8084_v13 }
 0x2f2   :  { %v4601_v51 = vrot.slane %v4593_v21, %v7178_v63  ;;  %v4612_v29 = vcombine.low %v3129_v18, %v3133_v57  ;;  %v4613_v47 = vcombine.low %v3137_v37, %v3141_v8  ;;  %v3149_v35 = vrot.slane %v7730_v30, %v8085_v6 }
 0x2f3   :  { %v4608_v60 = vrot.slane %v4594_v11, %v7178_v63  ;;  %v4620_v38 = vrot.slane %v4610_v19, %v7178_v63  ;;  %v4627_v9 = vrot.slane %v4611_v52, %v7178_v63  ;;  %v3153_v36 = vrot.slane %v7730_v30, %v8086_v2 }
 0x2f4   :  { %v4634_v4 = vrot.slane %v4612_v29, %v7178_v63  ;;  %v4641_v49 = vrot.slane %v4613_v47, %v7178_v63  ;;  %v3157_v31 = vrot.slane %v7730_v30, %v8087_v61  ;;  %v3161_v45 = vrot.slane %v7730_v30, %v6736_v54 }
 0x2f5   :  { %v4609_v14 = vcombine.low %v4601_v51, %v4608_v60  ;;  %v4642_v46 = vcombine.low %v4620_v38, %v4627_v9  ;;  %v3165_v56 = vrot.slane %v7730_v30, %v8088_v26  ;;  %v3169_v25 = vrot.slane %v7730_v30, %v6792_v0 }
 0x2f6   :  { %v4643_v3 = vcombine.low %v4634_v4, %v4641_v49  ;;  %v3173_v50 = vrot.slane %v7730_v30, %v6803_v15  ;;  %v4659_v44 = vcombine.low %v3145_v48, %v3149_v35  ;;  %v4660_v34 = vcombine.low %v3153_v36, %v3157_v31 }
 0x2f7   :  { %4888 = vperm.xlu0 %5304, %v4609_v14   ;;  %v4650_v42 = vrot.slane %v4642_v46, %v7178_v63  ;;  %v4661_v32 = vcombine.low %v3161_v45, %v3165_v56  ;;  %v3177_v28 = vrot.slane %v7777_v55, %v8084_v13  ;;  %v3181_v53 = vrot.slane %v7777_v55, %v8085_v6  ;;  %v4811_v56 = vpop.permute.xlu1 %4810 }
 0x2f8   :  { %v4657_v27 = vrot.slane %v4643_v3, %v7178_v63  ;;  %v4662_v58 = vcombine.low %v3169_v25, %v3173_v50  ;;  %v4669_v33 = vrot.slane %v4659_v44, %v7178_v63  ;;  %v4676_v23 = vrot.slane %v4660_v34, %v7178_v63 }
 0x2f9   :  { %v4683_v30 = vrot.slane %v4661_v32, %v7178_v63  ;;  %v3185_v39 = vrot.slane %v7777_v55, %v8086_v2  ;;  %v3189_v5 = vrot.slane %v7777_v55, %v8087_v61  ;;  %v3193_v59 = vrot.slane %v7777_v55, %v6736_v54 }
 0x2fa   :  { %v4658_v17 = vcombine.low %v4650_v42, %v4657_v27  ;;  %v4690_v7 = vrot.slane %v4662_v58, %v7178_v63  ;;  %v4691_v20 = vcombine.low %v4669_v33, %v4676_v23  ;;  %v3197_v41 = vrot.slane %v7777_v55, %v8088_v26 }
 0x2fb   :  { %v3201_v10 = vrot.slane %v7777_v55, %v6792_v0  ;;  %v3205_v22 = vrot.slane %v7777_v55, %v6803_v15  ;;  %v4708_v62 = vcombine.low %v3177_v28, %v3181_v53  ;;  %v4709_v40 = vcombine.low %v3185_v39, %v3189_v5  ;;  %v4814_v25 = vpop.permute.xlu1 %4813  ;;  %v4808_v28 = vpop.permute.xlu0 %4807 }
 0x2fc   :  { %4891 = vperm.xlu0 %5304, %v4658_v17   ;;  %v4692_v1 = vcombine.low %v4683_v30, %v4690_v7  ;;  %v4699_v24 = vrot.slane %v4691_v20, %v7178_v63  ;;  %v4710_v43 = vcombine.low %v3193_v59, %v3197_v41  ;;  %v3209_v18 = vrot.slane %v7802_v16, %v8084_v13 }
 0x2fd   :  { %v4711_v21 = vcombine.low %v3201_v10, %v3205_v22  ;;  %v4718_v57 = vrot.slane %v4708_v62, %v7178_v63  ;;  %v4725_v37 = vrot.slane %v4709_v40, %v7178_v63  ;;  %v3213_v8 = vrot.slane %v7802_v16, %v8085_v6 }
 0x2fe   :  { %v4706_v55 = vrot.slane %v4692_v1, %v7178_v63  ;;  %v4732_v11 = vrot.slane %v4710_v43, %v7178_v63  ;;  %v3217_v19 = vrot.slane %v7802_v16, %v8086_v2  ;;  %v3221_v52 = vrot.slane %v7802_v16, %v8087_v61 }
 0x2ff   :  { %v4739_v13 = vrot.slane %v4711_v21, %v7178_v63  ;;  %v4740_v48 = vcombine.low %v4718_v57, %v4725_v37  ;;  %v3225_v51 = vrot.slane %v7802_v16, %v6736_v54  ;;  %v3229_v29 = vrot.slane %v7802_v16, %v8088_v26  ;;  %v4817_v3 = vpop.permute.xlu1 %4816 }
 0x300   :  { %v4707_v6 = vcombine.low %v4699_v24, %v4706_v55  ;;  %v3233_v47 = vrot.slane %v7802_v16, %v6792_v0  ;;  %v3237_v35 = vrot.slane %v7802_v16, %v6803_v15  ;;  %v4757_v2 = vcombine.low %v3209_v18, %v3213_v8 }
 0x301   :  { %v4741_v60 = vcombine.low %v4732_v11, %v4739_v13  ;;  %v4748_v61 = vrot.slane %v4740_v48, %v7178_v63  ;;  %v4758_v38 = vcombine.low %v3217_v19, %v3221_v52  ;;  %v4759_v9 = vcombine.low %v3225_v51, %v3229_v29 }
 0x302   :  { %4894 = vperm.xlu0 %5304, %v4707_v6   ;;  %v4760_v36 = vcombine.low %v3233_v47, %v3237_v35  ;;  %v4767_v54 = vrot.slane %v4757_v2, %v7178_v63  ;;  %v8089_v17 = vlaneseq }
 0x303   :  { %v4755_v4 = vrot.slane %v4741_v60, %v7178_v63  ;;  %v4774_v26 = vrot.slane %v4758_v38, %v7178_v63  ;;  %v4781_v49 = vrot.slane %v4759_v9, %v7178_v63  ;;  %v4820_v50 = vpop.permute.xlu1 %4819 }
 0x304   :  { %v4788_v0 = vrot.slane %v4760_v36, %v7178_v63  ;;  %v7926_v7 = vand.u32 127, %v8089_v17  ;;  %vm5110_vm0 = vcmp.lt.s32.totalorder %v8089_v17, 256 }
 0x305   :  { %v4756_v31 = vcombine.low %v4748_v61, %v4755_v4  ;;  %v4789_v15 = vcombine.low %v4767_v54, %v4774_v26 }
 0x306   :  { %v4790_v16 = vcombine.low %v4781_v49, %v4788_v0  ;;  %v4908_v10 = vadd.s32 4294967288, %v7926_v7  ;;  %v4915_v22 = vadd.s32 4294967280, %v7926_v7  ;;  %v4922_v62 = vadd.s32 4294967272, %v7926_v7 }
 0x307   :  { %4897 = vperm.xlu0 %5304, %v4756_v31   ;;  %v4797_v45 = vrot.slane %v4789_v15, %v7178_v63  ;;  %v7899_v44 = vpop.permute.xlu1 %4822  ;;  %v4929_v40 = vadd.s32 4294967264, %v7926_v7  ;;  %v4936_v43 = vadd.s32 4294967256, %v7926_v7  ;;  %v4943_v57 = vadd.s32 4294967248, %v7926_v7 }
 0x308   :  { %v4804_v14 = vrot.slane %v4790_v16, %v7178_v63  ;;  %v4911_v24 = vsub.s32 %v4908_v10, %v8083_v12  ;;  %v4918_v21 = vsub.s32 %v4915_v22, %v8083_v12  ;;  %v4906_v37 = vsub.s32 %v7926_v7, %v8083_v12 }
 0x309   :  { %v7947_v8 = vsub.s32 %v4922_v62, %v8083_v12  ;;  %v7950_v55 = vsub.s32 %v4929_v40, %v8083_v12  ;;  %v4950_v11 = vadd.s32 4294967240, %v7926_v7  ;;  %v7956_v13 = vsub.s32 %v4936_v43, %v8083_v12 }
 0x30a   :  { %v4805_v46 = vcombine.low %v4797_v45, %v4804_v14  ;;  %v4912_v52 = vrot.slane %v4811_v56, %v4911_v24  ;;  %v4919_v48 = vrot.slane %v4814_v25, %v4918_v21  ;;  %v7959_v51 = vsub.s32 %v4943_v57, %v8083_v12 }
 0x30b   :  { %v7901_v34 = vpop.permute.xlu1 %4825  ;;  %v4957_v29 = vadd.s32 4294967232, %v7926_v7  ;;  %v4907_v6 = vrot.slane %v4808_v28, %v4906_v37  ;;  %v4926_v47 = vrot.slane %v4817_v3, %v7947_v8  ;;  %v4933_v2 = vrot.slane %v4820_v50, %v7950_v55 }
 0x30c   :  { %4900 = vperm.xlu0 %5304, %v4805_v46   ;;  %v7967_v60 = vsub.s32 %v4950_v11, %v8083_v12  ;;  %v4940_v9 = vrot.slane %v7899_v44, %v7956_v13  ;;  %v4947_v54 = vrot.slane %v7901_v34, %v7959_v51  ;;  %v4964_v49 = vadd.s32 4294967224, %v7926_v7 }
 0x30d   :  { %v4914_v38 = vsel %vm4913_vm1, %v4912_v52, %v4907_v6  ;;  %v4960_v4 = vsub.s32 %v4957_v29, %v8083_v12  ;;  %v4971_v14 = vadd.s32 4294967216, %v7926_v7  ;;  %v4978_v44 = vadd.s32 4294967208, %v7926_v7 }
 0x30e   :  { %v4921_v36 = vsel %vm4920_vm2, %v4919_v48, %v4914_v38  ;;  %v4967_v50 = vsub.s32 %v4964_v49, %v8083_v12  ;;  %v4992_v22 = vadd.s32 4294967192, %v7926_v7 }
 0x30f   :  { %v7903_v42 = vpop.permute.xlu1 %4828  ;;  %v4928_v26 = vsel %vm4927_vm3, %v4926_v47, %v4921_v36  ;;  %v4974_v10 = vsub.s32 %v4971_v14, %v8083_v12 }
 0x310   :  { %v4935_v0 = vsel %vm4934_vm4, %v4933_v2, %v4928_v26  ;;  %v4954_v31 = vrot.slane %v7903_v42, %v7967_v60 }
 0x311   :  { %v4942_v45 = vsel %vm4941_vm5, %v4940_v9, %v4935_v0 }
 0x312   :  { %v4949_v56 = vsel %vm4948_vm6, %v4947_v54, %v4942_v45 }
 0x313   :  { %v7905_v32 = vpop.permute.xlu1 %4831  ;;  %v7909_v27 = vpop.permute.xlu0 %4834  ;;  %v4956_v28 = vsel %vm4955_vm7, %v4954_v31, %v4949_v56 }
 0x314   :  { %v4961_v25 = vrot.slane %v7905_v32, %v4960_v4  ;;  %v4968_v52 = vrot.slane %v7909_v27, %v4967_v50 }
 0x318   :  { %v7907_v53 = vpop.permute.xlu1 %4837 }
 0x319   :  { %v4975_v29 = vrot.slane %v7907_v53, %v4974_v10 }
 0x31e   :  { %v7913_v33 = vpop.permute.xlu1 %4840 }
 0x323   :  { %v7917_v30 = vpop.permute.xlu1 %4843 }
 0x329   :  { %v7923_v59 = vpop.permute.xlu1 %4846 }
 0x32f   :  { %v7930_v41 = vpop.permute.xlu1 %4855 }
 0x330   :  { %v5016_v34 = vrot.slane %v7930_v41, %v4906_v37 }
 0x334   :  { %v7911_v58 = vpop.permute.xlu0 %4858 }
 0x335   :  { %v5020_v46 = vrot.slane %v7911_v58, %v4911_v24  ;;  %v4985_v58 = vadd.s32 4294967200, %v7926_v7 }
 0x337   :  { %v5021_v62 = vsel %vm4913_vm1, %v5020_v46, %v5016_v34 }
 0x33a   :  { %v7936_v1 = vpop.permute.xlu1 %4861 }
 0x33b   :  { %v5025_v3 = vrot.slane %v7936_v1, %v4918_v21  ;;  %v4999_v1 = vadd.s32 4294967184, %v7926_v7  ;;  %v4981_v21 = vsub.s32 %v4978_v44, %v8083_v12 }
 0x33d   :  { %v4982_v47 = vrot.slane %v7913_v33, %v4981_v21 }
 0x33f   :  { %v7915_v23 = vpop.permute.xlu0 %4864 }
 0x340   :  { %v5030_v42 = vrot.slane %v7915_v23, %v7947_v8  ;;  %v5026_v23 = vsel %vm4920_vm2, %v5025_v3, %v5021_v62  ;;  %v5006_v8 = vadd.s32 4294967176, %v7926_v7  ;;  %v5002_v7 = vsub.s32 %v4999_v1, %v8083_v12 }
 0x342   :  { %v5031_v57 = vsel %vm4927_vm3, %v5030_v42, %v5026_v23  ;;  %v5009_v27 = vsub.s32 %v5006_v8, %v8083_v12 }
 0x345   :  { %v7953_v19 = vpop.permute.xlu1 %4867 }
 0x346   :  { %v5035_v32 = vrot.slane %v7953_v19, %v7950_v55  ;;  %v4988_v55 = vsub.s32 %v4985_v58, %v8083_v12 }
 0x348   :  { %v5036_v11 = vsel %vm4934_vm4, %v5035_v32, %v5031_v57  ;;  %v4989_v38 = vrot.slane %v7917_v30, %v4988_v55 }
 0x34a   :  { %v7919_v39 = vpop.permute.xlu0 %4870 }
 0x34b   :  { %v5040_v41 = vrot.slane %v7919_v39, %v7956_v13  ;;  %v4963_v39 = vsel %vm4962_vm8, %v4961_v25, %v4956_v28  ;;  %v4995_v13 = vsub.s32 %v4992_v22, %v8083_v12 }
 0x34c   :  { %v4970_v36 = vsel %vm4969_vm9, %v4968_v52, %v4963_v39 }
 0x34d   :  { %v5041_v48 = vsel %vm4941_vm5, %v5040_v41, %v5036_v11  ;;  %v4977_v12 = vsel %vm4976_vm10, %v4975_v29, %v4970_v36 }
 0x34e   :  { %v4984_v30 = vsel %vm4983_vm11, %v4982_v47, %v4977_v12 }
 0x34f   :  { %v4991_v31 = vsel %vm4990_vm12, %v4989_v38, %v4984_v30 }
 0x350   :  { %v4874_v61 = vpop.permute.xlu1 %4873 }
 0x351   :  { %v5045_v40 = vrot.slane %v4874_v61, %v7959_v51 }
 0x355   :  { %v7921_v5 = vpop.permute.xlu0 %4876 }
 0x356   :  { %v5050_v37 = vrot.slane %v7921_v5, %v7967_v60  ;;  %v5046_v5 = vsel %vm4948_vm6, %v5045_v40, %v5041_v48 }
 0x358   :  { %v5051_v2 = vsel %vm4955_vm7, %v5050_v37, %v5046_v5 }
 0x35b   :  { %v4880_v15 = vpop.permute.xlu1 %4879 }
 0x35c   :  { %v5055_v19 = vrot.slane %v4880_v15, %v4960_v4 }
 0x35e   :  { %v5056_v53 = vsel %vm4962_vm8, %v5055_v19, %v5051_v2 }
 0x360   :  { %v7928_v20 = vpop.permute.xlu0 %4882 }
 0x361   :  { %v5060_v51 = vrot.slane %v7928_v20, %v4967_v50 }
 0x363   :  { %v5061_v33 = vsel %vm4969_vm9, %v5060_v51, %v5056_v53 }
 0x366   :  { %v4850_v24 = vpop.permute.xlu1 %4849 }
 0x367   :  { %v5003_v4 = vrot.slane %v4850_v24, %v5002_v7 }
 0x36b   :  { %v4853_v20 = vpop.permute.xlu1 %4852 }
 0x36c   :  { %v5010_v49 = vrot.slane %v4853_v20, %v5009_v27 }
 0x370   :  { %v7940_v18 = vpop.permute.xlu0 %4885 }
 0x371   :  { %v5065_v6 = vrot.slane %v7940_v18, %v4974_v10  ;;  %v4996_v18 = vrot.slane %v7923_v59, %v4995_v13 }
 0x376   :  { %v7963_v35 = vpop.permute.xlu0 %4888 }
 0x377   :  { %v5070_v60 = vrot.slane %v7963_v35, %v4981_v21  ;;  %v5066_v35 = vsel %vm4976_vm10, %v5065_v6, %v5061_v33 }
 0x379   :  { %v5071_v0 = vsel %vm4983_vm11, %v5070_v60, %v5066_v35 }
 0x37b   :  { %v7981_v16 = vpop.permute.xlu0 %4891 }
 0x37c   :  { %v5075_v9 = vrot.slane %v7981_v16, %v4988_v55  ;;  %v4998_v16 = vsel %vm4997_vm13, %v4996_v18, %v4991_v31 }
 0x37d   :  { %v5005_v46 = vsel %vm5004_vm14, %v5003_v4, %v4998_v16 }
 0x37e   :  { %v5076_v59 = vsel %vm4990_vm12, %v5075_v9, %v5071_v0  ;;  %v5012_v25 = vsel %vm5011_vm15, %v5010_v49, %v5005_v46 }
 0x381   :  { %v4895_v43 = vpop.permute.xlu0 %4894 }
 0x382   :  { %v5080_v54 = vrot.slane %v4895_v43, %v4995_v13 }
 0x384   :  { %v5081_v45 = vsel %vm4997_vm13, %v5080_v54, %v5076_v59 }
 0x386   :  { %v4898_v61 = vpop.permute.xlu0 %4897 }
 0x387   :  { %v5085_v26 = vrot.slane %v4898_v61, %v5002_v7 }
 0x389   :  { %v5086_v56 = vsel %vm5004_vm14, %v5085_v26, %v5081_v45 }
 0x38b   :  { %v4901_v15 = vpop.permute.xlu0 %4900 }
 0x38c   :  { %v5090_v14 = vrot.slane %v4901_v15, %v5009_v27 }
 0x38e   :  { %v5091_v3 = vsel %vm5011_vm15, %v5090_v14, %v5086_v56 }
 0x38f   :  { %v5092_v50 = vcombine.low %v5012_v25, %v5091_v3 }
 0x391   :  { %v5099_v44 = vrot.slane %v5092_v50, %v7178_v63 }
 0x393   :  { %v5106_v34 = vrot.slane %v5099_v44, %v7178_v63 }
 0x395   :  { %5112 = vst.msk [vmem:[#allocation11] sm:$0x3] %vm5110_vm0, %v5106_v34 }
 0x396   :  { %5919 = shalt.err (!%p5916_p8)
}
 0x397   :  { %s5920_s21 = scalar_lea.hbm %s8060_s5, 32 }
 0x398   :  { %p5921_p9 = scmp.ne.s32.totalorder %s8060_s5, %s5920_s21  ;;  %p5924_p10 = scmp.lt.u32.totalorder %s5920_s21, %s8060_s5 }
 0x39a   :  { %p5926_p11 = pnand %p5924_p10, %p5921_p9 }
 0x39c   :  { %5929 = shalt.err (!%p5926_p11)
}
 0x39d   :  { %5122 = dma.vmem_to_hbm [thread:$0]  %s5120_s1, 32, %s8060_s5, [#allocation5]  }
 0x39e   :  { %5936 = dma.done.wait [#allocation5], 32  }
 0x39f   :  { %5937 = vsyncadd [#allocation5], 4294967264 }
 0x3a0   :  { %5126 = vsyncpa [#allocation4], 1 }
 0x3a1   :  { %5127 = vsyncpa [#allocation7], 1 }
 0x3a2   :  { %5128 = vsyncpa [#allocation10], 1 }
 0x3a3   :  { %5129 = vsyncpa [#allocation5], 1 }

</bundles_post_ra>
